<compile_context>
chip_gen: v6e
topology: v6e:2x2x1
jax: 0.10.0
libtpu: 0.0.40
codegen_flags: <defaults>
</compile_context>

<pallas_src>
import jax
import jax.numpy as jnp
from jax import lax
from jax.experimental import pallas as pl
from jax.experimental.pallas import tpu as pltpu


_VMEM = pl.BlockSpec(memory_space=pltpu.MemorySpace.VMEM)


# ----------------------------------------------------------------------------
# Fused Pallas kernel
# ----------------------------------------------------------------------------
def _make_fused_gru_kernel(T, B, H):
    """Builds the fused kernel with static T, B, H baked in."""

    def kernel(x_ref,                                   # (T*B, E) time-major, flattened
               w0f_ih, w0f_hh, b0f_i, b0f_hn,           # layer 0, forward
               w0b_ih, w0b_hh, b0b_i, b0b_hn,           # layer 0, backward
               w1f_ihf, w1f_ihb, w1f_hh, b1f_i, b1f_hn,  # layer 1, forward
               w1b_ihf, w1b_ihb, w1b_hh, b1b_i, b1b_hn,  # layer 1, backward
               wout_f, wout_b, bout,                    # linear head (split 2H -> H+H)
               out_ref,                                 # (B, Dout)
               l0f_scr, l0b_scr):                       # VMEM scratch (T*B, H) each
        f32 = jnp.float32

        def dot(a, b):
            return jnp.dot(a, b, preferred_element_type=f32)

        def gru_step(h, gi_r, gi_z, gi_n, whh_ref, bhn):
            # gi_* already contain x@W_i* plus folded biases (b_i*, and b_h*
            # for r/z). Only the three h@W_h* matmuls are on the serial path.
            hr = dot(h, whh_ref[0])
            hz = dot(h, whh_ref[1])
            hn = dot(h, whh_ref[2])
            r = jax.nn.sigmoid(gi_r + hr)
            z = jax.nn.sigmoid(gi_z + hz)
            n = jnp.tanh(gi_n + r * (hn + bhn))
            return n + z * (h - n)                      # == (1-z)*n + z*h

        x = x_ref[...]                                  # (T*B, E)

        # ---- layer 0: hoisted input projections (one matmul per gate/dir).
        gi0f = [dot(x, w0f_ih[g]) + b0f_i[g] for g in range(3)]   # 3 x (T*B, H)
        gi0b = [dot(x, w0b_ih[g]) + b0b_i[g] for g in range(3)]

        # hoisted bias broadcasts (JAX does not CSE broadcast_in_dim in loops)
        b0f_hn_b = jnp.broadcast_to(b0f_hn[...], (B, H))
        b0b_hn_b = jnp.broadcast_to(b0b_hn[...], (B, H))

        h0f = jnp.zeros((B, H), f32)
        h0b = jnp.zeros((B, H), f32)
        h0b_last = None                                 # bwd hidden at original t=T-1
        # fully unrolled time loop; fwd / bwd chains interleaved.
        for t in range(T):
            tb = T - 1 - t                              # original time of the bwd step
            h0f = gru_step(h0f,
                           gi0f[0][t * B:(t + 1) * B],
                           gi0f[1][t * B:(t + 1) * B],
                           gi0f[2][t * B:(t + 1) * B],
                           w0f_hh, b0f_hn_b)
            h0b = gru_step(h0b,
                           gi0b[0][tb * B:(tb + 1) * B],
                           gi0b[1][tb * B:(tb + 1) * B],
                           gi0b[2][tb * B:(tb + 1) * B],
                           w0b_hh, b0b_hn_b)
            l0f_scr[pl.ds(t * B, B), :] = h0f           # layer-0 outputs stay in VMEM
            l0b_scr[pl.ds(tb * B, B), :] = h0b
            if t == 0:
                h0b_last = h0b                          # seen only the last token

        # ---- layer 1 forward: hoisted input projection over all timesteps.
        # input at time t is concat(l0f[t], l0b[t]); weights were pre-split so
        # this is two matmuls per gate instead of a lane-axis concat.
        l0f_all = l0f_scr[...]                          # (T*B, H)
        l0b_all = l0b_scr[...]
        gi1f = [dot(l0f_all, w1f_ihf[g]) + dot(l0b_all, w1f_ihb[g]) + b1f_i[g]
                for g in range(3)]

        b1f_hn_b = jnp.broadcast_to(b1f_hn[...], (B, H))
        h1f = jnp.zeros((B, H), f32)
        for t in range(T):
            h1f = gru_step(h1f,
                           gi1f[0][t * B:(t + 1) * B],
                           gi1f[1][t * B:(t + 1) * B],
                           gi1f[2][t * B:(t + 1) * B],
                           w1f_hh, b1f_hn_b)

        # ---- layer 1 backward: only its state at original t = T-1 feeds the
        # head, i.e. a single GRU step from h=0 on the last timestep's input.
        gi1b = [dot(h0f, w1b_ihf[g]) + dot(h0b_last, w1b_ihb[g]) + b1b_i[g]
                for g in range(3)]
        b1b_hn_b = jnp.broadcast_to(b1b_hn[...], (B, H))
        h1b = gru_step(jnp.zeros((B, H), f32),
                       gi1b[0], gi1b[1], gi1b[2], w1b_hh, b1b_hn_b)

        # ---- fused linear head: out = [h1f, h1b] @ W_out.T + b_out
        out_ref[...] = dot(h1f, wout_f[...]) + dot(h1b, wout_b[...]) + bout[...]

    return kernel


# ----------------------------------------------------------------------------
# Weight pre-processing (wrapper-level, plain XLA; gate order r, z, n)
# ----------------------------------------------------------------------------
def _prep_gru_dir(w_ih, w_hh, b_ih, b_hh):
    """PyTorch (3H, Din)/(3H, H)/(3H,)/(3H,) -> per-gate, pre-transposed, bias-folded."""
    H = w_hh.shape[1]
    din = w_ih.shape[1]
    wih = jnp.transpose(w_ih.reshape(3, H, din), (0, 2, 1))     # (3, Din, H), x @ wih[g]
    whh = jnp.transpose(w_hh.reshape(3, H, H), (0, 2, 1))       # (3, H, H),   h @ whh[g]
    bi = b_ih.reshape(3, 1, H)
    bh = b_hh.reshape(3, 1, H)
    b_fold = bi.at[0:2].add(bh[0:2])                            # fold b_hr, b_hz; keep n split
    b_hn = bh[2]                                                # (1, H)
    return wih, whh, b_fold, b_hn


# ----------------------------------------------------------------------------
# Model forward (matches PyTorch GRUModel.forward)
# ----------------------------------------------------------------------------
def gru_model_forward(text, params):
    B, T = text.shape
    E = params["embedding"].shape[1]
    H = params["l0_fwd"][1].shape[1]
    d_out = params["out_w"].shape[0]

    # Embedding gather + time-major flatten: the only XLA glue.
    emb = jnp.take(params["embedding"], text, axis=0)           # (B, T, E)
    x2d = jnp.transpose(emb, (1, 0, 2)).reshape(T * B, E).astype(jnp.float32)

    p0f = _prep_gru_dir(*params["l0_fwd"])
    p0b = _prep_gru_dir(*params["l0_bwd"])
    p1f = _prep_gru_dir(*params["l1_fwd"])
    p1b = _prep_gru_dir(*params["l1_bwd"])
    # layer-1 input weights split into the parts that see l0-fwd vs l0-bwd.
    w1f_ihf, w1f_ihb = p1f[0][:, :H, :], p1f[0][:, H:, :]
    w1b_ihf, w1b_ihb = p1b[0][:, :H, :], p1b[0][:, H:, :]

    wout_t = params["out_w"].T                                  # (2H, Dout)
    wout_f, wout_b = wout_t[:H], wout_t[H:]
    bout = params["out_b"][None, :]

    kernel = _make_fused_gru_kernel(T, B, H)
    return pl.pallas_call(
        kernel,
        out_shape=jax.ShapeDtypeStruct((B, d_out), jnp.float32),
        in_specs=[_VMEM] * 22,
        out_specs=_VMEM,
        scratch_shapes=[pltpu.VMEM((T * B, H), jnp.float32),
                        pltpu.VMEM((T * B, H), jnp.float32)],
    )(x2d,
      p0f[0], p0f[1], p0f[2], p0f[3],
      p0b[0], p0b[1], p0b[2], p0b[3],
      w1f_ihf, w1f_ihb, p1f[1], p1f[2], p1f[3],
      w1b_ihf, w1b_ihb, p1b[1], p1b[2], p1b[3],
      wout_f, wout_b, bout)


# ----------------------------------------------------------------------------
# Pure-JAX reference (mirrors PyTorch nn.GRU semantics) for a sanity check
# ----------------------------------------------------------------------------
def gru_model_reference(text, params):
    emb = jnp.take(params["embedding"], text, axis=0).astype(jnp.float32)  # (B,T,E)
    x = jnp.transpose(emb, (1, 0, 2))                                      # (T,B,E)
    T, B, _ = x.shape

    def run_dir(xs, w_ih, w_hh, b_ih, b_hh):
        H = w_hh.shape[1]
        h = jnp.zeros((B, H), jnp.float32)
        outs = []
        for t in range(xs.shape[0]):
            gi = xs[t] @ w_ih.T + b_ih
            gh = h @ w_hh.T + b_hh
            i_r, i_z, i_n = gi[:, :H], gi[:, H:2 * H], gi[:, 2 * H:]
            h_r, h_z, h_n = gh[:, :H], gh[:, H:2 * H], gh[:, 2 * H:]
            r = jax.nn.sigmoid(i_r + h_r)
            z = jax.nn.sigmoid(i_z + h_z)
            n = jnp.tanh(i_n + r * h_n)
            h = (1.0 - z) * n + z * h
            outs.append(h)
        return jnp.stack(outs)                                             # (T,B,H)

    layer_in = x
    for layer in range(2):
        f = run_dir(layer_in, *params[f"l{layer}_fwd"])
        b = run_dir(layer_in[::-1], *params[f"l{layer}_bwd"])[::-1]
        layer_in = jnp.concatenate([f, b], axis=-1)
    return layer_in[-1] @ params["out_w"].T + params["out_b"]


# ----------------------------------------------------------------------------
# Deterministic parameter init (shapes per nn.Embedding / nn.GRU / nn.Linear)
# ----------------------------------------------------------------------------
def init_params(key, obs_size, word_embedding_size=32, hidden_dim=32,
                text_embedding_size=32):
    keys = iter(jax.random.split(key, 32))
    scale = 1.0 / jnp.sqrt(jnp.float32(hidden_dim))

    def u(shape):
        return jax.random.uniform(next(keys), shape, jnp.float32, -scale, scale)

    params = {
        "embedding": jax.random.normal(next(keys),
                                       (obs_size, word_embedding_size),
                                       jnp.float32)
    }
    in_sizes = [word_embedding_size, 2 * hidden_dim]
    for layer in range(2):
        for direction in ("fwd", "bwd"):
            params[f"l{layer}_{direction}"] = (
                u((3 * hidden_dim, in_sizes[layer])),   # weight_ih
                u((3 * hidden_dim, hidden_dim)),        # weight_hh
                u((3 * hidden_dim,)),                   # bias_ih
                u((3 * hidden_dim,)),                   # bias_hh
            )
    params["out_w"] = u((text_embedding_size, 2 * hidden_dim))
    params["out_b"] = u((text_embedding_size,))
    return params


if __name__ == "__main__":
    key = jax.random.PRNGKey(0)
    pkey, tkey = jax.random.split(key)

    obs_size, batch, seq_len = 50, 2, 8
    params = init_params(pkey, obs_size)
    text = jax.random.randint(tkey, (batch, seq_len), 0, obs_size,
                              dtype=jnp.int32)

    fwd = jax.jit(gru_model_forward)
    out = jax.block_until_ready(fwd(text, params))

    ref = jax.block_until_ready(jax.jit(gru_model_reference)(text, params))

    assert out.shape == (batch, 32) and out.dtype == jnp.float32
    assert jnp.allclose(out, ref, atol=2e-2, rtol=2e-2), (
        "kernel/reference mismatch, max abs diff = "
        f"{float(jnp.max(jnp.abs(out - ref)))}")
    print("KERNEL_OK")
</pallas_src>

<mosaic_0001>
module attributes {stable_mosaic.version = 11 : i64} {
  func.func @kernel(%arg0: memref<16x32xf32, #tpu.memory_space<vmem>>, %arg1: memref<3x32x32xf32, #tpu.memory_space<vmem>>, %arg2: memref<3x32x32xf32, #tpu.memory_space<vmem>>, %arg3: memref<3x1x32xf32, #tpu.memory_space<vmem>>, %arg4: memref<1x32xf32, #tpu.memory_space<vmem>>, %arg5: memref<3x32x32xf32, #tpu.memory_space<vmem>>, %arg6: memref<3x32x32xf32, #tpu.memory_space<vmem>>, %arg7: memref<3x1x32xf32, #tpu.memory_space<vmem>>, %arg8: memref<1x32xf32, #tpu.memory_space<vmem>>, %arg9: memref<3x32x32xf32, #tpu.memory_space<vmem>>, %arg10: memref<3x32x32xf32, #tpu.memory_space<vmem>>, %arg11: memref<3x32x32xf32, #tpu.memory_space<vmem>>, %arg12: memref<3x1x32xf32, #tpu.memory_space<vmem>>, %arg13: memref<1x32xf32, #tpu.memory_space<vmem>>, %arg14: memref<3x32x32xf32, #tpu.memory_space<vmem>>, %arg15: memref<3x32x32xf32, #tpu.memory_space<vmem>>, %arg16: memref<3x32x32xf32, #tpu.memory_space<vmem>>, %arg17: memref<3x1x32xf32, #tpu.memory_space<vmem>>, %arg18: memref<1x32xf32, #tpu.memory_space<vmem>>, %arg19: memref<32x32xf32, #tpu.memory_space<vmem>>, %arg20: memref<32x32xf32, #tpu.memory_space<vmem>>, %arg21: memref<1x32xf32, #tpu.memory_space<vmem>>, %arg22: memref<2x32xf32, #tpu.memory_space<vmem>>, %arg23: memref<16x32xf32, #tpu.memory_space<vmem>>, %arg24: memref<16x32xf32, #tpu.memory_space<vmem>>) attributes {dimension_semantics = [], scalar_prefetch = 0 : i64, scratch_operands = 2 : i64, tpu.core_type = #tpu.core_type<tc>} {
    %c0 = arith.constant 0 : index
    %c0_0 = arith.constant 0 : index
    %0 = vector.load %arg0[%c0, %c0_0] : memref<16x32xf32, #tpu.memory_space<vmem>>, vector<16x32xf32>
    %c0_1 = arith.constant 0 : index
    %c0_2 = arith.constant 0 : index
    %c0_3 = arith.constant 0 : index
    %1 = vector.load %arg1[%c0_1, %c0_2, %c0_3] : memref<3x32x32xf32, #tpu.memory_space<vmem>>, vector<1x32x32xf32>
    %2 = vector.shape_cast %1 : vector<1x32x32xf32> to vector<32x32xf32>
    %cst = arith.constant dense<0.000000e+00> : vector<16x32xf32>
    %3 = tpu.matmul %0, %2, %cst {dimension_numbers = #tpu.dot_dimension_numbers<[1], [0], [0], [1], [0, 0, 1, 1], [], []>} : vector<16x32xf32>, vector<32x32xf32>, vector<16x32xf32> -> vector<16x32xf32>
    %c0_4 = arith.constant 0 : index
    %c0_5 = arith.constant 0 : index
    %c0_6 = arith.constant 0 : index
    %4 = vector.load %arg3[%c0_4, %c0_5, %c0_6] : memref<3x1x32xf32, #tpu.memory_space<vmem>>, vector<1x1x32xf32>
    %5 = vector.shape_cast %4 : vector<1x1x32xf32> to vector<1x32xf32>
    %6 = vector.broadcast %5 : vector<1x32xf32> to vector<16x32xf32>
    %7 = arith.addf %3, %6 : vector<16x32xf32>
    %c1 = arith.constant 1 : index
    %c0_7 = arith.constant 0 : index
    %c0_8 = arith.constant 0 : index
    %8 = vector.load %arg1[%c1, %c0_7, %c0_8] : memref<3x32x32xf32, #tpu.memory_space<vmem>>, vector<1x32x32xf32>
    %9 = vector.shape_cast %8 : vector<1x32x32xf32> to vector<32x32xf32>
    %cst_9 = arith.constant dense<0.000000e+00> : vector<16x32xf32>
    %10 = tpu.matmul %0, %9, %cst_9 {dimension_numbers = #tpu.dot_dimension_numbers<[1], [0], [0], [1], [0, 0, 1, 1], [], []>} : vector<16x32xf32>, vector<32x32xf32>, vector<16x32xf32> -> vector<16x32xf32>
    %c1_10 = arith.constant 1 : index
    %c0_11 = arith.constant 0 : index
    %c0_12 = arith.constant 0 : index
    %11 = vector.load %arg3[%c1_10, %c0_11, %c0_12] : memref<3x1x32xf32, #tpu.memory_space<vmem>>, vector<1x1x32xf32>
    %12 = vector.shape_cast %11 : vector<1x1x32xf32> to vector<1x32xf32>
    %13 = vector.broadcast %12 : vector<1x32xf32> to vector<16x32xf32>
    %14 = arith.addf %10, %13 : vector<16x32xf32>
    %c2 = arith.constant 2 : index
    %c0_13 = arith.constant 0 : index
    %c0_14 = arith.constant 0 : index
    %15 = vector.load %arg1[%c2, %c0_13, %c0_14] : memref<3x32x32xf32, #tpu.memory_space<vmem>>, vector<1x32x32xf32>
    %16 = vector.shape_cast %15 : vector<1x32x32xf32> to vector<32x32xf32>
    %cst_15 = arith.constant dense<0.000000e+00> : vector<16x32xf32>
    %17 = tpu.matmul %0, %16, %cst_15 {dimension_numbers = #tpu.dot_dimension_numbers<[1], [0], [0], [1], [0, 0, 1, 1], [], []>} : vector<16x32xf32>, vector<32x32xf32>, vector<16x32xf32> -> vector<16x32xf32>
    %c2_16 = arith.constant 2 : index
    %c0_17 = arith.constant 0 : index
    %c0_18 = arith.constant 0 : index
    %18 = vector.load %arg3[%c2_16, %c0_17, %c0_18] : memref<3x1x32xf32, #tpu.memory_space<vmem>>, vector<1x1x32xf32>
    %19 = vector.shape_cast %18 : vector<1x1x32xf32> to vector<1x32xf32>
    %20 = vector.broadcast %19 : vector<1x32xf32> to vector<16x32xf32>
    %21 = arith.addf %17, %20 : vector<16x32xf32>
    %c0_19 = arith.constant 0 : index
    %c0_20 = arith.constant 0 : index
    %c0_21 = arith.constant 0 : index
    %22 = vector.load %arg5[%c0_19, %c0_20, %c0_21] : memref<3x32x32xf32, #tpu.memory_space<vmem>>, vector<1x32x32xf32>
    %23 = vector.shape_cast %22 : vector<1x32x32xf32> to vector<32x32xf32>
    %cst_22 = arith.constant dense<0.000000e+00> : vector<16x32xf32>
    %24 = tpu.matmul %0, %23, %cst_22 {dimension_numbers = #tpu.dot_dimension_numbers<[1], [0], [0], [1], [0, 0, 1, 1], [], []>} : vector<16x32xf32>, vector<32x32xf32>, vector<16x32xf32> -> vector<16x32xf32>
    %c0_23 = arith.constant 0 : index
    %c0_24 = arith.constant 0 : index
    %c0_25 = arith.constant 0 : index
    %25 = vector.load %arg7[%c0_23, %c0_24, %c0_25] : memref<3x1x32xf32, #tpu.memory_space<vmem>>, vector<1x1x32xf32>
    %26 = vector.shape_cast %25 : vector<1x1x32xf32> to vector<1x32xf32>
    %27 = vector.broadcast %26 : vector<1x32xf32> to vector<16x32xf32>
    %28 = arith.addf %24, %27 : vector<16x32xf32>
    %c1_26 = arith.constant 1 : index
    %c0_27 = arith.constant 0 : index
    %c0_28 = arith.constant 0 : index
    %29 = vector.load %arg5[%c1_26, %c0_27, %c0_28] : memref<3x32x32xf32, #tpu.memory_space<vmem>>, vector<1x32x32xf32>
    %30 = vector.shape_cast %29 : vector<1x32x32xf32> to vector<32x32xf32>
    %cst_29 = arith.constant dense<0.000000e+00> : vector<16x32xf32>
    %31 = tpu.matmul %0, %30, %cst_29 {dimension_numbers = #tpu.dot_dimension_numbers<[1], [0], [0], [1], [0, 0, 1, 1], [], []>} : vector<16x32xf32>, vector<32x32xf32>, vector<16x32xf32> -> vector<16x32xf32>
    %c1_30 = arith.constant 1 : index
    %c0_31 = arith.constant 0 : index
    %c0_32 = arith.constant 0 : index
    %32 = vector.load %arg7[%c1_30, %c0_31, %c0_32] : memref<3x1x32xf32, #tpu.memory_space<vmem>>, vector<1x1x32xf32>
    %33 = vector.shape_cast %32 : vector<1x1x32xf32> to vector<1x32xf32>
    %34 = vector.broadcast %33 : vector<1x32xf32> to vector<16x32xf32>
    %35 = arith.addf %31, %34 : vector<16x32xf32>
    %c2_33 = arith.constant 2 : index
    %c0_34 = arith.constant 0 : index
    %c0_35 = arith.constant 0 : index
    %36 = vector.load %arg5[%c2_33, %c0_34, %c0_35] : memref<3x32x32xf32, #tpu.memory_space<vmem>>, vector<1x32x32xf32>
    %37 = vector.shape_cast %36 : vector<1x32x32xf32> to vector<32x32xf32>
    %cst_36 = arith.constant dense<0.000000e+00> : vector<16x32xf32>
    %38 = tpu.matmul %0, %37, %cst_36 {dimension_numbers = #tpu.dot_dimension_numbers<[1], [0], [0], [1], [0, 0, 1, 1], [], []>} : vector<16x32xf32>, vector<32x32xf32>, vector<16x32xf32> -> vector<16x32xf32>
    %c2_37 = arith.constant 2 : index
    %c0_38 = arith.constant 0 : index
    %c0_39 = arith.constant 0 : index
    %39 = vector.load %arg7[%c2_37, %c0_38, %c0_39] : memref<3x1x32xf32, #tpu.memory_space<vmem>>, vector<1x1x32xf32>
    %40 = vector.shape_cast %39 : vector<1x1x32xf32> to vector<1x32xf32>
    %41 = vector.broadcast %40 : vector<1x32xf32> to vector<16x32xf32>
    %42 = arith.addf %38, %41 : vector<16x32xf32>
    %c0_40 = arith.constant 0 : index
    %c0_41 = arith.constant 0 : index
    %43 = vector.load %arg4[%c0_40, %c0_41] : memref<1x32xf32, #tpu.memory_space<vmem>>, vector<1x32xf32>
    %44 = vector.shape_cast %43 : vector<1x32xf32> to vector<1x32xf32>
    %45 = vector.broadcast %44 : vector<1x32xf32> to vector<2x32xf32>
    %c0_42 = arith.constant 0 : index
    %c0_43 = arith.constant 0 : index
    %46 = vector.load %arg8[%c0_42, %c0_43] : memref<1x32xf32, #tpu.memory_space<vmem>>, vector<1x32xf32>
    %47 = vector.shape_cast %46 : vector<1x32xf32> to vector<1x32xf32>
    %48 = vector.broadcast %47 : vector<1x32xf32> to vector<2x32xf32>
    %cst_44 = arith.constant 0.000000e+00 : f32
    %49 = vector.broadcast %cst_44 : f32 to vector<2x32xf32>
    %cst_45 = arith.constant 0.000000e+00 : f32
    %50 = vector.broadcast %cst_45 : f32 to vector<2x32xf32>
    %51 = vector.extract_strided_slice %7 {offsets = [0, 0], sizes = [2, 32], strides = [1, 1]} : vector<16x32xf32> to vector<2x32xf32>
    %52 = vector.extract_strided_slice %14 {offsets = [0, 0], sizes = [2, 32], strides = [1, 1]} : vector<16x32xf32> to vector<2x32xf32>
    %53 = vector.extract_strided_slice %21 {offsets = [0, 0], sizes = [2, 32], strides = [1, 1]} : vector<16x32xf32> to vector<2x32xf32>
    %c0_46 = arith.constant 0 : index
    %c0_47 = arith.constant 0 : index
    %c0_48 = arith.constant 0 : index
    %54 = vector.load %arg2[%c0_46, %c0_47, %c0_48] : memref<3x32x32xf32, #tpu.memory_space<vmem>>, vector<1x32x32xf32>
    %55 = vector.shape_cast %54 : vector<1x32x32xf32> to vector<32x32xf32>
    %cst_49 = arith.constant dense<0.000000e+00> : vector<2x32xf32>
    %56 = tpu.matmul %49, %55, %cst_49 {dimension_numbers = #tpu.dot_dimension_numbers<[1], [0], [0], [1], [0, 0, 1, 1], [], []>} : vector<2x32xf32>, vector<32x32xf32>, vector<2x32xf32> -> vector<2x32xf32>
    %c1_50 = arith.constant 1 : index
    %c0_51 = arith.constant 0 : index
    %c0_52 = arith.constant 0 : index
    %57 = vector.load %arg2[%c1_50, %c0_51, %c0_52] : memref<3x32x32xf32, #tpu.memory_space<vmem>>, vector<1x32x32xf32>
    %58 = vector.shape_cast %57 : vector<1x32x32xf32> to vector<32x32xf32>
    %cst_53 = arith.constant dense<0.000000e+00> : vector<2x32xf32>
    %59 = tpu.matmul %49, %58, %cst_53 {dimension_numbers = #tpu.dot_dimension_numbers<[1], [0], [0], [1], [0, 0, 1, 1], [], []>} : vector<2x32xf32>, vector<32x32xf32>, vector<2x32xf32> -> vector<2x32xf32>
    %c2_54 = arith.constant 2 : index
    %c0_55 = arith.constant 0 : index
    %c0_56 = arith.constant 0 : index
    %60 = vector.load %arg2[%c2_54, %c0_55, %c0_56] : memref<3x32x32xf32, #tpu.memory_space<vmem>>, vector<1x32x32xf32>
    %61 = vector.shape_cast %60 : vector<1x32x32xf32> to vector<32x32xf32>
    %cst_57 = arith.constant dense<0.000000e+00> : vector<2x32xf32>
    %62 = tpu.matmul %49, %61, %cst_57 {dimension_numbers = #tpu.dot_dimension_numbers<[1], [0], [0], [1], [0, 0, 1, 1], [], []>} : vector<2x32xf32>, vector<32x32xf32>, vector<2x32xf32> -> vector<2x32xf32>
    %63 = arith.addf %51, %56 : vector<2x32xf32>
    %64 = arith.negf %63 : vector<2x32xf32>
    %65 = math.exp %64 : vector<2x32xf32>
    %cst_58 = arith.constant 1.000000e+00 : f32
    %66 = vector.broadcast %cst_58 : f32 to vector<2x32xf32>
    %67 = arith.addf %66, %65 : vector<2x32xf32>
    %68 = arith.divf %66, %67 : vector<2x32xf32>
    %69 = arith.addf %52, %59 : vector<2x32xf32>
    %70 = arith.negf %69 : vector<2x32xf32>
    %71 = math.exp %70 : vector<2x32xf32>
    %cst_59 = arith.constant 1.000000e+00 : f32
    %72 = vector.broadcast %cst_59 : f32 to vector<2x32xf32>
    %73 = arith.addf %72, %71 : vector<2x32xf32>
    %74 = arith.divf %72, %73 : vector<2x32xf32>
    %75 = arith.addf %62, %45 : vector<2x32xf32>
    %76 = arith.mulf %68, %75 : vector<2x32xf32>
    %77 = arith.addf %53, %76 : vector<2x32xf32>
    %78 = math.tanh %77 : vector<2x32xf32>
    %79 = arith.subf %49, %78 : vector<2x32xf32>
    %80 = arith.mulf %74, %79 : vector<2x32xf32>
    %81 = arith.addf %78, %80 : vector<2x32xf32>
    %82 = vector.extract_strided_slice %28 {offsets = [14, 0], sizes = [2, 32], strides = [1, 1]} : vector<16x32xf32> to vector<2x32xf32>
    %83 = vector.extract_strided_slice %35 {offsets = [14, 0], sizes = [2, 32], strides = [1, 1]} : vector<16x32xf32> to vector<2x32xf32>
    %84 = vector.extract_strided_slice %42 {offsets = [14, 0], sizes = [2, 32], strides = [1, 1]} : vector<16x32xf32> to vector<2x32xf32>
    %c0_60 = arith.constant 0 : index
    %c0_61 = arith.constant 0 : index
    %c0_62 = arith.constant 0 : index
    %85 = vector.load %arg6[%c0_60, %c0_61, %c0_62] : memref<3x32x32xf32, #tpu.memory_space<vmem>>, vector<1x32x32xf32>
    %86 = vector.shape_cast %85 : vector<1x32x32xf32> to vector<32x32xf32>
    %cst_63 = arith.constant dense<0.000000e+00> : vector<2x32xf32>
    %87 = tpu.matmul %50, %86, %cst_63 {dimension_numbers = #tpu.dot_dimension_numbers<[1], [0], [0], [1], [0, 0, 1, 1], [], []>} : vector<2x32xf32>, vector<32x32xf32>, vector<2x32xf32> -> vector<2x32xf32>
    %c1_64 = arith.constant 1 : index
    %c0_65 = arith.constant 0 : index
    %c0_66 = arith.constant 0 : index
    %88 = vector.load %arg6[%c1_64, %c0_65, %c0_66] : memref<3x32x32xf32, #tpu.memory_space<vmem>>, vector<1x32x32xf32>
    %89 = vector.shape_cast %88 : vector<1x32x32xf32> to vector<32x32xf32>
    %cst_67 = arith.constant dense<0.000000e+00> : vector<2x32xf32>
    %90 = tpu.matmul %50, %89, %cst_67 {dimension_numbers = #tpu.dot_dimension_numbers<[1], [0], [0], [1], [0, 0, 1, 1], [], []>} : vector<2x32xf32>, vector<32x32xf32>, vector<2x32xf32> -> vector<2x32xf32>
    %c2_68 = arith.constant 2 : index
    %c0_69 = arith.constant 0 : index
    %c0_70 = arith.constant 0 : index
    %91 = vector.load %arg6[%c2_68, %c0_69, %c0_70] : memref<3x32x32xf32, #tpu.memory_space<vmem>>, vector<1x32x32xf32>
    %92 = vector.shape_cast %91 : vector<1x32x32xf32> to vector<32x32xf32>
    %cst_71 = arith.constant dense<0.000000e+00> : vector<2x32xf32>
    %93 = tpu.matmul %50, %92, %cst_71 {dimension_numbers = #tpu.dot_dimension_numbers<[1], [0], [0], [1], [0, 0, 1, 1], [], []>} : vector<2x32xf32>, vector<32x32xf32>, vector<2x32xf32> -> vector<2x32xf32>
    %94 = arith.addf %82, %87 : vector<2x32xf32>
    %95 = arith.negf %94 : vector<2x32xf32>
    %96 = math.exp %95 : vector<2x32xf32>
    %cst_72 = arith.constant 1.000000e+00 : f32
    %97 = vector.broadcast %cst_72 : f32 to vector<2x32xf32>
    %98 = arith.addf %97, %96 : vector<2x32xf32>
    %99 = arith.divf %97, %98 : vector<2x32xf32>
    %100 = arith.addf %83, %90 : vector<2x32xf32>
    %101 = arith.negf %100 : vector<2x32xf32>
    %102 = math.exp %101 : vector<2x32xf32>
    %cst_73 = arith.constant 1.000000e+00 : f32
    %103 = vector.broadcast %cst_73 : f32 to vector<2x32xf32>
    %104 = arith.addf %103, %102 : vector<2x32xf32>
    %105 = arith.divf %103, %104 : vector<2x32xf32>
    %106 = arith.addf %93, %48 : vector<2x32xf32>
    %107 = arith.mulf %99, %106 : vector<2x32xf32>
    %108 = arith.addf %84, %107 : vector<2x32xf32>
    %109 = math.tanh %108 : vector<2x32xf32>
    %110 = arith.subf %50, %109 : vector<2x32xf32>
    %111 = arith.mulf %105, %110 : vector<2x32xf32>
    %112 = arith.addf %109, %111 : vector<2x32xf32>
    %c0_74 = arith.constant 0 : index
    %c0_75 = arith.constant 0 : index
    %113 = vector.load %arg23[%c0_74, %c0_75] : memref<16x32xf32, #tpu.memory_space<vmem>>, vector<2x32xf32>
    tpu.vector_store %arg23[%c0_74, %c0_75], %81 {strides = array<i32>} : memref<16x32xf32, #tpu.memory_space<vmem>>, vector<2x32xf32>,
    %c14 = arith.constant 14 : index
    %c0_76 = arith.constant 0 : index
    %114 = vector.load %arg24[%c14, %c0_76] : memref<16x32xf32, #tpu.memory_space<vmem>>, vector<2x32xf32>
    tpu.vector_store %arg24[%c14, %c0_76], %112 {strides = array<i32>} : memref<16x32xf32, #tpu.memory_space<vmem>>, vector<2x32xf32>,
    %115 = vector.extract_strided_slice %7 {offsets = [2, 0], sizes = [2, 32], strides = [1, 1]} : vector<16x32xf32> to vector<2x32xf32>
    %116 = vector.extract_strided_slice %14 {offsets = [2, 0], sizes = [2, 32], strides = [1, 1]} : vector<16x32xf32> to vector<2x32xf32>
    %117 = vector.extract_strided_slice %21 {offsets = [2, 0], sizes = [2, 32], strides = [1, 1]} : vector<16x32xf32> to vector<2x32xf32>
    %c0_77 = arith.constant 0 : index
    %c0_78 = arith.constant 0 : index
    %c0_79 = arith.constant 0 : index
    %118 = vector.load %arg2[%c0_77, %c0_78, %c0_79] : memref<3x32x32xf32, #tpu.memory_space<vmem>>, vector<1x32x32xf32>
    %119 = vector.shape_cast %118 : vector<1x32x32xf32> to vector<32x32xf32>
    %cst_80 = arith.constant dense<0.000000e+00> : vector<2x32xf32>
    %120 = tpu.matmul %81, %119, %cst_80 {dimension_numbers = #tpu.dot_dimension_numbers<[1], [0], [0], [1], [0, 0, 1, 1], [], []>} : vector<2x32xf32>, vector<32x32xf32>, vector<2x32xf32> -> vector<2x32xf32>
    %c1_81 = arith.constant 1 : index
    %c0_82 = arith.constant 0 : index
    %c0_83 = arith.constant 0 : index
    %121 = vector.load %arg2[%c1_81, %c0_82, %c0_83] : memref<3x32x32xf32, #tpu.memory_space<vmem>>, vector<1x32x32xf32>
    %122 = vector.shape_cast %121 : vector<1x32x32xf32> to vector<32x32xf32>
    %cst_84 = arith.constant dense<0.000000e+00> : vector<2x32xf32>
    %123 = tpu.matmul %81, %122, %cst_84 {dimension_numbers = #tpu.dot_dimension_numbers<[1], [0], [0], [1], [0, 0, 1, 1], [], []>} : vector<2x32xf32>, vector<32x32xf32>, vector<2x32xf32> -> vector<2x32xf32>
    %c2_85 = arith.constant 2 : index
    %c0_86 = arith.constant 0 : index
    %c0_87 = arith.constant 0 : index
    %124 = vector.load %arg2[%c2_85, %c0_86, %c0_87] : memref<3x32x32xf32, #tpu.memory_space<vmem>>, vector<1x32x32xf32>
    %125 = vector.shape_cast %124 : vector<1x32x32xf32> to vector<32x32xf32>
    %cst_88 = arith.constant dense<0.000000e+00> : vector<2x32xf32>
    %126 = tpu.matmul %81, %125, %cst_88 {dimension_numbers = #tpu.dot_dimension_numbers<[1], [0], [0], [1], [0, 0, 1, 1], [], []>} : vector<2x32xf32>, vector<32x32xf32>, vector<2x32xf32> -> vector<2x32xf32>
    %127 = arith.addf %115, %120 : vector<2x32xf32>
    %128 = arith.negf %127 : vector<2x32xf32>
    %129 = math.exp %128 : vector<2x32xf32>
    %cst_89 = arith.constant 1.000000e+00 : f32
    %130 = vector.broadcast %cst_89 : f32 to vector<2x32xf32>
    %131 = arith.addf %130, %129 : vector<2x32xf32>
    %132 = arith.divf %130, %131 : vector<2x32xf32>
    %133 = arith.addf %116, %123 : vector<2x32xf32>
    %134 = arith.negf %133 : vector<2x32xf32>
    %135 = math.exp %134 : vector<2x32xf32>
    %cst_90 = arith.constant 1.000000e+00 : f32
    %136 = vector.broadcast %cst_90 : f32 to vector<2x32xf32>
    %137 = arith.addf %136, %135 : vector<2x32xf32>
    %138 = arith.divf %136, %137 : vector<2x32xf32>
    %139 = arith.addf %126, %45 : vector<2x32xf32>
    %140 = arith.mulf %132, %139 : vector<2x32xf32>
    %141 = arith.addf %117, %140 : vector<2x32xf32>
    %142 = math.tanh %141 : vector<2x32xf32>
    %143 = arith.subf %81, %142 : vector<2x32xf32>
    %144 = arith.mulf %138, %143 : vector<2x32xf32>
    %145 = arith.addf %142, %144 : vector<2x32xf32>
    %146 = vector.extract_strided_slice %28 {offsets = [12, 0], sizes = [2, 32], strides = [1, 1]} : vector<16x32xf32> to vector<2x32xf32>
    %147 = vector.extract_strided_slice %35 {offsets = [12, 0], sizes = [2, 32], strides = [1, 1]} : vector<16x32xf32> to vector<2x32xf32>
    %148 = vector.extract_strided_slice %42 {offsets = [12, 0], sizes = [2, 32], strides = [1, 1]} : vector<16x32xf32> to vector<2x32xf32>
    %c0_91 = arith.constant 0 : index
    %c0_92 = arith.constant 0 : index
    %c0_93 = arith.constant 0 : index
    %149 = vector.load %arg6[%c0_91, %c0_92, %c0_93] : memref<3x32x32xf32, #tpu.memory_space<vmem>>, vector<1x32x32xf32>
    %150 = vector.shape_cast %149 : vector<1x32x32xf32> to vector<32x32xf32>
    %cst_94 = arith.constant dense<0.000000e+00> : vector<2x32xf32>
    %151 = tpu.matmul %112, %150, %cst_94 {dimension_numbers = #tpu.dot_dimension_numbers<[1], [0], [0], [1], [0, 0, 1, 1], [], []>} : vector<2x32xf32>, vector<32x32xf32>, vector<2x32xf32> -> vector<2x32xf32>
    %c1_95 = arith.constant 1 : index
    %c0_96 = arith.constant 0 : index
    %c0_97 = arith.constant 0 : index
    %152 = vector.load %arg6[%c1_95, %c0_96, %c0_97] : memref<3x32x32xf32, #tpu.memory_space<vmem>>, vector<1x32x32xf32>
    %153 = vector.shape_cast %152 : vector<1x32x32xf32> to vector<32x32xf32>
    %cst_98 = arith.constant dense<0.000000e+00> : vector<2x32xf32>
    %154 = tpu.matmul %112, %153, %cst_98 {dimension_numbers = #tpu.dot_dimension_numbers<[1], [0], [0], [1], [0, 0, 1, 1], [], []>} : vector<2x32xf32>, vector<32x32xf32>, vector<2x32xf32> -> vector<2x32xf32>
    %c2_99 = arith.constant 2 : index
    %c0_100 = arith.constant 0 : index
    %c0_101 = arith.constant 0 : index
    %155 = vector.load %arg6[%c2_99, %c0_100, %c0_101] : memref<3x32x32xf32, #tpu.memory_space<vmem>>, vector<1x32x32xf32>
    %156 = vector.shape_cast %155 : vector<1x32x32xf32> to vector<32x32xf32>
    %cst_102 = arith.constant dense<0.000000e+00> : vector<2x32xf32>
    %157 = tpu.matmul %112, %156, %cst_102 {dimension_numbers = #tpu.dot_dimension_numbers<[1], [0], [0], [1], [0, 0, 1, 1], [], []>} : vector<2x32xf32>, vector<32x32xf32>, vector<2x32xf32> -> vector<2x32xf32>
    %158 = arith.addf %146, %151 : vector<2x32xf32>
    %159 = arith.negf %158 : vector<2x32xf32>
    %160 = math.exp %159 : vector<2x32xf32>
    %cst_103 = arith.constant 1.000000e+00 : f32
    %161 = vector.broadcast %cst_103 : f32 to vector<2x32xf32>
    %162 = arith.addf %161, %160 : vector<2x32xf32>
    %163 = arith.divf %161, %162 : vector<2x32xf32>
    %164 = arith.addf %147, %154 : vector<2x32xf32>
    %165 = arith.negf %164 : vector<2x32xf32>
    %166 = math.exp %165 : vector<2x32xf32>
    %cst_104 = arith.constant 1.000000e+00 : f32
    %167 = vector.broadcast %cst_104 : f32 to vector<2x32xf32>
    %168 = arith.addf %167, %166 : vector<2x32xf32>
    %169 = arith.divf %167, %168 : vector<2x32xf32>
    %170 = arith.addf %157, %48 : vector<2x32xf32>
    %171 = arith.mulf %163, %170 : vector<2x32xf32>
    %172 = arith.addf %148, %171 : vector<2x32xf32>
    %173 = math.tanh %172 : vector<2x32xf32>
    %174 = arith.subf %112, %173 : vector<2x32xf32>
    %175 = arith.mulf %169, %174 : vector<2x32xf32>
    %176 = arith.addf %173, %175 : vector<2x32xf32>
    %c2_105 = arith.constant 2 : index
    %c0_106 = arith.constant 0 : index
    %177 = vector.load %arg23[%c2_105, %c0_106] : memref<16x32xf32, #tpu.memory_space<vmem>>, vector<2x32xf32>
    tpu.vector_store %arg23[%c2_105, %c0_106], %145 {strides = array<i32>} : memref<16x32xf32, #tpu.memory_space<vmem>>, vector<2x32xf32>,
    %c12 = arith.constant 12 : index
    %c0_107 = arith.constant 0 : index
    %178 = vector.load %arg24[%c12, %c0_107] : memref<16x32xf32, #tpu.memory_space<vmem>>, vector<2x32xf32>
    tpu.vector_store %arg24[%c12, %c0_107], %176 {strides = array<i32>} : memref<16x32xf32, #tpu.memory_space<vmem>>, vector<2x32xf32>,
    %179 = vector.extract_strided_slice %7 {offsets = [4, 0], sizes = [2, 32], strides = [1, 1]} : vector<16x32xf32> to vector<2x32xf32>
    %180 = vector.extract_strided_slice %14 {offsets = [4, 0], sizes = [2, 32], strides = [1, 1]} : vector<16x32xf32> to vector<2x32xf32>
    %181 = vector.extract_strided_slice %21 {offsets = [4, 0], sizes = [2, 32], strides = [1, 1]} : vector<16x32xf32> to vector<2x32xf32>
    %c0_108 = arith.constant 0 : index
    %c0_109 = arith.constant 0 : index
    %c0_110 = arith.constant 0 : index
    %182 = vector.load %arg2[%c0_108, %c0_109, %c0_110] : memref<3x32x32xf32, #tpu.memory_space<vmem>>, vector<1x32x32xf32>
    %183 = vector.shape_cast %182 : vector<1x32x32xf32> to vector<32x32xf32>
    %cst_111 = arith.constant dense<0.000000e+00> : vector<2x32xf32>
    %184 = tpu.matmul %145, %183, %cst_111 {dimension_numbers = #tpu.dot_dimension_numbers<[1], [0], [0], [1], [0, 0, 1, 1], [], []>} : vector<2x32xf32>, vector<32x32xf32>, vector<2x32xf32> -> vector<2x32xf32>
    %c1_112 = arith.constant 1 : index
    %c0_113 = arith.constant 0 : index
    %c0_114 = arith.constant 0 : index
    %185 = vector.load %arg2[%c1_112, %c0_113, %c0_114] : memref<3x32x32xf32, #tpu.memory_space<vmem>>, vector<1x32x32xf32>
    %186 = vector.shape_cast %185 : vector<1x32x32xf32> to vector<32x32xf32>
    %cst_115 = arith.constant dense<0.000000e+00> : vector<2x32xf32>
    %187 = tpu.matmul %145, %186, %cst_115 {dimension_numbers = #tpu.dot_dimension_numbers<[1], [0], [0], [1], [0, 0, 1, 1], [], []>} : vector<2x32xf32>, vector<32x32xf32>, vector<2x32xf32> -> vector<2x32xf32>
    %c2_116 = arith.constant 2 : index
    %c0_117 = arith.constant 0 : index
    %c0_118 = arith.constant 0 : index
    %188 = vector.load %arg2[%c2_116, %c0_117, %c0_118] : memref<3x32x32xf32, #tpu.memory_space<vmem>>, vector<1x32x32xf32>
    %189 = vector.shape_cast %188 : vector<1x32x32xf32> to vector<32x32xf32>
    %cst_119 = arith.constant dense<0.000000e+00> : vector<2x32xf32>
    %190 = tpu.matmul %145, %189, %cst_119 {dimension_numbers = #tpu.dot_dimension_numbers<[1], [0], [0], [1], [0, 0, 1, 1], [], []>} : vector<2x32xf32>, vector<32x32xf32>, vector<2x32xf32> -> vector<2x32xf32>
    %191 = arith.addf %179, %184 : vector<2x32xf32>
    %192 = arith.negf %191 : vector<2x32xf32>
    %193 = math.exp %192 : vector<2x32xf32>
    %cst_120 = arith.constant 1.000000e+00 : f32
    %194 = vector.broadcast %cst_120 : f32 to vector<2x32xf32>
    %195 = arith.addf %194, %193 : vector<2x32xf32>
    %196 = arith.divf %194, %195 : vector<2x32xf32>
    %197 = arith.addf %180, %187 : vector<2x32xf32>
    %198 = arith.negf %197 : vector<2x32xf32>
    %199 = math.exp %198 : vector<2x32xf32>
    %cst_121 = arith.constant 1.000000e+00 : f32
    %200 = vector.broadcast %cst_121 : f32 to vector<2x32xf32>
    %201 = arith.addf %200, %199 : vector<2x32xf32>
    %202 = arith.divf %200, %201 : vector<2x32xf32>
    %203 = arith.addf %190, %45 : vector<2x32xf32>
    %204 = arith.mulf %196, %203 : vector<2x32xf32>
    %205 = arith.addf %181, %204 : vector<2x32xf32>
    %206 = math.tanh %205 : vector<2x32xf32>
    %207 = arith.subf %145, %206 : vector<2x32xf32>
    %208 = arith.mulf %202, %207 : vector<2x32xf32>
    %209 = arith.addf %206, %208 : vector<2x32xf32>
    %210 = vector.extract_strided_slice %28 {offsets = [10, 0], sizes = [2, 32], strides = [1, 1]} : vector<16x32xf32> to vector<2x32xf32>
    %211 = vector.extract_strided_slice %35 {offsets = [10, 0], sizes = [2, 32], strides = [1, 1]} : vector<16x32xf32> to vector<2x32xf32>
    %212 = vector.extract_strided_slice %42 {offsets = [10, 0], sizes = [2, 32], strides = [1, 1]} : vector<16x32xf32> to vector<2x32xf32>
    %c0_122 = arith.constant 0 : index
    %c0_123 = arith.constant 0 : index
    %c0_124 = arith.constant 0 : index
    %213 = vector.load %arg6[%c0_122, %c0_123, %c0_124] : memref<3x32x32xf32, #tpu.memory_space<vmem>>, vector<1x32x32xf32>
    %214 = vector.shape_cast %213 : vector<1x32x32xf32> to vector<32x32xf32>
    %cst_125 = arith.constant dense<0.000000e+00> : vector<2x32xf32>
    %215 = tpu.matmul %176, %214, %cst_125 {dimension_numbers = #tpu.dot_dimension_numbers<[1], [0], [0], [1], [0, 0, 1, 1], [], []>} : vector<2x32xf32>, vector<32x32xf32>, vector<2x32xf32> -> vector<2x32xf32>
    %c1_126 = arith.constant 1 : index
    %c0_127 = arith.constant 0 : index
    %c0_128 = arith.constant 0 : index
    %216 = vector.load %arg6[%c1_126, %c0_127, %c0_128] : memref<3x32x32xf32, #tpu.memory_space<vmem>>, vector<1x32x32xf32>
    %217 = vector.shape_cast %216 : vector<1x32x32xf32> to vector<32x32xf32>
    %cst_129 = arith.constant dense<0.000000e+00> : vector<2x32xf32>
    %218 = tpu.matmul %176, %217, %cst_129 {dimension_numbers = #tpu.dot_dimension_numbers<[1], [0], [0], [1], [0, 0, 1, 1], [], []>} : vector<2x32xf32>, vector<32x32xf32>, vector<2x32xf32> -> vector<2x32xf32>
    %c2_130 = arith.constant 2 : index
    %c0_131 = arith.constant 0 : index
    %c0_132 = arith.constant 0 : index
    %219 = vector.load %arg6[%c2_130, %c0_131, %c0_132] : memref<3x32x32xf32, #tpu.memory_space<vmem>>, vector<1x32x32xf32>
    %220 = vector.shape_cast %219 : vector<1x32x32xf32> to vector<32x32xf32>
    %cst_133 = arith.constant dense<0.000000e+00> : vector<2x32xf32>
    %221 = tpu.matmul %176, %220, %cst_133 {dimension_numbers = #tpu.dot_dimension_numbers<[1], [0], [0], [1], [0, 0, 1, 1], [], []>} : vector<2x32xf32>, vector<32x32xf32>, vector<2x32xf32> -> vector<2x32xf32>
    %222 = arith.addf %210, %215 : vector<2x32xf32>
    %223 = arith.negf %222 : vector<2x32xf32>
    %224 = math.exp %223 : vector<2x32xf32>
    %cst_134 = arith.constant 1.000000e+00 : f32
    %225 = vector.broadcast %cst_134 : f32 to vector<2x32xf32>
    %226 = arith.addf %225, %224 : vector<2x32xf32>
    %227 = arith.divf %225, %226 : vector<2x32xf32>
    %228 = arith.addf %211, %218 : vector<2x32xf32>
    %229 = arith.negf %228 : vector<2x32xf32>
    %230 = math.exp %229 : vector<2x32xf32>
    %cst_135 = arith.constant 1.000000e+00 : f32
    %231 = vector.broadcast %cst_135 : f32 to vector<2x32xf32>
    %232 = arith.addf %231, %230 : vector<2x32xf32>
    %233 = arith.divf %231, %232 : vector<2x32xf32>
    %234 = arith.addf %221, %48 : vector<2x32xf32>
    %235 = arith.mulf %227, %234 : vector<2x32xf32>
    %236 = arith.addf %212, %235 : vector<2x32xf32>
    %237 = math.tanh %236 : vector<2x32xf32>
    %238 = arith.subf %176, %237 : vector<2x32xf32>
    %239 = arith.mulf %233, %238 : vector<2x32xf32>
    %240 = arith.addf %237, %239 : vector<2x32xf32>
    %c4 = arith.constant 4 : index
    %c0_136 = arith.constant 0 : index
    %241 = vector.load %arg23[%c4, %c0_136] : memref<16x32xf32, #tpu.memory_space<vmem>>, vector<2x32xf32>
    tpu.vector_store %arg23[%c4, %c0_136], %209 {strides = array<i32>} : memref<16x32xf32, #tpu.memory_space<vmem>>, vector<2x32xf32>,
    %c10 = arith.constant 10 : index
    %c0_137 = arith.constant 0 : index
    %242 = vector.load %arg24[%c10, %c0_137] : memref<16x32xf32, #tpu.memory_space<vmem>>, vector<2x32xf32>
    tpu.vector_store %arg24[%c10, %c0_137], %240 {strides = array<i32>} : memref<16x32xf32, #tpu.memory_space<vmem>>, vector<2x32xf32>,
    %243 = vector.extract_strided_slice %7 {offsets = [6, 0], sizes = [2, 32], strides = [1, 1]} : vector<16x32xf32> to vector<2x32xf32>
    %244 = vector.extract_strided_slice %14 {offsets = [6, 0], sizes = [2, 32], strides = [1, 1]} : vector<16x32xf32> to vector<2x32xf32>
    %245 = vector.extract_strided_slice %21 {offsets = [6, 0], sizes = [2, 32], strides = [1, 1]} : vector<16x32xf32> to vector<2x32xf32>
    %c0_138 = arith.constant 0 : index
    %c0_139 = arith.constant 0 : index
    %c0_140 = arith.constant 0 : index
    %246 = vector.load %arg2[%c0_138, %c0_139, %c0_140] : memref<3x32x32xf32, #tpu.memory_space<vmem>>, vector<1x32x32xf32>
    %247 = vector.shape_cast %246 : vector<1x32x32xf32> to vector<32x32xf32>
    %cst_141 = arith.constant dense<0.000000e+00> : vector<2x32xf32>
    %248 = tpu.matmul %209, %247, %cst_141 {dimension_numbers = #tpu.dot_dimension_numbers<[1], [0], [0], [1], [0, 0, 1, 1], [], []>} : vector<2x32xf32>, vector<32x32xf32>, vector<2x32xf32> -> vector<2x32xf32>
    %c1_142 = arith.constant 1 : index
    %c0_143 = arith.constant 0 : index
    %c0_144 = arith.constant 0 : index
    %249 = vector.load %arg2[%c1_142, %c0_143, %c0_144] : memref<3x32x32xf32, #tpu.memory_space<vmem>>, vector<1x32x32xf32>
    %250 = vector.shape_cast %249 : vector<1x32x32xf32> to vector<32x32xf32>
    %cst_145 = arith.constant dense<0.000000e+00> : vector<2x32xf32>
    %251 = tpu.matmul %209, %250, %cst_145 {dimension_numbers = #tpu.dot_dimension_numbers<[1], [0], [0], [1], [0, 0, 1, 1], [], []>} : vector<2x32xf32>, vector<32x32xf32>, vector<2x32xf32> -> vector<2x32xf32>
    %c2_146 = arith.constant 2 : index
    %c0_147 = arith.constant 0 : index
    %c0_148 = arith.constant 0 : index
    %252 = vector.load %arg2[%c2_146, %c0_147, %c0_148] : memref<3x32x32xf32, #tpu.memory_space<vmem>>, vector<1x32x32xf32>
    %253 = vector.shape_cast %252 : vector<1x32x32xf32> to vector<32x32xf32>
    %cst_149 = arith.constant dense<0.000000e+00> : vector<2x32xf32>
    %254 = tpu.matmul %209, %253, %cst_149 {dimension_numbers = #tpu.dot_dimension_numbers<[1], [0], [0], [1], [0, 0, 1, 1], [], []>} : vector<2x32xf32>, vector<32x32xf32>, vector<2x32xf32> -> vector<2x32xf32>
    %255 = arith.addf %243, %248 : vector<2x32xf32>
    %256 = arith.negf %255 : vector<2x32xf32>
    %257 = math.exp %256 : vector<2x32xf32>
    %cst_150 = arith.constant 1.000000e+00 : f32
    %258 = vector.broadcast %cst_150 : f32 to vector<2x32xf32>
    %259 = arith.addf %258, %257 : vector<2x32xf32>
    %260 = arith.divf %258, %259 : vector<2x32xf32>
    %261 = arith.addf %244, %251 : vector<2x32xf32>
    %262 = arith.negf %261 : vector<2x32xf32>
    %263 = math.exp %262 : vector<2x32xf32>
    %cst_151 = arith.constant 1.000000e+00 : f32
    %264 = vector.broadcast %cst_151 : f32 to vector<2x32xf32>
    %265 = arith.addf %264, %263 : vector<2x32xf32>
    %266 = arith.divf %264, %265 : vector<2x32xf32>
    %267 = arith.addf %254, %45 : vector<2x32xf32>
    %268 = arith.mulf %260, %267 : vector<2x32xf32>
    %269 = arith.addf %245, %268 : vector<2x32xf32>
    %270 = math.tanh %269 : vector<2x32xf32>
    %271 = arith.subf %209, %270 : vector<2x32xf32>
    %272 = arith.mulf %266, %271 : vector<2x32xf32>
    %273 = arith.addf %270, %272 : vector<2x32xf32>
    %274 = vector.extract_strided_slice %28 {offsets = [8, 0], sizes = [2, 32], strides = [1, 1]} : vector<16x32xf32> to vector<2x32xf32>
    %275 = vector.extract_strided_slice %35 {offsets = [8, 0], sizes = [2, 32], strides = [1, 1]} : vector<16x32xf32> to vector<2x32xf32>
    %276 = vector.extract_strided_slice %42 {offsets = [8, 0], sizes = [2, 32], strides = [1, 1]} : vector<16x32xf32> to vector<2x32xf32>
    %c0_152 = arith.constant 0 : index
    %c0_153 = arith.constant 0 : index
    %c0_154 = arith.constant 0 : index
    %277 = vector.load %arg6[%c0_152, %c0_153, %c0_154] : memref<3x32x32xf32, #tpu.memory_space<vmem>>, vector<1x32x32xf32>
    %278 = vector.shape_cast %277 : vector<1x32x32xf32> to vector<32x32xf32>
    %cst_155 = arith.constant dense<0.000000e+00> : vector<2x32xf32>
    %279 = tpu.matmul %240, %278, %cst_155 {dimension_numbers = #tpu.dot_dimension_numbers<[1], [0], [0], [1], [0, 0, 1, 1], [], []>} : vector<2x32xf32>, vector<32x32xf32>, vector<2x32xf32> -> vector<2x32xf32>
    %c1_156 = arith.constant 1 : index
    %c0_157 = arith.constant 0 : index
    %c0_158 = arith.constant 0 : index
    %280 = vector.load %arg6[%c1_156, %c0_157, %c0_158] : memref<3x32x32xf32, #tpu.memory_space<vmem>>, vector<1x32x32xf32>
    %281 = vector.shape_cast %280 : vector<1x32x32xf32> to vector<32x32xf32>
    %cst_159 = arith.constant dense<0.000000e+00> : vector<2x32xf32>
    %282 = tpu.matmul %240, %281, %cst_159 {dimension_numbers = #tpu.dot_dimension_numbers<[1], [0], [0], [1], [0, 0, 1, 1], [], []>} : vector<2x32xf32>, vector<32x32xf32>, vector<2x32xf32> -> vector<2x32xf32>
    %c2_160 = arith.constant 2 : index
    %c0_161 = arith.constant 0 : index
    %c0_162 = arith.constant 0 : index
    %283 = vector.load %arg6[%c2_160, %c0_161, %c0_162] : memref<3x32x32xf32, #tpu.memory_space<vmem>>, vector<1x32x32xf32>
    %284 = vector.shape_cast %283 : vector<1x32x32xf32> to vector<32x32xf32>
    %cst_163 = arith.constant dense<0.000000e+00> : vector<2x32xf32>
    %285 = tpu.matmul %240, %284, %cst_163 {dimension_numbers = #tpu.dot_dimension_numbers<[1], [0], [0], [1], [0, 0, 1, 1], [], []>} : vector<2x32xf32>, vector<32x32xf32>, vector<2x32xf32> -> vector<2x32xf32>
    %286 = arith.addf %274, %279 : vector<2x32xf32>
    %287 = arith.negf %286 : vector<2x32xf32>
    %288 = math.exp %287 : vector<2x32xf32>
    %cst_164 = arith.constant 1.000000e+00 : f32
    %289 = vector.broadcast %cst_164 : f32 to vector<2x32xf32>
    %290 = arith.addf %289, %288 : vector<2x32xf32>
    %291 = arith.divf %289, %290 : vector<2x32xf32>
    %292 = arith.addf %275, %282 : vector<2x32xf32>
    %293 = arith.negf %292 : vector<2x32xf32>
    %294 = math.exp %293 : vector<2x32xf32>
    %cst_165 = arith.constant 1.000000e+00 : f32
    %295 = vector.broadcast %cst_165 : f32 to vector<2x32xf32>
    %296 = arith.addf %295, %294 : vector<2x32xf32>
    %297 = arith.divf %295, %296 : vector<2x32xf32>
    %298 = arith.addf %285, %48 : vector<2x32xf32>
    %299 = arith.mulf %291, %298 : vector<2x32xf32>
    %300 = arith.addf %276, %299 : vector<2x32xf32>
    %301 = math.tanh %300 : vector<2x32xf32>
    %302 = arith.subf %240, %301 : vector<2x32xf32>
    %303 = arith.mulf %297, %302 : vector<2x32xf32>
    %304 = arith.addf %301, %303 : vector<2x32xf32>
    %c6 = arith.constant 6 : index
    %c0_166 = arith.constant 0 : index
    %305 = vector.load %arg23[%c6, %c0_166] : memref<16x32xf32, #tpu.memory_space<vmem>>, vector<2x32xf32>
    tpu.vector_store %arg23[%c6, %c0_166], %273 {strides = array<i32>} : memref<16x32xf32, #tpu.memory_space<vmem>>, vector<2x32xf32>,
    %c8 = arith.constant 8 : index
    %c0_167 = arith.constant 0 : index
    %306 = vector.load %arg24[%c8, %c0_167] : memref<16x32xf32, #tpu.memory_space<vmem>>, vector<2x32xf32>
    tpu.vector_store %arg24[%c8, %c0_167], %304 {strides = array<i32>} : memref<16x32xf32, #tpu.memory_space<vmem>>, vector<2x32xf32>,
    %307 = vector.extract_strided_slice %7 {offsets = [8, 0], sizes = [2, 32], strides = [1, 1]} : vector<16x32xf32> to vector<2x32xf32>
    %308 = vector.extract_strided_slice %14 {offsets = [8, 0], sizes = [2, 32], strides = [1, 1]} : vector<16x32xf32> to vector<2x32xf32>
    %309 = vector.extract_strided_slice %21 {offsets = [8, 0], sizes = [2, 32], strides = [1, 1]} : vector<16x32xf32> to vector<2x32xf32>
    %c0_168 = arith.constant 0 : index
    %c0_169 = arith.constant 0 : index
    %c0_170 = arith.constant 0 : index
    %310 = vector.load %arg2[%c0_168, %c0_169, %c0_170] : memref<3x32x32xf32, #tpu.memory_space<vmem>>, vector<1x32x32xf32>
    %311 = vector.shape_cast %310 : vector<1x32x32xf32> to vector<32x32xf32>
    %cst_171 = arith.constant dense<0.000000e+00> : vector<2x32xf32>
    %312 = tpu.matmul %273, %311, %cst_171 {dimension_numbers = #tpu.dot_dimension_numbers<[1], [0], [0], [1], [0, 0, 1, 1], [], []>} : vector<2x32xf32>, vector<32x32xf32>, vector<2x32xf32> -> vector<2x32xf32>
    %c1_172 = arith.constant 1 : index
    %c0_173 = arith.constant 0 : index
    %c0_174 = arith.constant 0 : index
    %313 = vector.load %arg2[%c1_172, %c0_173, %c0_174] : memref<3x32x32xf32, #tpu.memory_space<vmem>>, vector<1x32x32xf32>
    %314 = vector.shape_cast %313 : vector<1x32x32xf32> to vector<32x32xf32>
    %cst_175 = arith.constant dense<0.000000e+00> : vector<2x32xf32>
    %315 = tpu.matmul %273, %314, %cst_175 {dimension_numbers = #tpu.dot_dimension_numbers<[1], [0], [0], [1], [0, 0, 1, 1], [], []>} : vector<2x32xf32>, vector<32x32xf32>, vector<2x32xf32> -> vector<2x32xf32>
    %c2_176 = arith.constant 2 : index
    %c0_177 = arith.constant 0 : index
    %c0_178 = arith.constant 0 : index
    %316 = vector.load %arg2[%c2_176, %c0_177, %c0_178] : memref<3x32x32xf32, #tpu.memory_space<vmem>>, vector<1x32x32xf32>
    %317 = vector.shape_cast %316 : vector<1x32x32xf32> to vector<32x32xf32>
    %cst_179 = arith.constant dense<0.000000e+00> : vector<2x32xf32>
    %318 = tpu.matmul %273, %317, %cst_179 {dimension_numbers = #tpu.dot_dimension_numbers<[1], [0], [0], [1], [0, 0, 1, 1], [], []>} : vector<2x32xf32>, vector<32x32xf32>, vector<2x32xf32> -> vector<2x32xf32>
    %319 = arith.addf %307, %312 : vector<2x32xf32>
    %320 = arith.negf %319 : vector<2x32xf32>
    %321 = math.exp %320 : vector<2x32xf32>
    %cst_180 = arith.constant 1.000000e+00 : f32
    %322 = vector.broadcast %cst_180 : f32 to vector<2x32xf32>
    %323 = arith.addf %322, %321 : vector<2x32xf32>
    %324 = arith.divf %322, %323 : vector<2x32xf32>
    %325 = arith.addf %308, %315 : vector<2x32xf32>
    %326 = arith.negf %325 : vector<2x32xf32>
    %327 = math.exp %326 : vector<2x32xf32>
    %cst_181 = arith.constant 1.000000e+00 : f32
    %328 = vector.broadcast %cst_181 : f32 to vector<2x32xf32>
    %329 = arith.addf %328, %327 : vector<2x32xf32>
    %330 = arith.divf %328, %329 : vector<2x32xf32>
    %331 = arith.addf %318, %45 : vector<2x32xf32>
    %332 = arith.mulf %324, %331 : vector<2x32xf32>
    %333 = arith.addf %309, %332 : vector<2x32xf32>
    %334 = math.tanh %333 : vector<2x32xf32>
    %335 = arith.subf %273, %334 : vector<2x32xf32>
    %336 = arith.mulf %330, %335 : vector<2x32xf32>
    %337 = arith.addf %334, %336 : vector<2x32xf32>
    %338 = vector.extract_strided_slice %28 {offsets = [6, 0], sizes = [2, 32], strides = [1, 1]} : vector<16x32xf32> to vector<2x32xf32>
    %339 = vector.extract_strided_slice %35 {offsets = [6, 0], sizes = [2, 32], strides = [1, 1]} : vector<16x32xf32> to vector<2x32xf32>
    %340 = vector.extract_strided_slice %42 {offsets = [6, 0], sizes = [2, 32], strides = [1, 1]} : vector<16x32xf32> to vector<2x32xf32>
    %c0_182 = arith.constant 0 : index
    %c0_183 = arith.constant 0 : index
    %c0_184 = arith.constant 0 : index
    %341 = vector.load %arg6[%c0_182, %c0_183, %c0_184] : memref<3x32x32xf32, #tpu.memory_space<vmem>>, vector<1x32x32xf32>
    %342 = vector.shape_cast %341 : vector<1x32x32xf32> to vector<32x32xf32>
    %cst_185 = arith.constant dense<0.000000e+00> : vector<2x32xf32>
    %343 = tpu.matmul %304, %342, %cst_185 {dimension_numbers = #tpu.dot_dimension_numbers<[1], [0], [0], [1], [0, 0, 1, 1], [], []>} : vector<2x32xf32>, vector<32x32xf32>, vector<2x32xf32> -> vector<2x32xf32>
    %c1_186 = arith.constant 1 : index
    %c0_187 = arith.constant 0 : index
    %c0_188 = arith.constant 0 : index
    %344 = vector.load %arg6[%c1_186, %c0_187, %c0_188] : memref<3x32x32xf32, #tpu.memory_space<vmem>>, vector<1x32x32xf32>
    %345 = vector.shape_cast %344 : vector<1x32x32xf32> to vector<32x32xf32>
    %cst_189 = arith.constant dense<0.000000e+00> : vector<2x32xf32>
    %346 = tpu.matmul %304, %345, %cst_189 {dimension_numbers = #tpu.dot_dimension_numbers<[1], [0], [0], [1], [0, 0, 1, 1], [], []>} : vector<2x32xf32>, vector<32x32xf32>, vector<2x32xf32> -> vector<2x32xf32>
    %c2_190 = arith.constant 2 : index
    %c0_191 = arith.constant 0 : index
    %c0_192 = arith.constant 0 : index
    %347 = vector.load %arg6[%c2_190, %c0_191, %c0_192] : memref<3x32x32xf32, #tpu.memory_space<vmem>>, vector<1x32x32xf32>
    %348 = vector.shape_cast %347 : vector<1x32x32xf32> to vector<32x32xf32>
    %cst_193 = arith.constant dense<0.000000e+00> : vector<2x32xf32>
    %349 = tpu.matmul %304, %348, %cst_193 {dimension_numbers = #tpu.dot_dimension_numbers<[1], [0], [0], [1], [0, 0, 1, 1], [], []>} : vector<2x32xf32>, vector<32x32xf32>, vector<2x32xf32> -> vector<2x32xf32>
    %350 = arith.addf %338, %343 : vector<2x32xf32>
    %351 = arith.negf %350 : vector<2x32xf32>
    %352 = math.exp %351 : vector<2x32xf32>
    %cst_194 = arith.constant 1.000000e+00 : f32
    %353 = vector.broadcast %cst_194 : f32 to vector<2x32xf32>
    %354 = arith.addf %353, %352 : vector<2x32xf32>
    %355 = arith.divf %353, %354 : vector<2x32xf32>
    %356 = arith.addf %339, %346 : vector<2x32xf32>
    %357 = arith.negf %356 : vector<2x32xf32>
    %358 = math.exp %357 : vector<2x32xf32>
    %cst_195 = arith.constant 1.000000e+00 : f32
    %359 = vector.broadcast %cst_195 : f32 to vector<2x32xf32>
    %360 = arith.addf %359, %358 : vector<2x32xf32>
    %361 = arith.divf %359, %360 : vector<2x32xf32>
    %362 = arith.addf %349, %48 : vector<2x32xf32>
    %363 = arith.mulf %355, %362 : vector<2x32xf32>
    %364 = arith.addf %340, %363 : vector<2x32xf32>
    %365 = math.tanh %364 : vector<2x32xf32>
    %366 = arith.subf %304, %365 : vector<2x32xf32>
    %367 = arith.mulf %361, %366 : vector<2x32xf32>
    %368 = arith.addf %365, %367 : vector<2x32xf32>
    %c8_196 = arith.constant 8 : index
    %c0_197 = arith.constant 0 : index
    %369 = vector.load %arg23[%c8_196, %c0_197] : memref<16x32xf32, #tpu.memory_space<vmem>>, vector<2x32xf32>
    tpu.vector_store %arg23[%c8_196, %c0_197], %337 {strides = array<i32>} : memref<16x32xf32, #tpu.memory_space<vmem>>, vector<2x32xf32>,
    %c6_198 = arith.constant 6 : index
    %c0_199 = arith.constant 0 : index
    %370 = vector.load %arg24[%c6_198, %c0_199] : memref<16x32xf32, #tpu.memory_space<vmem>>, vector<2x32xf32>
    tpu.vector_store %arg24[%c6_198, %c0_199], %368 {strides = array<i32>} : memref<16x32xf32, #tpu.memory_space<vmem>>, vector<2x32xf32>,
    %371 = vector.extract_strided_slice %7 {offsets = [10, 0], sizes = [2, 32], strides = [1, 1]} : vector<16x32xf32> to vector<2x32xf32>
    %372 = vector.extract_strided_slice %14 {offsets = [10, 0], sizes = [2, 32], strides = [1, 1]} : vector<16x32xf32> to vector<2x32xf32>
    %373 = vector.extract_strided_slice %21 {offsets = [10, 0], sizes = [2, 32], strides = [1, 1]} : vector<16x32xf32> to vector<2x32xf32>
    %c0_200 = arith.constant 0 : index
    %c0_201 = arith.constant 0 : index
    %c0_202 = arith.constant 0 : index
    %374 = vector.load %arg2[%c0_200, %c0_201, %c0_202] : memref<3x32x32xf32, #tpu.memory_space<vmem>>, vector<1x32x32xf32>
    %375 = vector.shape_cast %374 : vector<1x32x32xf32> to vector<32x32xf32>
    %cst_203 = arith.constant dense<0.000000e+00> : vector<2x32xf32>
    %376 = tpu.matmul %337, %375, %cst_203 {dimension_numbers = #tpu.dot_dimension_numbers<[1], [0], [0], [1], [0, 0, 1, 1], [], []>} : vector<2x32xf32>, vector<32x32xf32>, vector<2x32xf32> -> vector<2x32xf32>
    %c1_204 = arith.constant 1 : index
    %c0_205 = arith.constant 0 : index
    %c0_206 = arith.constant 0 : index
    %377 = vector.load %arg2[%c1_204, %c0_205, %c0_206] : memref<3x32x32xf32, #tpu.memory_space<vmem>>, vector<1x32x32xf32>
    %378 = vector.shape_cast %377 : vector<1x32x32xf32> to vector<32x32xf32>
    %cst_207 = arith.constant dense<0.000000e+00> : vector<2x32xf32>
    %379 = tpu.matmul %337, %378, %cst_207 {dimension_numbers = #tpu.dot_dimension_numbers<[1], [0], [0], [1], [0, 0, 1, 1], [], []>} : vector<2x32xf32>, vector<32x32xf32>, vector<2x32xf32> -> vector<2x32xf32>
    %c2_208 = arith.constant 2 : index
    %c0_209 = arith.constant 0 : index
    %c0_210 = arith.constant 0 : index
    %380 = vector.load %arg2[%c2_208, %c0_209, %c0_210] : memref<3x32x32xf32, #tpu.memory_space<vmem>>, vector<1x32x32xf32>
    %381 = vector.shape_cast %380 : vector<1x32x32xf32> to vector<32x32xf32>
    %cst_211 = arith.constant dense<0.000000e+00> : vector<2x32xf32>
    %382 = tpu.matmul %337, %381, %cst_211 {dimension_numbers = #tpu.dot_dimension_numbers<[1], [0], [0], [1], [0, 0, 1, 1], [], []>} : vector<2x32xf32>, vector<32x32xf32>, vector<2x32xf32> -> vector<2x32xf32>
    %383 = arith.addf %371, %376 : vector<2x32xf32>
    %384 = arith.negf %383 : vector<2x32xf32>
    %385 = math.exp %384 : vector<2x32xf32>
    %cst_212 = arith.constant 1.000000e+00 : f32
    %386 = vector.broadcast %cst_212 : f32 to vector<2x32xf32>
    %387 = arith.addf %386, %385 : vector<2x32xf32>
    %388 = arith.divf %386, %387 : vector<2x32xf32>
    %389 = arith.addf %372, %379 : vector<2x32xf32>
    %390 = arith.negf %389 : vector<2x32xf32>
    %391 = math.exp %390 : vector<2x32xf32>
    %cst_213 = arith.constant 1.000000e+00 : f32
    %392 = vector.broadcast %cst_213 : f32 to vector<2x32xf32>
    %393 = arith.addf %392, %391 : vector<2x32xf32>
    %394 = arith.divf %392, %393 : vector<2x32xf32>
    %395 = arith.addf %382, %45 : vector<2x32xf32>
    %396 = arith.mulf %388, %395 : vector<2x32xf32>
    %397 = arith.addf %373, %396 : vector<2x32xf32>
    %398 = math.tanh %397 : vector<2x32xf32>
    %399 = arith.subf %337, %398 : vector<2x32xf32>
    %400 = arith.mulf %394, %399 : vector<2x32xf32>
    %401 = arith.addf %398, %400 : vector<2x32xf32>
    %402 = vector.extract_strided_slice %28 {offsets = [4, 0], sizes = [2, 32], strides = [1, 1]} : vector<16x32xf32> to vector<2x32xf32>
    %403 = vector.extract_strided_slice %35 {offsets = [4, 0], sizes = [2, 32], strides = [1, 1]} : vector<16x32xf32> to vector<2x32xf32>
    %404 = vector.extract_strided_slice %42 {offsets = [4, 0], sizes = [2, 32], strides = [1, 1]} : vector<16x32xf32> to vector<2x32xf32>
    %c0_214 = arith.constant 0 : index
    %c0_215 = arith.constant 0 : index
    %c0_216 = arith.constant 0 : index
    %405 = vector.load %arg6[%c0_214, %c0_215, %c0_216] : memref<3x32x32xf32, #tpu.memory_space<vmem>>, vector<1x32x32xf32>
    %406 = vector.shape_cast %405 : vector<1x32x32xf32> to vector<32x32xf32>
    %cst_217 = arith.constant dense<0.000000e+00> : vector<2x32xf32>
    %407 = tpu.matmul %368, %406, %cst_217 {dimension_numbers = #tpu.dot_dimension_numbers<[1], [0], [0], [1], [0, 0, 1, 1], [], []>} : vector<2x32xf32>, vector<32x32xf32>, vector<2x32xf32> -> vector<2x32xf32>
    %c1_218 = arith.constant 1 : index
    %c0_219 = arith.constant 0 : index
    %c0_220 = arith.constant 0 : index
    %408 = vector.load %arg6[%c1_218, %c0_219, %c0_220] : memref<3x32x32xf32, #tpu.memory_space<vmem>>, vector<1x32x32xf32>
    %409 = vector.shape_cast %408 : vector<1x32x32xf32> to vector<32x32xf32>
    %cst_221 = arith.constant dense<0.000000e+00> : vector<2x32xf32>
    %410 = tpu.matmul %368, %409, %cst_221 {dimension_numbers = #tpu.dot_dimension_numbers<[1], [0], [0], [1], [0, 0, 1, 1], [], []>} : vector<2x32xf32>, vector<32x32xf32>, vector<2x32xf32> -> vector<2x32xf32>
    %c2_222 = arith.constant 2 : index
    %c0_223 = arith.constant 0 : index
    %c0_224 = arith.constant 0 : index
    %411 = vector.load %arg6[%c2_222, %c0_223, %c0_224] : memref<3x32x32xf32, #tpu.memory_space<vmem>>, vector<1x32x32xf32>
    %412 = vector.shape_cast %411 : vector<1x32x32xf32> to vector<32x32xf32>
    %cst_225 = arith.constant dense<0.000000e+00> : vector<2x32xf32>
    %413 = tpu.matmul %368, %412, %cst_225 {dimension_numbers = #tpu.dot_dimension_numbers<[1], [0], [0], [1], [0, 0, 1, 1], [], []>} : vector<2x32xf32>, vector<32x32xf32>, vector<2x32xf32> -> vector<2x32xf32>
    %414 = arith.addf %402, %407 : vector<2x32xf32>
    %415 = arith.negf %414 : vector<2x32xf32>
    %416 = math.exp %415 : vector<2x32xf32>
    %cst_226 = arith.constant 1.000000e+00 : f32
    %417 = vector.broadcast %cst_226 : f32 to vector<2x32xf32>
    %418 = arith.addf %417, %416 : vector<2x32xf32>
    %419 = arith.divf %417, %418 : vector<2x32xf32>
    %420 = arith.addf %403, %410 : vector<2x32xf32>
    %421 = arith.negf %420 : vector<2x32xf32>
    %422 = math.exp %421 : vector<2x32xf32>
    %cst_227 = arith.constant 1.000000e+00 : f32
    %423 = vector.broadcast %cst_227 : f32 to vector<2x32xf32>
    %424 = arith.addf %423, %422 : vector<2x32xf32>
    %425 = arith.divf %423, %424 : vector<2x32xf32>
    %426 = arith.addf %413, %48 : vector<2x32xf32>
    %427 = arith.mulf %419, %426 : vector<2x32xf32>
    %428 = arith.addf %404, %427 : vector<2x32xf32>
    %429 = math.tanh %428 : vector<2x32xf32>
    %430 = arith.subf %368, %429 : vector<2x32xf32>
    %431 = arith.mulf %425, %430 : vector<2x32xf32>
    %432 = arith.addf %429, %431 : vector<2x32xf32>
    %c10_228 = arith.constant 10 : index
    %c0_229 = arith.constant 0 : index
    %433 = vector.load %arg23[%c10_228, %c0_229] : memref<16x32xf32, #tpu.memory_space<vmem>>, vector<2x32xf32>
    tpu.vector_store %arg23[%c10_228, %c0_229], %401 {strides = array<i32>} : memref<16x32xf32, #tpu.memory_space<vmem>>, vector<2x32xf32>,
    %c4_230 = arith.constant 4 : index
    %c0_231 = arith.constant 0 : index
    %434 = vector.load %arg24[%c4_230, %c0_231] : memref<16x32xf32, #tpu.memory_space<vmem>>, vector<2x32xf32>
    tpu.vector_store %arg24[%c4_230, %c0_231], %432 {strides = array<i32>} : memref<16x32xf32, #tpu.memory_space<vmem>>, vector<2x32xf32>,
    %435 = vector.extract_strided_slice %7 {offsets = [12, 0], sizes = [2, 32], strides = [1, 1]} : vector<16x32xf32> to vector<2x32xf32>
    %436 = vector.extract_strided_slice %14 {offsets = [12, 0], sizes = [2, 32], strides = [1, 1]} : vector<16x32xf32> to vector<2x32xf32>
    %437 = vector.extract_strided_slice %21 {offsets = [12, 0], sizes = [2, 32], strides = [1, 1]} : vector<16x32xf32> to vector<2x32xf32>
    %c0_232 = arith.constant 0 : index
    %c0_233 = arith.constant 0 : index
    %c0_234 = arith.constant 0 : index
    %438 = vector.load %arg2[%c0_232, %c0_233, %c0_234] : memref<3x32x32xf32, #tpu.memory_space<vmem>>, vector<1x32x32xf32>
    %439 = vector.shape_cast %438 : vector<1x32x32xf32> to vector<32x32xf32>
    %cst_235 = arith.constant dense<0.000000e+00> : vector<2x32xf32>
    %440 = tpu.matmul %401, %439, %cst_235 {dimension_numbers = #tpu.dot_dimension_numbers<[1], [0], [0], [1], [0, 0, 1, 1], [], []>} : vector<2x32xf32>, vector<32x32xf32>, vector<2x32xf32> -> vector<2x32xf32>
    %c1_236 = arith.constant 1 : index
    %c0_237 = arith.constant 0 : index
    %c0_238 = arith.constant 0 : index
    %441 = vector.load %arg2[%c1_236, %c0_237, %c0_238] : memref<3x32x32xf32, #tpu.memory_space<vmem>>, vector<1x32x32xf32>
    %442 = vector.shape_cast %441 : vector<1x32x32xf32> to vector<32x32xf32>
    %cst_239 = arith.constant dense<0.000000e+00> : vector<2x32xf32>
    %443 = tpu.matmul %401, %442, %cst_239 {dimension_numbers = #tpu.dot_dimension_numbers<[1], [0], [0], [1], [0, 0, 1, 1], [], []>} : vector<2x32xf32>, vector<32x32xf32>, vector<2x32xf32> -> vector<2x32xf32>
    %c2_240 = arith.constant 2 : index
    %c0_241 = arith.constant 0 : index
    %c0_242 = arith.constant 0 : index
    %444 = vector.load %arg2[%c2_240, %c0_241, %c0_242] : memref<3x32x32xf32, #tpu.memory_space<vmem>>, vector<1x32x32xf32>
    %445 = vector.shape_cast %444 : vector<1x32x32xf32> to vector<32x32xf32>
    %cst_243 = arith.constant dense<0.000000e+00> : vector<2x32xf32>
    %446 = tpu.matmul %401, %445, %cst_243 {dimension_numbers = #tpu.dot_dimension_numbers<[1], [0], [0], [1], [0, 0, 1, 1], [], []>} : vector<2x32xf32>, vector<32x32xf32>, vector<2x32xf32> -> vector<2x32xf32>
    %447 = arith.addf %435, %440 : vector<2x32xf32>
    %448 = arith.negf %447 : vector<2x32xf32>
    %449 = math.exp %448 : vector<2x32xf32>
    %cst_244 = arith.constant 1.000000e+00 : f32
    %450 = vector.broadcast %cst_244 : f32 to vector<2x32xf32>
    %451 = arith.addf %450, %449 : vector<2x32xf32>
    %452 = arith.divf %450, %451 : vector<2x32xf32>
    %453 = arith.addf %436, %443 : vector<2x32xf32>
    %454 = arith.negf %453 : vector<2x32xf32>
    %455 = math.exp %454 : vector<2x32xf32>
    %cst_245 = arith.constant 1.000000e+00 : f32
    %456 = vector.broadcast %cst_245 : f32 to vector<2x32xf32>
    %457 = arith.addf %456, %455 : vector<2x32xf32>
    %458 = arith.divf %456, %457 : vector<2x32xf32>
    %459 = arith.addf %446, %45 : vector<2x32xf32>
    %460 = arith.mulf %452, %459 : vector<2x32xf32>
    %461 = arith.addf %437, %460 : vector<2x32xf32>
    %462 = math.tanh %461 : vector<2x32xf32>
    %463 = arith.subf %401, %462 : vector<2x32xf32>
    %464 = arith.mulf %458, %463 : vector<2x32xf32>
    %465 = arith.addf %462, %464 : vector<2x32xf32>
    %466 = vector.extract_strided_slice %28 {offsets = [2, 0], sizes = [2, 32], strides = [1, 1]} : vector<16x32xf32> to vector<2x32xf32>
    %467 = vector.extract_strided_slice %35 {offsets = [2, 0], sizes = [2, 32], strides = [1, 1]} : vector<16x32xf32> to vector<2x32xf32>
    %468 = vector.extract_strided_slice %42 {offsets = [2, 0], sizes = [2, 32], strides = [1, 1]} : vector<16x32xf32> to vector<2x32xf32>
    %c0_246 = arith.constant 0 : index
    %c0_247 = arith.constant 0 : index
    %c0_248 = arith.constant 0 : index
    %469 = vector.load %arg6[%c0_246, %c0_247, %c0_248] : memref<3x32x32xf32, #tpu.memory_space<vmem>>, vector<1x32x32xf32>
    %470 = vector.shape_cast %469 : vector<1x32x32xf32> to vector<32x32xf32>
    %cst_249 = arith.constant dense<0.000000e+00> : vector<2x32xf32>
    %471 = tpu.matmul %432, %470, %cst_249 {dimension_numbers = #tpu.dot_dimension_numbers<[1], [0], [0], [1], [0, 0, 1, 1], [], []>} : vector<2x32xf32>, vector<32x32xf32>, vector<2x32xf32> -> vector<2x32xf32>
    %c1_250 = arith.constant 1 : index
    %c0_251 = arith.constant 0 : index
    %c0_252 = arith.constant 0 : index
    %472 = vector.load %arg6[%c1_250, %c0_251, %c0_252] : memref<3x32x32xf32, #tpu.memory_space<vmem>>, vector<1x32x32xf32>
    %473 = vector.shape_cast %472 : vector<1x32x32xf32> to vector<32x32xf32>
    %cst_253 = arith.constant dense<0.000000e+00> : vector<2x32xf32>
    %474 = tpu.matmul %432, %473, %cst_253 {dimension_numbers = #tpu.dot_dimension_numbers<[1], [0], [0], [1], [0, 0, 1, 1], [], []>} : vector<2x32xf32>, vector<32x32xf32>, vector<2x32xf32> -> vector<2x32xf32>
    %c2_254 = arith.constant 2 : index
    %c0_255 = arith.constant 0 : index
    %c0_256 = arith.constant 0 : index
    %475 = vector.load %arg6[%c2_254, %c0_255, %c0_256] : memref<3x32x32xf32, #tpu.memory_space<vmem>>, vector<1x32x32xf32>
    %476 = vector.shape_cast %475 : vector<1x32x32xf32> to vector<32x32xf32>
    %cst_257 = arith.constant dense<0.000000e+00> : vector<2x32xf32>
    %477 = tpu.matmul %432, %476, %cst_257 {dimension_numbers = #tpu.dot_dimension_numbers<[1], [0], [0], [1], [0, 0, 1, 1], [], []>} : vector<2x32xf32>, vector<32x32xf32>, vector<2x32xf32> -> vector<2x32xf32>
    %478 = arith.addf %466, %471 : vector<2x32xf32>
    %479 = arith.negf %478 : vector<2x32xf32>
    %480 = math.exp %479 : vector<2x32xf32>
    %cst_258 = arith.constant 1.000000e+00 : f32
    %481 = vector.broadcast %cst_258 : f32 to vector<2x32xf32>
    %482 = arith.addf %481, %480 : vector<2x32xf32>
    %483 = arith.divf %481, %482 : vector<2x32xf32>
    %484 = arith.addf %467, %474 : vector<2x32xf32>
    %485 = arith.negf %484 : vector<2x32xf32>
    %486 = math.exp %485 : vector<2x32xf32>
    %cst_259 = arith.constant 1.000000e+00 : f32
    %487 = vector.broadcast %cst_259 : f32 to vector<2x32xf32>
    %488 = arith.addf %487, %486 : vector<2x32xf32>
    %489 = arith.divf %487, %488 : vector<2x32xf32>
    %490 = arith.addf %477, %48 : vector<2x32xf32>
    %491 = arith.mulf %483, %490 : vector<2x32xf32>
    %492 = arith.addf %468, %491 : vector<2x32xf32>
    %493 = math.tanh %492 : vector<2x32xf32>
    %494 = arith.subf %432, %493 : vector<2x32xf32>
    %495 = arith.mulf %489, %494 : vector<2x32xf32>
    %496 = arith.addf %493, %495 : vector<2x32xf32>
    %c12_260 = arith.constant 12 : index
    %c0_261 = arith.constant 0 : index
    %497 = vector.load %arg23[%c12_260, %c0_261] : memref<16x32xf32, #tpu.memory_space<vmem>>, vector<2x32xf32>
    tpu.vector_store %arg23[%c12_260, %c0_261], %465 {strides = array<i32>} : memref<16x32xf32, #tpu.memory_space<vmem>>, vector<2x32xf32>,
    %c2_262 = arith.constant 2 : index
    %c0_263 = arith.constant 0 : index
    %498 = vector.load %arg24[%c2_262, %c0_263] : memref<16x32xf32, #tpu.memory_space<vmem>>, vector<2x32xf32>
    tpu.vector_store %arg24[%c2_262, %c0_263], %496 {strides = array<i32>} : memref<16x32xf32, #tpu.memory_space<vmem>>, vector<2x32xf32>,
    %499 = vector.extract_strided_slice %7 {offsets = [14, 0], sizes = [2, 32], strides = [1, 1]} : vector<16x32xf32> to vector<2x32xf32>
    %500 = vector.extract_strided_slice %14 {offsets = [14, 0], sizes = [2, 32], strides = [1, 1]} : vector<16x32xf32> to vector<2x32xf32>
    %501 = vector.extract_strided_slice %21 {offsets = [14, 0], sizes = [2, 32], strides = [1, 1]} : vector<16x32xf32> to vector<2x32xf32>
    %c0_264 = arith.constant 0 : index
    %c0_265 = arith.constant 0 : index
    %c0_266 = arith.constant 0 : index
    %502 = vector.load %arg2[%c0_264, %c0_265, %c0_266] : memref<3x32x32xf32, #tpu.memory_space<vmem>>, vector<1x32x32xf32>
    %503 = vector.shape_cast %502 : vector<1x32x32xf32> to vector<32x32xf32>
    %cst_267 = arith.constant dense<0.000000e+00> : vector<2x32xf32>
    %504 = tpu.matmul %465, %503, %cst_267 {dimension_numbers = #tpu.dot_dimension_numbers<[1], [0], [0], [1], [0, 0, 1, 1], [], []>} : vector<2x32xf32>, vector<32x32xf32>, vector<2x32xf32> -> vector<2x32xf32>
    %c1_268 = arith.constant 1 : index
    %c0_269 = arith.constant 0 : index
    %c0_270 = arith.constant 0 : index
    %505 = vector.load %arg2[%c1_268, %c0_269, %c0_270] : memref<3x32x32xf32, #tpu.memory_space<vmem>>, vector<1x32x32xf32>
    %506 = vector.shape_cast %505 : vector<1x32x32xf32> to vector<32x32xf32>
    %cst_271 = arith.constant dense<0.000000e+00> : vector<2x32xf32>
    %507 = tpu.matmul %465, %506, %cst_271 {dimension_numbers = #tpu.dot_dimension_numbers<[1], [0], [0], [1], [0, 0, 1, 1], [], []>} : vector<2x32xf32>, vector<32x32xf32>, vector<2x32xf32> -> vector<2x32xf32>
    %c2_272 = arith.constant 2 : index
    %c0_273 = arith.constant 0 : index
    %c0_274 = arith.constant 0 : index
    %508 = vector.load %arg2[%c2_272, %c0_273, %c0_274] : memref<3x32x32xf32, #tpu.memory_space<vmem>>, vector<1x32x32xf32>
    %509 = vector.shape_cast %508 : vector<1x32x32xf32> to vector<32x32xf32>
    %cst_275 = arith.constant dense<0.000000e+00> : vector<2x32xf32>
    %510 = tpu.matmul %465, %509, %cst_275 {dimension_numbers = #tpu.dot_dimension_numbers<[1], [0], [0], [1], [0, 0, 1, 1], [], []>} : vector<2x32xf32>, vector<32x32xf32>, vector<2x32xf32> -> vector<2x32xf32>
    %511 = arith.addf %499, %504 : vector<2x32xf32>
    %512 = arith.negf %511 : vector<2x32xf32>
    %513 = math.exp %512 : vector<2x32xf32>
    %cst_276 = arith.constant 1.000000e+00 : f32
    %514 = vector.broadcast %cst_276 : f32 to vector<2x32xf32>
    %515 = arith.addf %514, %513 : vector<2x32xf32>
    %516 = arith.divf %514, %515 : vector<2x32xf32>
    %517 = arith.addf %500, %507 : vector<2x32xf32>
    %518 = arith.negf %517 : vector<2x32xf32>
    %519 = math.exp %518 : vector<2x32xf32>
    %cst_277 = arith.constant 1.000000e+00 : f32
    %520 = vector.broadcast %cst_277 : f32 to vector<2x32xf32>
    %521 = arith.addf %520, %519 : vector<2x32xf32>
    %522 = arith.divf %520, %521 : vector<2x32xf32>
    %523 = arith.addf %510, %45 : vector<2x32xf32>
    %524 = arith.mulf %516, %523 : vector<2x32xf32>
    %525 = arith.addf %501, %524 : vector<2x32xf32>
    %526 = math.tanh %525 : vector<2x32xf32>
    %527 = arith.subf %465, %526 : vector<2x32xf32>
    %528 = arith.mulf %522, %527 : vector<2x32xf32>
    %529 = arith.addf %526, %528 : vector<2x32xf32>
    %530 = vector.extract_strided_slice %28 {offsets = [0, 0], sizes = [2, 32], strides = [1, 1]} : vector<16x32xf32> to vector<2x32xf32>
    %531 = vector.extract_strided_slice %35 {offsets = [0, 0], sizes = [2, 32], strides = [1, 1]} : vector<16x32xf32> to vector<2x32xf32>
    %532 = vector.extract_strided_slice %42 {offsets = [0, 0], sizes = [2, 32], strides = [1, 1]} : vector<16x32xf32> to vector<2x32xf32>
    %c0_278 = arith.constant 0 : index
    %c0_279 = arith.constant 0 : index
    %c0_280 = arith.constant 0 : index
    %533 = vector.load %arg6[%c0_278, %c0_279, %c0_280] : memref<3x32x32xf32, #tpu.memory_space<vmem>>, vector<1x32x32xf32>
    %534 = vector.shape_cast %533 : vector<1x32x32xf32> to vector<32x32xf32>
    %cst_281 = arith.constant dense<0.000000e+00> : vector<2x32xf32>
    %535 = tpu.matmul %496, %534, %cst_281 {dimension_numbers = #tpu.dot_dimension_numbers<[1], [0], [0], [1], [0, 0, 1, 1], [], []>} : vector<2x32xf32>, vector<32x32xf32>, vector<2x32xf32> -> vector<2x32xf32>
    %c1_282 = arith.constant 1 : index
    %c0_283 = arith.constant 0 : index
    %c0_284 = arith.constant 0 : index
    %536 = vector.load %arg6[%c1_282, %c0_283, %c0_284] : memref<3x32x32xf32, #tpu.memory_space<vmem>>, vector<1x32x32xf32>
    %537 = vector.shape_cast %536 : vector<1x32x32xf32> to vector<32x32xf32>
    %cst_285 = arith.constant dense<0.000000e+00> : vector<2x32xf32>
    %538 = tpu.matmul %496, %537, %cst_285 {dimension_numbers = #tpu.dot_dimension_numbers<[1], [0], [0], [1], [0, 0, 1, 1], [], []>} : vector<2x32xf32>, vector<32x32xf32>, vector<2x32xf32> -> vector<2x32xf32>
    %c2_286 = arith.constant 2 : index
    %c0_287 = arith.constant 0 : index
    %c0_288 = arith.constant 0 : index
    %539 = vector.load %arg6[%c2_286, %c0_287, %c0_288] : memref<3x32x32xf32, #tpu.memory_space<vmem>>, vector<1x32x32xf32>
    %540 = vector.shape_cast %539 : vector<1x32x32xf32> to vector<32x32xf32>
    %cst_289 = arith.constant dense<0.000000e+00> : vector<2x32xf32>
    %541 = tpu.matmul %496, %540, %cst_289 {dimension_numbers = #tpu.dot_dimension_numbers<[1], [0], [0], [1], [0, 0, 1, 1], [], []>} : vector<2x32xf32>, vector<32x32xf32>, vector<2x32xf32> -> vector<2x32xf32>
    %542 = arith.addf %530, %535 : vector<2x32xf32>
    %543 = arith.negf %542 : vector<2x32xf32>
    %544 = math.exp %543 : vector<2x32xf32>
    %cst_290 = arith.constant 1.000000e+00 : f32
    %545 = vector.broadcast %cst_290 : f32 to vector<2x32xf32>
    %546 = arith.addf %545, %544 : vector<2x32xf32>
    %547 = arith.divf %545, %546 : vector<2x32xf32>
    %548 = arith.addf %531, %538 : vector<2x32xf32>
    %549 = arith.negf %548 : vector<2x32xf32>
    %550 = math.exp %549 : vector<2x32xf32>
    %cst_291 = arith.constant 1.000000e+00 : f32
    %551 = vector.broadcast %cst_291 : f32 to vector<2x32xf32>
    %552 = arith.addf %551, %550 : vector<2x32xf32>
    %553 = arith.divf %551, %552 : vector<2x32xf32>
    %554 = arith.addf %541, %48 : vector<2x32xf32>
    %555 = arith.mulf %547, %554 : vector<2x32xf32>
    %556 = arith.addf %532, %555 : vector<2x32xf32>
    %557 = math.tanh %556 : vector<2x32xf32>
    %558 = arith.subf %496, %557 : vector<2x32xf32>
    %559 = arith.mulf %553, %558 : vector<2x32xf32>
    %560 = arith.addf %557, %559 : vector<2x32xf32>
    %c14_292 = arith.constant 14 : index
    %c0_293 = arith.constant 0 : index
    %561 = vector.load %arg23[%c14_292, %c0_293] : memref<16x32xf32, #tpu.memory_space<vmem>>, vector<2x32xf32>
    tpu.vector_store %arg23[%c14_292, %c0_293], %529 {strides = array<i32>} : memref<16x32xf32, #tpu.memory_space<vmem>>, vector<2x32xf32>,
    %c0_294 = arith.constant 0 : index
    %c0_295 = arith.constant 0 : index
    %562 = vector.load %arg24[%c0_294, %c0_295] : memref<16x32xf32, #tpu.memory_space<vmem>>, vector<2x32xf32>
    tpu.vector_store %arg24[%c0_294, %c0_295], %560 {strides = array<i32>} : memref<16x32xf32, #tpu.memory_space<vmem>>, vector<2x32xf32>,
    %c0_296 = arith.constant 0 : index
    %c0_297 = arith.constant 0 : index
    %563 = vector.load %arg23[%c0_296, %c0_297] : memref<16x32xf32, #tpu.memory_space<vmem>>, vector<16x32xf32>
    %c0_298 = arith.constant 0 : index
    %c0_299 = arith.constant 0 : index
    %564 = vector.load %arg24[%c0_298, %c0_299] : memref<16x32xf32, #tpu.memory_space<vmem>>, vector<16x32xf32>
    %c0_300 = arith.constant 0 : index
    %c0_301 = arith.constant 0 : index
    %c0_302 = arith.constant 0 : index
    %565 = vector.load %arg9[%c0_300, %c0_301, %c0_302] : memref<3x32x32xf32, #tpu.memory_space<vmem>>, vector<1x32x32xf32>
    %566 = vector.shape_cast %565 : vector<1x32x32xf32> to vector<32x32xf32>
    %cst_303 = arith.constant dense<0.000000e+00> : vector<16x32xf32>
    %567 = tpu.matmul %563, %566, %cst_303 {dimension_numbers = #tpu.dot_dimension_numbers<[1], [0], [0], [1], [0, 0, 1, 1], [], []>} : vector<16x32xf32>, vector<32x32xf32>, vector<16x32xf32> -> vector<16x32xf32>
    %c0_304 = arith.constant 0 : index
    %c0_305 = arith.constant 0 : index
    %c0_306 = arith.constant 0 : index
    %568 = vector.load %arg10[%c0_304, %c0_305, %c0_306] : memref<3x32x32xf32, #tpu.memory_space<vmem>>, vector<1x32x32xf32>
    %569 = vector.shape_cast %568 : vector<1x32x32xf32> to vector<32x32xf32>
    %cst_307 = arith.constant dense<0.000000e+00> : vector<16x32xf32>
    %570 = tpu.matmul %564, %569, %cst_307 {dimension_numbers = #tpu.dot_dimension_numbers<[1], [0], [0], [1], [0, 0, 1, 1], [], []>} : vector<16x32xf32>, vector<32x32xf32>, vector<16x32xf32> -> vector<16x32xf32>
    %571 = arith.addf %567, %570 : vector<16x32xf32>
    %c0_308 = arith.constant 0 : index
    %c0_309 = arith.constant 0 : index
    %c0_310 = arith.constant 0 : index
    %572 = vector.load %arg12[%c0_308, %c0_309, %c0_310] : memref<3x1x32xf32, #tpu.memory_space<vmem>>, vector<1x1x32xf32>
    %573 = vector.shape_cast %572 : vector<1x1x32xf32> to vector<1x32xf32>
    %574 = vector.broadcast %573 : vector<1x32xf32> to vector<16x32xf32>
    %575 = arith.addf %571, %574 : vector<16x32xf32>
    %c1_311 = arith.constant 1 : index
    %c0_312 = arith.constant 0 : index
    %c0_313 = arith.constant 0 : index
    %576 = vector.load %arg9[%c1_311, %c0_312, %c0_313] : memref<3x32x32xf32, #tpu.memory_space<vmem>>, vector<1x32x32xf32>
    %577 = vector.shape_cast %576 : vector<1x32x32xf32> to vector<32x32xf32>
    %cst_314 = arith.constant dense<0.000000e+00> : vector<16x32xf32>
    %578 = tpu.matmul %563, %577, %cst_314 {dimension_numbers = #tpu.dot_dimension_numbers<[1], [0], [0], [1], [0, 0, 1, 1], [], []>} : vector<16x32xf32>, vector<32x32xf32>, vector<16x32xf32> -> vector<16x32xf32>
    %c1_315 = arith.constant 1 : index
    %c0_316 = arith.constant 0 : index
    %c0_317 = arith.constant 0 : index
    %579 = vector.load %arg10[%c1_315, %c0_316, %c0_317] : memref<3x32x32xf32, #tpu.memory_space<vmem>>, vector<1x32x32xf32>
    %580 = vector.shape_cast %579 : vector<1x32x32xf32> to vector<32x32xf32>
    %cst_318 = arith.constant dense<0.000000e+00> : vector<16x32xf32>
    %581 = tpu.matmul %564, %580, %cst_318 {dimension_numbers = #tpu.dot_dimension_numbers<[1], [0], [0], [1], [0, 0, 1, 1], [], []>} : vector<16x32xf32>, vector<32x32xf32>, vector<16x32xf32> -> vector<16x32xf32>
    %582 = arith.addf %578, %581 : vector<16x32xf32>
    %c1_319 = arith.constant 1 : index
    %c0_320 = arith.constant 0 : index
    %c0_321 = arith.constant 0 : index
    %583 = vector.load %arg12[%c1_319, %c0_320, %c0_321] : memref<3x1x32xf32, #tpu.memory_space<vmem>>, vector<1x1x32xf32>
    %584 = vector.shape_cast %583 : vector<1x1x32xf32> to vector<1x32xf32>
    %585 = vector.broadcast %584 : vector<1x32xf32> to vector<16x32xf32>
    %586 = arith.addf %582, %585 : vector<16x32xf32>
    %c2_322 = arith.constant 2 : index
    %c0_323 = arith.constant 0 : index
    %c0_324 = arith.constant 0 : index
    %587 = vector.load %arg9[%c2_322, %c0_323, %c0_324] : memref<3x32x32xf32, #tpu.memory_space<vmem>>, vector<1x32x32xf32>
    %588 = vector.shape_cast %587 : vector<1x32x32xf32> to vector<32x32xf32>
    %cst_325 = arith.constant dense<0.000000e+00> : vector<16x32xf32>
    %589 = tpu.matmul %563, %588, %cst_325 {dimension_numbers = #tpu.dot_dimension_numbers<[1], [0], [0], [1], [0, 0, 1, 1], [], []>} : vector<16x32xf32>, vector<32x32xf32>, vector<16x32xf32> -> vector<16x32xf32>
    %c2_326 = arith.constant 2 : index
    %c0_327 = arith.constant 0 : index
    %c0_328 = arith.constant 0 : index
    %590 = vector.load %arg10[%c2_326, %c0_327, %c0_328] : memref<3x32x32xf32, #tpu.memory_space<vmem>>, vector<1x32x32xf32>
    %591 = vector.shape_cast %590 : vector<1x32x32xf32> to vector<32x32xf32>
    %cst_329 = arith.constant dense<0.000000e+00> : vector<16x32xf32>
    %592 = tpu.matmul %564, %591, %cst_329 {dimension_numbers = #tpu.dot_dimension_numbers<[1], [0], [0], [1], [0, 0, 1, 1], [], []>} : vector<16x32xf32>, vector<32x32xf32>, vector<16x32xf32> -> vector<16x32xf32>
    %593 = arith.addf %589, %592 : vector<16x32xf32>
    %c2_330 = arith.constant 2 : index
    %c0_331 = arith.constant 0 : index
    %c0_332 = arith.constant 0 : index
    %594 = vector.load %arg12[%c2_330, %c0_331, %c0_332] : memref<3x1x32xf32, #tpu.memory_space<vmem>>, vector<1x1x32xf32>
    %595 = vector.shape_cast %594 : vector<1x1x32xf32> to vector<1x32xf32>
    %596 = vector.broadcast %595 : vector<1x32xf32> to vector<16x32xf32>
    %597 = arith.addf %593, %596 : vector<16x32xf32>
    %c0_333 = arith.constant 0 : index
    %c0_334 = arith.constant 0 : index
    %598 = vector.load %arg13[%c0_333, %c0_334] : memref<1x32xf32, #tpu.memory_space<vmem>>, vector<1x32xf32>
    %599 = vector.shape_cast %598 : vector<1x32xf32> to vector<1x32xf32>
    %600 = vector.broadcast %599 : vector<1x32xf32> to vector<2x32xf32>
    %cst_335 = arith.constant 0.000000e+00 : f32
    %601 = vector.broadcast %cst_335 : f32 to vector<2x32xf32>
    %602 = vector.extract_strided_slice %575 {offsets = [0, 0], sizes = [2, 32], strides = [1, 1]} : vector<16x32xf32> to vector<2x32xf32>
    %603 = vector.extract_strided_slice %586 {offsets = [0, 0], sizes = [2, 32], strides = [1, 1]} : vector<16x32xf32> to vector<2x32xf32>
    %604 = vector.extract_strided_slice %597 {offsets = [0, 0], sizes = [2, 32], strides = [1, 1]} : vector<16x32xf32> to vector<2x32xf32>
    %c0_336 = arith.constant 0 : index
    %c0_337 = arith.constant 0 : index
    %c0_338 = arith.constant 0 : index
    %605 = vector.load %arg11[%c0_336, %c0_337, %c0_338] : memref<3x32x32xf32, #tpu.memory_space<vmem>>, vector<1x32x32xf32>
    %606 = vector.shape_cast %605 : vector<1x32x32xf32> to vector<32x32xf32>
    %cst_339 = arith.constant dense<0.000000e+00> : vector<2x32xf32>
    %607 = tpu.matmul %601, %606, %cst_339 {dimension_numbers = #tpu.dot_dimension_numbers<[1], [0], [0], [1], [0, 0, 1, 1], [], []>} : vector<2x32xf32>, vector<32x32xf32>, vector<2x32xf32> -> vector<2x32xf32>
    %c1_340 = arith.constant 1 : index
    %c0_341 = arith.constant 0 : index
    %c0_342 = arith.constant 0 : index
    %608 = vector.load %arg11[%c1_340, %c0_341, %c0_342] : memref<3x32x32xf32, #tpu.memory_space<vmem>>, vector<1x32x32xf32>
    %609 = vector.shape_cast %608 : vector<1x32x32xf32> to vector<32x32xf32>
    %cst_343 = arith.constant dense<0.000000e+00> : vector<2x32xf32>
    %610 = tpu.matmul %601, %609, %cst_343 {dimension_numbers = #tpu.dot_dimension_numbers<[1], [0], [0], [1], [0, 0, 1, 1], [], []>} : vector<2x32xf32>, vector<32x32xf32>, vector<2x32xf32> -> vector<2x32xf32>
    %c2_344 = arith.constant 2 : index
    %c0_345 = arith.constant 0 : index
    %c0_346 = arith.constant 0 : index
    %611 = vector.load %arg11[%c2_344, %c0_345, %c0_346] : memref<3x32x32xf32, #tpu.memory_space<vmem>>, vector<1x32x32xf32>
    %612 = vector.shape_cast %611 : vector<1x32x32xf32> to vector<32x32xf32>
    %cst_347 = arith.constant dense<0.000000e+00> : vector<2x32xf32>
    %613 = tpu.matmul %601, %612, %cst_347 {dimension_numbers = #tpu.dot_dimension_numbers<[1], [0], [0], [1], [0, 0, 1, 1], [], []>} : vector<2x32xf32>, vector<32x32xf32>, vector<2x32xf32> -> vector<2x32xf32>
    %614 = arith.addf %602, %607 : vector<2x32xf32>
    %615 = arith.negf %614 : vector<2x32xf32>
    %616 = math.exp %615 : vector<2x32xf32>
    %cst_348 = arith.constant 1.000000e+00 : f32
    %617 = vector.broadcast %cst_348 : f32 to vector<2x32xf32>
    %618 = arith.addf %617, %616 : vector<2x32xf32>
    %619 = arith.divf %617, %618 : vector<2x32xf32>
    %620 = arith.addf %603, %610 : vector<2x32xf32>
    %621 = arith.negf %620 : vector<2x32xf32>
    %622 = math.exp %621 : vector<2x32xf32>
    %cst_349 = arith.constant 1.000000e+00 : f32
    %623 = vector.broadcast %cst_349 : f32 to vector<2x32xf32>
    %624 = arith.addf %623, %622 : vector<2x32xf32>
    %625 = arith.divf %623, %624 : vector<2x32xf32>
    %626 = arith.addf %613, %600 : vector<2x32xf32>
    %627 = arith.mulf %619, %626 : vector<2x32xf32>
    %628 = arith.addf %604, %627 : vector<2x32xf32>
    %629 = math.tanh %628 : vector<2x32xf32>
    %630 = arith.subf %601, %629 : vector<2x32xf32>
    %631 = arith.mulf %625, %630 : vector<2x32xf32>
    %632 = arith.addf %629, %631 : vector<2x32xf32>
    %633 = vector.extract_strided_slice %575 {offsets = [2, 0], sizes = [2, 32], strides = [1, 1]} : vector<16x32xf32> to vector<2x32xf32>
    %634 = vector.extract_strided_slice %586 {offsets = [2, 0], sizes = [2, 32], strides = [1, 1]} : vector<16x32xf32> to vector<2x32xf32>
    %635 = vector.extract_strided_slice %597 {offsets = [2, 0], sizes = [2, 32], strides = [1, 1]} : vector<16x32xf32> to vector<2x32xf32>
    %c0_350 = arith.constant 0 : index
    %c0_351 = arith.constant 0 : index
    %c0_352 = arith.constant 0 : index
    %636 = vector.load %arg11[%c0_350, %c0_351, %c0_352] : memref<3x32x32xf32, #tpu.memory_space<vmem>>, vector<1x32x32xf32>
    %637 = vector.shape_cast %636 : vector<1x32x32xf32> to vector<32x32xf32>
    %cst_353 = arith.constant dense<0.000000e+00> : vector<2x32xf32>
    %638 = tpu.matmul %632, %637, %cst_353 {dimension_numbers = #tpu.dot_dimension_numbers<[1], [0], [0], [1], [0, 0, 1, 1], [], []>} : vector<2x32xf32>, vector<32x32xf32>, vector<2x32xf32> -> vector<2x32xf32>
    %c1_354 = arith.constant 1 : index
    %c0_355 = arith.constant 0 : index
    %c0_356 = arith.constant 0 : index
    %639 = vector.load %arg11[%c1_354, %c0_355, %c0_356] : memref<3x32x32xf32, #tpu.memory_space<vmem>>, vector<1x32x32xf32>
    %640 = vector.shape_cast %639 : vector<1x32x32xf32> to vector<32x32xf32>
    %cst_357 = arith.constant dense<0.000000e+00> : vector<2x32xf32>
    %641 = tpu.matmul %632, %640, %cst_357 {dimension_numbers = #tpu.dot_dimension_numbers<[1], [0], [0], [1], [0, 0, 1, 1], [], []>} : vector<2x32xf32>, vector<32x32xf32>, vector<2x32xf32> -> vector<2x32xf32>
    %c2_358 = arith.constant 2 : index
    %c0_359 = arith.constant 0 : index
    %c0_360 = arith.constant 0 : index
    %642 = vector.load %arg11[%c2_358, %c0_359, %c0_360] : memref<3x32x32xf32, #tpu.memory_space<vmem>>, vector<1x32x32xf32>
    %643 = vector.shape_cast %642 : vector<1x32x32xf32> to vector<32x32xf32>
    %cst_361 = arith.constant dense<0.000000e+00> : vector<2x32xf32>
    %644 = tpu.matmul %632, %643, %cst_361 {dimension_numbers = #tpu.dot_dimension_numbers<[1], [0], [0], [1], [0, 0, 1, 1], [], []>} : vector<2x32xf32>, vector<32x32xf32>, vector<2x32xf32> -> vector<2x32xf32>
    %645 = arith.addf %633, %638 : vector<2x32xf32>
    %646 = arith.negf %645 : vector<2x32xf32>
    %647 = math.exp %646 : vector<2x32xf32>
    %cst_362 = arith.constant 1.000000e+00 : f32
    %648 = vector.broadcast %cst_362 : f32 to vector<2x32xf32>
    %649 = arith.addf %648, %647 : vector<2x32xf32>
    %650 = arith.divf %648, %649 : vector<2x32xf32>
    %651 = arith.addf %634, %641 : vector<2x32xf32>
    %652 = arith.negf %651 : vector<2x32xf32>
    %653 = math.exp %652 : vector<2x32xf32>
    %cst_363 = arith.constant 1.000000e+00 : f32
    %654 = vector.broadcast %cst_363 : f32 to vector<2x32xf32>
    %655 = arith.addf %654, %653 : vector<2x32xf32>
    %656 = arith.divf %654, %655 : vector<2x32xf32>
    %657 = arith.addf %644, %600 : vector<2x32xf32>
    %658 = arith.mulf %650, %657 : vector<2x32xf32>
    %659 = arith.addf %635, %658 : vector<2x32xf32>
    %660 = math.tanh %659 : vector<2x32xf32>
    %661 = arith.subf %632, %660 : vector<2x32xf32>
    %662 = arith.mulf %656, %661 : vector<2x32xf32>
    %663 = arith.addf %660, %662 : vector<2x32xf32>
    %664 = vector.extract_strided_slice %575 {offsets = [4, 0], sizes = [2, 32], strides = [1, 1]} : vector<16x32xf32> to vector<2x32xf32>
    %665 = vector.extract_strided_slice %586 {offsets = [4, 0], sizes = [2, 32], strides = [1, 1]} : vector<16x32xf32> to vector<2x32xf32>
    %666 = vector.extract_strided_slice %597 {offsets = [4, 0], sizes = [2, 32], strides = [1, 1]} : vector<16x32xf32> to vector<2x32xf32>
    %c0_364 = arith.constant 0 : index
    %c0_365 = arith.constant 0 : index
    %c0_366 = arith.constant 0 : index
    %667 = vector.load %arg11[%c0_364, %c0_365, %c0_366] : memref<3x32x32xf32, #tpu.memory_space<vmem>>, vector<1x32x32xf32>
    %668 = vector.shape_cast %667 : vector<1x32x32xf32> to vector<32x32xf32>
    %cst_367 = arith.constant dense<0.000000e+00> : vector<2x32xf32>
    %669 = tpu.matmul %663, %668, %cst_367 {dimension_numbers = #tpu.dot_dimension_numbers<[1], [0], [0], [1], [0, 0, 1, 1], [], []>} : vector<2x32xf32>, vector<32x32xf32>, vector<2x32xf32> -> vector<2x32xf32>
    %c1_368 = arith.constant 1 : index
    %c0_369 = arith.constant 0 : index
    %c0_370 = arith.constant 0 : index
    %670 = vector.load %arg11[%c1_368, %c0_369, %c0_370] : memref<3x32x32xf32, #tpu.memory_space<vmem>>, vector<1x32x32xf32>
    %671 = vector.shape_cast %670 : vector<1x32x32xf32> to vector<32x32xf32>
    %cst_371 = arith.constant dense<0.000000e+00> : vector<2x32xf32>
    %672 = tpu.matmul %663, %671, %cst_371 {dimension_numbers = #tpu.dot_dimension_numbers<[1], [0], [0], [1], [0, 0, 1, 1], [], []>} : vector<2x32xf32>, vector<32x32xf32>, vector<2x32xf32> -> vector<2x32xf32>
    %c2_372 = arith.constant 2 : index
    %c0_373 = arith.constant 0 : index
    %c0_374 = arith.constant 0 : index
    %673 = vector.load %arg11[%c2_372, %c0_373, %c0_374] : memref<3x32x32xf32, #tpu.memory_space<vmem>>, vector<1x32x32xf32>
    %674 = vector.shape_cast %673 : vector<1x32x32xf32> to vector<32x32xf32>
    %cst_375 = arith.constant dense<0.000000e+00> : vector<2x32xf32>
    %675 = tpu.matmul %663, %674, %cst_375 {dimension_numbers = #tpu.dot_dimension_numbers<[1], [0], [0], [1], [0, 0, 1, 1], [], []>} : vector<2x32xf32>, vector<32x32xf32>, vector<2x32xf32> -> vector<2x32xf32>
    %676 = arith.addf %664, %669 : vector<2x32xf32>
    %677 = arith.negf %676 : vector<2x32xf32>
    %678 = math.exp %677 : vector<2x32xf32>
    %cst_376 = arith.constant 1.000000e+00 : f32
    %679 = vector.broadcast %cst_376 : f32 to vector<2x32xf32>
    %680 = arith.addf %679, %678 : vector<2x32xf32>
    %681 = arith.divf %679, %680 : vector<2x32xf32>
    %682 = arith.addf %665, %672 : vector<2x32xf32>
    %683 = arith.negf %682 : vector<2x32xf32>
    %684 = math.exp %683 : vector<2x32xf32>
    %cst_377 = arith.constant 1.000000e+00 : f32
    %685 = vector.broadcast %cst_377 : f32 to vector<2x32xf32>
    %686 = arith.addf %685, %684 : vector<2x32xf32>
    %687 = arith.divf %685, %686 : vector<2x32xf32>
    %688 = arith.addf %675, %600 : vector<2x32xf32>
    %689 = arith.mulf %681, %688 : vector<2x32xf32>
    %690 = arith.addf %666, %689 : vector<2x32xf32>
    %691 = math.tanh %690 : vector<2x32xf32>
    %692 = arith.subf %663, %691 : vector<2x32xf32>
    %693 = arith.mulf %687, %692 : vector<2x32xf32>
    %694 = arith.addf %691, %693 : vector<2x32xf32>
    %695 = vector.extract_strided_slice %575 {offsets = [6, 0], sizes = [2, 32], strides = [1, 1]} : vector<16x32xf32> to vector<2x32xf32>
    %696 = vector.extract_strided_slice %586 {offsets = [6, 0], sizes = [2, 32], strides = [1, 1]} : vector<16x32xf32> to vector<2x32xf32>
    %697 = vector.extract_strided_slice %597 {offsets = [6, 0], sizes = [2, 32], strides = [1, 1]} : vector<16x32xf32> to vector<2x32xf32>
    %c0_378 = arith.constant 0 : index
    %c0_379 = arith.constant 0 : index
    %c0_380 = arith.constant 0 : index
    %698 = vector.load %arg11[%c0_378, %c0_379, %c0_380] : memref<3x32x32xf32, #tpu.memory_space<vmem>>, vector<1x32x32xf32>
    %699 = vector.shape_cast %698 : vector<1x32x32xf32> to vector<32x32xf32>
    %cst_381 = arith.constant dense<0.000000e+00> : vector<2x32xf32>
    %700 = tpu.matmul %694, %699, %cst_381 {dimension_numbers = #tpu.dot_dimension_numbers<[1], [0], [0], [1], [0, 0, 1, 1], [], []>} : vector<2x32xf32>, vector<32x32xf32>, vector<2x32xf32> -> vector<2x32xf32>
    %c1_382 = arith.constant 1 : index
    %c0_383 = arith.constant 0 : index
    %c0_384 = arith.constant 0 : index
    %701 = vector.load %arg11[%c1_382, %c0_383, %c0_384] : memref<3x32x32xf32, #tpu.memory_space<vmem>>, vector<1x32x32xf32>
    %702 = vector.shape_cast %701 : vector<1x32x32xf32> to vector<32x32xf32>
    %cst_385 = arith.constant dense<0.000000e+00> : vector<2x32xf32>
    %703 = tpu.matmul %694, %702, %cst_385 {dimension_numbers = #tpu.dot_dimension_numbers<[1], [0], [0], [1], [0, 0, 1, 1], [], []>} : vector<2x32xf32>, vector<32x32xf32>, vector<2x32xf32> -> vector<2x32xf32>
    %c2_386 = arith.constant 2 : index
    %c0_387 = arith.constant 0 : index
    %c0_388 = arith.constant 0 : index
    %704 = vector.load %arg11[%c2_386, %c0_387, %c0_388] : memref<3x32x32xf32, #tpu.memory_space<vmem>>, vector<1x32x32xf32>
    %705 = vector.shape_cast %704 : vector<1x32x32xf32> to vector<32x32xf32>
    %cst_389 = arith.constant dense<0.000000e+00> : vector<2x32xf32>
    %706 = tpu.matmul %694, %705, %cst_389 {dimension_numbers = #tpu.dot_dimension_numbers<[1], [0], [0], [1], [0, 0, 1, 1], [], []>} : vector<2x32xf32>, vector<32x32xf32>, vector<2x32xf32> -> vector<2x32xf32>
    %707 = arith.addf %695, %700 : vector<2x32xf32>
    %708 = arith.negf %707 : vector<2x32xf32>
    %709 = math.exp %708 : vector<2x32xf32>
    %cst_390 = arith.constant 1.000000e+00 : f32
    %710 = vector.broadcast %cst_390 : f32 to vector<2x32xf32>
    %711 = arith.addf %710, %709 : vector<2x32xf32>
    %712 = arith.divf %710, %711 : vector<2x32xf32>
    %713 = arith.addf %696, %703 : vector<2x32xf32>
    %714 = arith.negf %713 : vector<2x32xf32>
    %715 = math.exp %714 : vector<2x32xf32>
    %cst_391 = arith.constant 1.000000e+00 : f32
    %716 = vector.broadcast %cst_391 : f32 to vector<2x32xf32>
    %717 = arith.addf %716, %715 : vector<2x32xf32>
    %718 = arith.divf %716, %717 : vector<2x32xf32>
    %719 = arith.addf %706, %600 : vector<2x32xf32>
    %720 = arith.mulf %712, %719 : vector<2x32xf32>
    %721 = arith.addf %697, %720 : vector<2x32xf32>
    %722 = math.tanh %721 : vector<2x32xf32>
    %723 = arith.subf %694, %722 : vector<2x32xf32>
    %724 = arith.mulf %718, %723 : vector<2x32xf32>
    %725 = arith.addf %722, %724 : vector<2x32xf32>
    %726 = vector.extract_strided_slice %575 {offsets = [8, 0], sizes = [2, 32], strides = [1, 1]} : vector<16x32xf32> to vector<2x32xf32>
    %727 = vector.extract_strided_slice %586 {offsets = [8, 0], sizes = [2, 32], strides = [1, 1]} : vector<16x32xf32> to vector<2x32xf32>
    %728 = vector.extract_strided_slice %597 {offsets = [8, 0], sizes = [2, 32], strides = [1, 1]} : vector<16x32xf32> to vector<2x32xf32>
    %c0_392 = arith.constant 0 : index
    %c0_393 = arith.constant 0 : index
    %c0_394 = arith.constant 0 : index
    %729 = vector.load %arg11[%c0_392, %c0_393, %c0_394] : memref<3x32x32xf32, #tpu.memory_space<vmem>>, vector<1x32x32xf32>
    %730 = vector.shape_cast %729 : vector<1x32x32xf32> to vector<32x32xf32>
    %cst_395 = arith.constant dense<0.000000e+00> : vector<2x32xf32>
    %731 = tpu.matmul %725, %730, %cst_395 {dimension_numbers = #tpu.dot_dimension_numbers<[1], [0], [0], [1], [0, 0, 1, 1], [], []>} : vector<2x32xf32>, vector<32x32xf32>, vector<2x32xf32> -> vector<2x32xf32>
    %c1_396 = arith.constant 1 : index
    %c0_397 = arith.constant 0 : index
    %c0_398 = arith.constant 0 : index
    %732 = vector.load %arg11[%c1_396, %c0_397, %c0_398] : memref<3x32x32xf32, #tpu.memory_space<vmem>>, vector<1x32x32xf32>
    %733 = vector.shape_cast %732 : vector<1x32x32xf32> to vector<32x32xf32>
    %cst_399 = arith.constant dense<0.000000e+00> : vector<2x32xf32>
    %734 = tpu.matmul %725, %733, %cst_399 {dimension_numbers = #tpu.dot_dimension_numbers<[1], [0], [0], [1], [0, 0, 1, 1], [], []>} : vector<2x32xf32>, vector<32x32xf32>, vector<2x32xf32> -> vector<2x32xf32>
    %c2_400 = arith.constant 2 : index
    %c0_401 = arith.constant 0 : index
    %c0_402 = arith.constant 0 : index
    %735 = vector.load %arg11[%c2_400, %c0_401, %c0_402] : memref<3x32x32xf32, #tpu.memory_space<vmem>>, vector<1x32x32xf32>
    %736 = vector.shape_cast %735 : vector<1x32x32xf32> to vector<32x32xf32>
    %cst_403 = arith.constant dense<0.000000e+00> : vector<2x32xf32>
    %737 = tpu.matmul %725, %736, %cst_403 {dimension_numbers = #tpu.dot_dimension_numbers<[1], [0], [0], [1], [0, 0, 1, 1], [], []>} : vector<2x32xf32>, vector<32x32xf32>, vector<2x32xf32> -> vector<2x32xf32>
    %738 = arith.addf %726, %731 : vector<2x32xf32>
    %739 = arith.negf %738 : vector<2x32xf32>
    %740 = math.exp %739 : vector<2x32xf32>
    %cst_404 = arith.constant 1.000000e+00 : f32
    %741 = vector.broadcast %cst_404 : f32 to vector<2x32xf32>
    %742 = arith.addf %741, %740 : vector<2x32xf32>
    %743 = arith.divf %741, %742 : vector<2x32xf32>
    %744 = arith.addf %727, %734 : vector<2x32xf32>
    %745 = arith.negf %744 : vector<2x32xf32>
    %746 = math.exp %745 : vector<2x32xf32>
    %cst_405 = arith.constant 1.000000e+00 : f32
    %747 = vector.broadcast %cst_405 : f32 to vector<2x32xf32>
    %748 = arith.addf %747, %746 : vector<2x32xf32>
    %749 = arith.divf %747, %748 : vector<2x32xf32>
    %750 = arith.addf %737, %600 : vector<2x32xf32>
    %751 = arith.mulf %743, %750 : vector<2x32xf32>
    %752 = arith.addf %728, %751 : vector<2x32xf32>
    %753 = math.tanh %752 : vector<2x32xf32>
    %754 = arith.subf %725, %753 : vector<2x32xf32>
    %755 = arith.mulf %749, %754 : vector<2x32xf32>
    %756 = arith.addf %753, %755 : vector<2x32xf32>
    %757 = vector.extract_strided_slice %575 {offsets = [10, 0], sizes = [2, 32], strides = [1, 1]} : vector<16x32xf32> to vector<2x32xf32>
    %758 = vector.extract_strided_slice %586 {offsets = [10, 0], sizes = [2, 32], strides = [1, 1]} : vector<16x32xf32> to vector<2x32xf32>
    %759 = vector.extract_strided_slice %597 {offsets = [10, 0], sizes = [2, 32], strides = [1, 1]} : vector<16x32xf32> to vector<2x32xf32>
    %c0_406 = arith.constant 0 : index
    %c0_407 = arith.constant 0 : index
    %c0_408 = arith.constant 0 : index
    %760 = vector.load %arg11[%c0_406, %c0_407, %c0_408] : memref<3x32x32xf32, #tpu.memory_space<vmem>>, vector<1x32x32xf32>
    %761 = vector.shape_cast %760 : vector<1x32x32xf32> to vector<32x32xf32>
    %cst_409 = arith.constant dense<0.000000e+00> : vector<2x32xf32>
    %762 = tpu.matmul %756, %761, %cst_409 {dimension_numbers = #tpu.dot_dimension_numbers<[1], [0], [0], [1], [0, 0, 1, 1], [], []>} : vector<2x32xf32>, vector<32x32xf32>, vector<2x32xf32> -> vector<2x32xf32>
    %c1_410 = arith.constant 1 : index
    %c0_411 = arith.constant 0 : index
    %c0_412 = arith.constant 0 : index
    %763 = vector.load %arg11[%c1_410, %c0_411, %c0_412] : memref<3x32x32xf32, #tpu.memory_space<vmem>>, vector<1x32x32xf32>
    %764 = vector.shape_cast %763 : vector<1x32x32xf32> to vector<32x32xf32>
    %cst_413 = arith.constant dense<0.000000e+00> : vector<2x32xf32>
    %765 = tpu.matmul %756, %764, %cst_413 {dimension_numbers = #tpu.dot_dimension_numbers<[1], [0], [0], [1], [0, 0, 1, 1], [], []>} : vector<2x32xf32>, vector<32x32xf32>, vector<2x32xf32> -> vector<2x32xf32>
    %c2_414 = arith.constant 2 : index
    %c0_415 = arith.constant 0 : index
    %c0_416 = arith.constant 0 : index
    %766 = vector.load %arg11[%c2_414, %c0_415, %c0_416] : memref<3x32x32xf32, #tpu.memory_space<vmem>>, vector<1x32x32xf32>
    %767 = vector.shape_cast %766 : vector<1x32x32xf32> to vector<32x32xf32>
    %cst_417 = arith.constant dense<0.000000e+00> : vector<2x32xf32>
    %768 = tpu.matmul %756, %767, %cst_417 {dimension_numbers = #tpu.dot_dimension_numbers<[1], [0], [0], [1], [0, 0, 1, 1], [], []>} : vector<2x32xf32>, vector<32x32xf32>, vector<2x32xf32> -> vector<2x32xf32>
    %769 = arith.addf %757, %762 : vector<2x32xf32>
    %770 = arith.negf %769 : vector<2x32xf32>
    %771 = math.exp %770 : vector<2x32xf32>
    %cst_418 = arith.constant 1.000000e+00 : f32
    %772 = vector.broadcast %cst_418 : f32 to vector<2x32xf32>
    %773 = arith.addf %772, %771 : vector<2x32xf32>
    %774 = arith.divf %772, %773 : vector<2x32xf32>
    %775 = arith.addf %758, %765 : vector<2x32xf32>
    %776 = arith.negf %775 : vector<2x32xf32>
    %777 = math.exp %776 : vector<2x32xf32>
    %cst_419 = arith.constant 1.000000e+00 : f32
    %778 = vector.broadcast %cst_419 : f32 to vector<2x32xf32>
    %779 = arith.addf %778, %777 : vector<2x32xf32>
    %780 = arith.divf %778, %779 : vector<2x32xf32>
    %781 = arith.addf %768, %600 : vector<2x32xf32>
    %782 = arith.mulf %774, %781 : vector<2x32xf32>
    %783 = arith.addf %759, %782 : vector<2x32xf32>
    %784 = math.tanh %783 : vector<2x32xf32>
    %785 = arith.subf %756, %784 : vector<2x32xf32>
    %786 = arith.mulf %780, %785 : vector<2x32xf32>
    %787 = arith.addf %784, %786 : vector<2x32xf32>
    %788 = vector.extract_strided_slice %575 {offsets = [12, 0], sizes = [2, 32], strides = [1, 1]} : vector<16x32xf32> to vector<2x32xf32>
    %789 = vector.extract_strided_slice %586 {offsets = [12, 0], sizes = [2, 32], strides = [1, 1]} : vector<16x32xf32> to vector<2x32xf32>
    %790 = vector.extract_strided_slice %597 {offsets = [12, 0], sizes = [2, 32], strides = [1, 1]} : vector<16x32xf32> to vector<2x32xf32>
    %c0_420 = arith.constant 0 : index
    %c0_421 = arith.constant 0 : index
    %c0_422 = arith.constant 0 : index
    %791 = vector.load %arg11[%c0_420, %c0_421, %c0_422] : memref<3x32x32xf32, #tpu.memory_space<vmem>>, vector<1x32x32xf32>
    %792 = vector.shape_cast %791 : vector<1x32x32xf32> to vector<32x32xf32>
    %cst_423 = arith.constant dense<0.000000e+00> : vector<2x32xf32>
    %793 = tpu.matmul %787, %792, %cst_423 {dimension_numbers = #tpu.dot_dimension_numbers<[1], [0], [0], [1], [0, 0, 1, 1], [], []>} : vector<2x32xf32>, vector<32x32xf32>, vector<2x32xf32> -> vector<2x32xf32>
    %c1_424 = arith.constant 1 : index
    %c0_425 = arith.constant 0 : index
    %c0_426 = arith.constant 0 : index
    %794 = vector.load %arg11[%c1_424, %c0_425, %c0_426] : memref<3x32x32xf32, #tpu.memory_space<vmem>>, vector<1x32x32xf32>
    %795 = vector.shape_cast %794 : vector<1x32x32xf32> to vector<32x32xf32>
    %cst_427 = arith.constant dense<0.000000e+00> : vector<2x32xf32>
    %796 = tpu.matmul %787, %795, %cst_427 {dimension_numbers = #tpu.dot_dimension_numbers<[1], [0], [0], [1], [0, 0, 1, 1], [], []>} : vector<2x32xf32>, vector<32x32xf32>, vector<2x32xf32> -> vector<2x32xf32>
    %c2_428 = arith.constant 2 : index
    %c0_429 = arith.constant 0 : index
    %c0_430 = arith.constant 0 : index
    %797 = vector.load %arg11[%c2_428, %c0_429, %c0_430] : memref<3x32x32xf32, #tpu.memory_space<vmem>>, vector<1x32x32xf32>
    %798 = vector.shape_cast %797 : vector<1x32x32xf32> to vector<32x32xf32>
    %cst_431 = arith.constant dense<0.000000e+00> : vector<2x32xf32>
    %799 = tpu.matmul %787, %798, %cst_431 {dimension_numbers = #tpu.dot_dimension_numbers<[1], [0], [0], [1], [0, 0, 1, 1], [], []>} : vector<2x32xf32>, vector<32x32xf32>, vector<2x32xf32> -> vector<2x32xf32>
    %800 = arith.addf %788, %793 : vector<2x32xf32>
    %801 = arith.negf %800 : vector<2x32xf32>
    %802 = math.exp %801 : vector<2x32xf32>
    %cst_432 = arith.constant 1.000000e+00 : f32
    %803 = vector.broadcast %cst_432 : f32 to vector<2x32xf32>
    %804 = arith.addf %803, %802 : vector<2x32xf32>
    %805 = arith.divf %803, %804 : vector<2x32xf32>
    %806 = arith.addf %789, %796 : vector<2x32xf32>
    %807 = arith.negf %806 : vector<2x32xf32>
    %808 = math.exp %807 : vector<2x32xf32>
    %cst_433 = arith.constant 1.000000e+00 : f32
    %809 = vector.broadcast %cst_433 : f32 to vector<2x32xf32>
    %810 = arith.addf %809, %808 : vector<2x32xf32>
    %811 = arith.divf %809, %810 : vector<2x32xf32>
    %812 = arith.addf %799, %600 : vector<2x32xf32>
    %813 = arith.mulf %805, %812 : vector<2x32xf32>
    %814 = arith.addf %790, %813 : vector<2x32xf32>
    %815 = math.tanh %814 : vector<2x32xf32>
    %816 = arith.subf %787, %815 : vector<2x32xf32>
    %817 = arith.mulf %811, %816 : vector<2x32xf32>
    %818 = arith.addf %815, %817 : vector<2x32xf32>
    %819 = vector.extract_strided_slice %575 {offsets = [14, 0], sizes = [2, 32], strides = [1, 1]} : vector<16x32xf32> to vector<2x32xf32>
    %820 = vector.extract_strided_slice %586 {offsets = [14, 0], sizes = [2, 32], strides = [1, 1]} : vector<16x32xf32> to vector<2x32xf32>
    %821 = vector.extract_strided_slice %597 {offsets = [14, 0], sizes = [2, 32], strides = [1, 1]} : vector<16x32xf32> to vector<2x32xf32>
    %c0_434 = arith.constant 0 : index
    %c0_435 = arith.constant 0 : index
    %c0_436 = arith.constant 0 : index
    %822 = vector.load %arg11[%c0_434, %c0_435, %c0_436] : memref<3x32x32xf32, #tpu.memory_space<vmem>>, vector<1x32x32xf32>
    %823 = vector.shape_cast %822 : vector<1x32x32xf32> to vector<32x32xf32>
    %cst_437 = arith.constant dense<0.000000e+00> : vector<2x32xf32>
    %824 = tpu.matmul %818, %823, %cst_437 {dimension_numbers = #tpu.dot_dimension_numbers<[1], [0], [0], [1], [0, 0, 1, 1], [], []>} : vector<2x32xf32>, vector<32x32xf32>, vector<2x32xf32> -> vector<2x32xf32>
    %c1_438 = arith.constant 1 : index
    %c0_439 = arith.constant 0 : index
    %c0_440 = arith.constant 0 : index
    %825 = vector.load %arg11[%c1_438, %c0_439, %c0_440] : memref<3x32x32xf32, #tpu.memory_space<vmem>>, vector<1x32x32xf32>
    %826 = vector.shape_cast %825 : vector<1x32x32xf32> to vector<32x32xf32>
    %cst_441 = arith.constant dense<0.000000e+00> : vector<2x32xf32>
    %827 = tpu.matmul %818, %826, %cst_441 {dimension_numbers = #tpu.dot_dimension_numbers<[1], [0], [0], [1], [0, 0, 1, 1], [], []>} : vector<2x32xf32>, vector<32x32xf32>, vector<2x32xf32> -> vector<2x32xf32>
    %c2_442 = arith.constant 2 : index
    %c0_443 = arith.constant 0 : index
    %c0_444 = arith.constant 0 : index
    %828 = vector.load %arg11[%c2_442, %c0_443, %c0_444] : memref<3x32x32xf32, #tpu.memory_space<vmem>>, vector<1x32x32xf32>
    %829 = vector.shape_cast %828 : vector<1x32x32xf32> to vector<32x32xf32>
    %cst_445 = arith.constant dense<0.000000e+00> : vector<2x32xf32>
    %830 = tpu.matmul %818, %829, %cst_445 {dimension_numbers = #tpu.dot_dimension_numbers<[1], [0], [0], [1], [0, 0, 1, 1], [], []>} : vector<2x32xf32>, vector<32x32xf32>, vector<2x32xf32> -> vector<2x32xf32>
    %831 = arith.addf %819, %824 : vector<2x32xf32>
    %832 = arith.negf %831 : vector<2x32xf32>
    %833 = math.exp %832 : vector<2x32xf32>
    %cst_446 = arith.constant 1.000000e+00 : f32
    %834 = vector.broadcast %cst_446 : f32 to vector<2x32xf32>
    %835 = arith.addf %834, %833 : vector<2x32xf32>
    %836 = arith.divf %834, %835 : vector<2x32xf32>
    %837 = arith.addf %820, %827 : vector<2x32xf32>
    %838 = arith.negf %837 : vector<2x32xf32>
    %839 = math.exp %838 : vector<2x32xf32>
    %cst_447 = arith.constant 1.000000e+00 : f32
    %840 = vector.broadcast %cst_447 : f32 to vector<2x32xf32>
    %841 = arith.addf %840, %839 : vector<2x32xf32>
    %842 = arith.divf %840, %841 : vector<2x32xf32>
    %843 = arith.addf %830, %600 : vector<2x32xf32>
    %844 = arith.mulf %836, %843 : vector<2x32xf32>
    %845 = arith.addf %821, %844 : vector<2x32xf32>
    %846 = math.tanh %845 : vector<2x32xf32>
    %847 = arith.subf %818, %846 : vector<2x32xf32>
    %848 = arith.mulf %842, %847 : vector<2x32xf32>
    %849 = arith.addf %846, %848 : vector<2x32xf32>
    %c0_448 = arith.constant 0 : index
    %c0_449 = arith.constant 0 : index
    %c0_450 = arith.constant 0 : index
    %850 = vector.load %arg14[%c0_448, %c0_449, %c0_450] : memref<3x32x32xf32, #tpu.memory_space<vmem>>, vector<1x32x32xf32>
    %851 = vector.shape_cast %850 : vector<1x32x32xf32> to vector<32x32xf32>
    %cst_451 = arith.constant dense<0.000000e+00> : vector<2x32xf32>
    %852 = tpu.matmul %529, %851, %cst_451 {dimension_numbers = #tpu.dot_dimension_numbers<[1], [0], [0], [1], [0, 0, 1, 1], [], []>} : vector<2x32xf32>, vector<32x32xf32>, vector<2x32xf32> -> vector<2x32xf32>
    %c0_452 = arith.constant 0 : index
    %c0_453 = arith.constant 0 : index
    %c0_454 = arith.constant 0 : index
    %853 = vector.load %arg15[%c0_452, %c0_453, %c0_454] : memref<3x32x32xf32, #tpu.memory_space<vmem>>, vector<1x32x32xf32>
    %854 = vector.shape_cast %853 : vector<1x32x32xf32> to vector<32x32xf32>
    %cst_455 = arith.constant dense<0.000000e+00> : vector<2x32xf32>
    %855 = tpu.matmul %112, %854, %cst_455 {dimension_numbers = #tpu.dot_dimension_numbers<[1], [0], [0], [1], [0, 0, 1, 1], [], []>} : vector<2x32xf32>, vector<32x32xf32>, vector<2x32xf32> -> vector<2x32xf32>
    %856 = arith.addf %852, %855 : vector<2x32xf32>
    %c0_456 = arith.constant 0 : index
    %c0_457 = arith.constant 0 : index
    %c0_458 = arith.constant 0 : index
    %857 = vector.load %arg17[%c0_456, %c0_457, %c0_458] : memref<3x1x32xf32, #tpu.memory_space<vmem>>, vector<1x1x32xf32>
    %858 = vector.shape_cast %857 : vector<1x1x32xf32> to vector<1x32xf32>
    %859 = vector.broadcast %858 : vector<1x32xf32> to vector<2x32xf32>
    %860 = arith.addf %856, %859 : vector<2x32xf32>
    %c1_459 = arith.constant 1 : index
    %c0_460 = arith.constant 0 : index
    %c0_461 = arith.constant 0 : index
    %861 = vector.load %arg14[%c1_459, %c0_460, %c0_461] : memref<3x32x32xf32, #tpu.memory_space<vmem>>, vector<1x32x32xf32>
    %862 = vector.shape_cast %861 : vector<1x32x32xf32> to vector<32x32xf32>
    %cst_462 = arith.constant dense<0.000000e+00> : vector<2x32xf32>
    %863 = tpu.matmul %529, %862, %cst_462 {dimension_numbers = #tpu.dot_dimension_numbers<[1], [0], [0], [1], [0, 0, 1, 1], [], []>} : vector<2x32xf32>, vector<32x32xf32>, vector<2x32xf32> -> vector<2x32xf32>
    %c1_463 = arith.constant 1 : index
    %c0_464 = arith.constant 0 : index
    %c0_465 = arith.constant 0 : index
    %864 = vector.load %arg15[%c1_463, %c0_464, %c0_465] : memref<3x32x32xf32, #tpu.memory_space<vmem>>, vector<1x32x32xf32>
    %865 = vector.shape_cast %864 : vector<1x32x32xf32> to vector<32x32xf32>
    %cst_466 = arith.constant dense<0.000000e+00> : vector<2x32xf32>
    %866 = tpu.matmul %112, %865, %cst_466 {dimension_numbers = #tpu.dot_dimension_numbers<[1], [0], [0], [1], [0, 0, 1, 1], [], []>} : vector<2x32xf32>, vector<32x32xf32>, vector<2x32xf32> -> vector<2x32xf32>
    %867 = arith.addf %863, %866 : vector<2x32xf32>
    %c1_467 = arith.constant 1 : index
    %c0_468 = arith.constant 0 : index
    %c0_469 = arith.constant 0 : index
    %868 = vector.load %arg17[%c1_467, %c0_468, %c0_469] : memref<3x1x32xf32, #tpu.memory_space<vmem>>, vector<1x1x32xf32>
    %869 = vector.shape_cast %868 : vector<1x1x32xf32> to vector<1x32xf32>
    %870 = vector.broadcast %869 : vector<1x32xf32> to vector<2x32xf32>
    %871 = arith.addf %867, %870 : vector<2x32xf32>
    %c2_470 = arith.constant 2 : index
    %c0_471 = arith.constant 0 : index
    %c0_472 = arith.constant 0 : index
    %872 = vector.load %arg14[%c2_470, %c0_471, %c0_472] : memref<3x32x32xf32, #tpu.memory_space<vmem>>, vector<1x32x32xf32>
    %873 = vector.shape_cast %872 : vector<1x32x32xf32> to vector<32x32xf32>
    %cst_473 = arith.constant dense<0.000000e+00> : vector<2x32xf32>
    %874 = tpu.matmul %529, %873, %cst_473 {dimension_numbers = #tpu.dot_dimension_numbers<[1], [0], [0], [1], [0, 0, 1, 1], [], []>} : vector<2x32xf32>, vector<32x32xf32>, vector<2x32xf32> -> vector<2x32xf32>
    %c2_474 = arith.constant 2 : index
    %c0_475 = arith.constant 0 : index
    %c0_476 = arith.constant 0 : index
    %875 = vector.load %arg15[%c2_474, %c0_475, %c0_476] : memref<3x32x32xf32, #tpu.memory_space<vmem>>, vector<1x32x32xf32>
    %876 = vector.shape_cast %875 : vector<1x32x32xf32> to vector<32x32xf32>
    %cst_477 = arith.constant dense<0.000000e+00> : vector<2x32xf32>
    %877 = tpu.matmul %112, %876, %cst_477 {dimension_numbers = #tpu.dot_dimension_numbers<[1], [0], [0], [1], [0, 0, 1, 1], [], []>} : vector<2x32xf32>, vector<32x32xf32>, vector<2x32xf32> -> vector<2x32xf32>
    %878 = arith.addf %874, %877 : vector<2x32xf32>
    %c2_478 = arith.constant 2 : index
    %c0_479 = arith.constant 0 : index
    %c0_480 = arith.constant 0 : index
    %879 = vector.load %arg17[%c2_478, %c0_479, %c0_480] : memref<3x1x32xf32, #tpu.memory_space<vmem>>, vector<1x1x32xf32>
    %880 = vector.shape_cast %879 : vector<1x1x32xf32> to vector<1x32xf32>
    %881 = vector.broadcast %880 : vector<1x32xf32> to vector<2x32xf32>
    %882 = arith.addf %878, %881 : vector<2x32xf32>
    %c0_481 = arith.constant 0 : index
    %c0_482 = arith.constant 0 : index
    %883 = vector.load %arg18[%c0_481, %c0_482] : memref<1x32xf32, #tpu.memory_space<vmem>>, vector<1x32xf32>
    %884 = vector.shape_cast %883 : vector<1x32xf32> to vector<1x32xf32>
    %885 = vector.broadcast %884 : vector<1x32xf32> to vector<2x32xf32>
    %cst_483 = arith.constant 0.000000e+00 : f32
    %886 = vector.broadcast %cst_483 : f32 to vector<2x32xf32>
    %c0_484 = arith.constant 0 : index
    %c0_485 = arith.constant 0 : index
    %c0_486 = arith.constant 0 : index
    %887 = vector.load %arg16[%c0_484, %c0_485, %c0_486] : memref<3x32x32xf32, #tpu.memory_space<vmem>>, vector<1x32x32xf32>
    %888 = vector.shape_cast %887 : vector<1x32x32xf32> to vector<32x32xf32>
    %cst_487 = arith.constant dense<0.000000e+00> : vector<2x32xf32>
    %889 = tpu.matmul %886, %888, %cst_487 {dimension_numbers = #tpu.dot_dimension_numbers<[1], [0], [0], [1], [0, 0, 1, 1], [], []>} : vector<2x32xf32>, vector<32x32xf32>, vector<2x32xf32> -> vector<2x32xf32>
    %c1_488 = arith.constant 1 : index
    %c0_489 = arith.constant 0 : index
    %c0_490 = arith.constant 0 : index
    %890 = vector.load %arg16[%c1_488, %c0_489, %c0_490] : memref<3x32x32xf32, #tpu.memory_space<vmem>>, vector<1x32x32xf32>
    %891 = vector.shape_cast %890 : vector<1x32x32xf32> to vector<32x32xf32>
    %cst_491 = arith.constant dense<0.000000e+00> : vector<2x32xf32>
    %892 = tpu.matmul %886, %891, %cst_491 {dimension_numbers = #tpu.dot_dimension_numbers<[1], [0], [0], [1], [0, 0, 1, 1], [], []>} : vector<2x32xf32>, vector<32x32xf32>, vector<2x32xf32> -> vector<2x32xf32>
    %c2_492 = arith.constant 2 : index
    %c0_493 = arith.constant 0 : index
    %c0_494 = arith.constant 0 : index
    %893 = vector.load %arg16[%c2_492, %c0_493, %c0_494] : memref<3x32x32xf32, #tpu.memory_space<vmem>>, vector<1x32x32xf32>
    %894 = vector.shape_cast %893 : vector<1x32x32xf32> to vector<32x32xf32>
    %cst_495 = arith.constant dense<0.000000e+00> : vector<2x32xf32>
    %895 = tpu.matmul %886, %894, %cst_495 {dimension_numbers = #tpu.dot_dimension_numbers<[1], [0], [0], [1], [0, 0, 1, 1], [], []>} : vector<2x32xf32>, vector<32x32xf32>, vector<2x32xf32> -> vector<2x32xf32>
    %896 = arith.addf %860, %889 : vector<2x32xf32>
    %897 = arith.negf %896 : vector<2x32xf32>
    %898 = math.exp %897 : vector<2x32xf32>
    %cst_496 = arith.constant 1.000000e+00 : f32
    %899 = vector.broadcast %cst_496 : f32 to vector<2x32xf32>
    %900 = arith.addf %899, %898 : vector<2x32xf32>
    %901 = arith.divf %899, %900 : vector<2x32xf32>
    %902 = arith.addf %871, %892 : vector<2x32xf32>
    %903 = arith.negf %902 : vector<2x32xf32>
    %904 = math.exp %903 : vector<2x32xf32>
    %cst_497 = arith.constant 1.000000e+00 : f32
    %905 = vector.broadcast %cst_497 : f32 to vector<2x32xf32>
    %906 = arith.addf %905, %904 : vector<2x32xf32>
    %907 = arith.divf %905, %906 : vector<2x32xf32>
    %908 = arith.addf %895, %885 : vector<2x32xf32>
    %909 = arith.mulf %901, %908 : vector<2x32xf32>
    %910 = arith.addf %882, %909 : vector<2x32xf32>
    %911 = math.tanh %910 : vector<2x32xf32>
    %912 = arith.subf %886, %911 : vector<2x32xf32>
    %913 = arith.mulf %907, %912 : vector<2x32xf32>
    %914 = arith.addf %911, %913 : vector<2x32xf32>
    %c0_498 = arith.constant 0 : index
    %c0_499 = arith.constant 0 : index
    %915 = vector.load %arg19[%c0_498, %c0_499] : memref<32x32xf32, #tpu.memory_space<vmem>>, vector<32x32xf32>
    %cst_500 = arith.constant dense<0.000000e+00> : vector<2x32xf32>
    %916 = tpu.matmul %849, %915, %cst_500 {dimension_numbers = #tpu.dot_dimension_numbers<[1], [0], [0], [1], [0, 0, 1, 1], [], []>} : vector<2x32xf32>, vector<32x32xf32>, vector<2x32xf32> -> vector<2x32xf32>
    %c0_501 = arith.constant 0 : index
    %c0_502 = arith.constant 0 : index
    %917 = vector.load %arg20[%c0_501, %c0_502] : memref<32x32xf32, #tpu.memory_space<vmem>>, vector<32x32xf32>
    %cst_503 = arith.constant dense<0.000000e+00> : vector<2x32xf32>
    %918 = tpu.matmul %914, %917, %cst_503 {dimension_numbers = #tpu.dot_dimension_numbers<[1], [0], [0], [1], [0, 0, 1, 1], [], []>} : vector<2x32xf32>, vector<32x32xf32>, vector<2x32xf32> -> vector<2x32xf32>
    %919 = arith.addf %916, %918 : vector<2x32xf32>
    %c0_504 = arith.constant 0 : index
    %c0_505 = arith.constant 0 : index
    %920 = vector.load %arg21[%c0_504, %c0_505] : memref<1x32xf32, #tpu.memory_space<vmem>>, vector<1x32xf32>
    %921 = vector.broadcast %920 : vector<1x32xf32> to vector<2x32xf32>
    %922 = arith.addf %919, %921 : vector<2x32xf32>
    %c0_506 = arith.constant 0 : index
    %c0_507 = arith.constant 0 : index
    %923 = vector.load %arg22[%c0_506, %c0_507] : memref<2x32xf32, #tpu.memory_space<vmem>>, vector<2x32xf32>
    tpu.vector_store %arg22[%c0_506, %c0_507], %922 {strides = array<i32>} : memref<2x32xf32, #tpu.memory_space<vmem>>, vector<2x32xf32>,
    return
  }
}

</mosaic_0001>

<bundles_post_ra>
// kernel: gru_model_forward.1
= control target key start
LH: loop header
LB: loop body
LE: loop exit
PB: predicated region body
PF: predicated region fallthrough
CT: control target
= control target key end

     0   :  { %s12283_s0 = inlined_call_operand.vmem [shape: f32[16,32], index: 0, kind: input, shape index: {}]   ;;  %s12284_s1 = inlined_call_operand.vmem [shape: f32[3,32,32], index: 1, kind: input, shape index: {}]   ;;  %s12285_s2 = inlined_call_operand.vmem [shape: f32[3,32,32], index: 2, kind: input, shape index: {}]   ;;  %s12286_s3 = inlined_call_operand.vmem [shape: f32[3,1,32], index: 3, kind: input, shape index: {}]   ;;  %s12287_s4 = inlined_call_operand.vmem [shape: f32[1,32], index: 4, kind: input, shape index: {}]   ;;  %s12288_s5 = inlined_call_operand.vmem [shape: f32[3,32,32], index: 5, kind: input, shape index: {}]   ;;  %s12289_s6 = inlined_call_operand.vmem [shape: f32[3,32,32], index: 6, kind: input, shape index: {}]   ;;  %s12290_s7 = inlined_call_operand.vmem [shape: f32[3,1,32], index: 7, kind: input, shape index: {}]   ;;  %s12291_s8 = inlined_call_operand.vmem [shape: f32[1,32], index: 8, kind: input, shape index: {}]   ;;  %s12292_s9 = inlined_call_operand.vmem [shape: f32[3,32,32], index: 9, kind: input, shape index: {}]   ;;  %s12293_s10 = inlined_call_operand.vmem [shape: f32[3,32,32], index: 10, kind: input, shape index: {}]   ;;  %s12294_s11 = inlined_call_operand.vmem [shape: f32[3,32,32], index: 11, kind: input, shape index: {}]   ;;  %s12295_s12 = inlined_call_operand.vmem [shape: f32[3,1,32], index: 12, kind: input, shape index: {}]   ;;  %s12296_s13 = inlined_call_operand.vmem [shape: f32[1,32], index: 13, kind: input, shape index: {}]   ;;  %s12297_s14 = inlined_call_operand.vmem [shape: f32[3,32,32], index: 14, kind: input, shape index: {}]   ;;  %s12298_s15 = inlined_call_operand.vmem [shape: f32[3,32,32], index: 15, kind: input, shape index: {}]   ;;  %s12299_s16 = inlined_call_operand.vmem [shape: f32[3,32,32], index: 16, kind: input, shape index: {}]   ;;  %s12300_s17 = inlined_call_operand.vmem [shape: f32[3,1,32], index: 17, kind: input, shape index: {}]   ;;  %s12301_s18 = inlined_call_operand.vmem [shape: f32[1,32], index: 18, kind: input, shape index: {}]   ;;  %s12302_s19 = inlined_call_operand.vmem [shape: f32[32,32], index: 19, kind: input, shape index: {}]   ;;  %s12303_s20 = inlined_call_operand.vmem [shape: f32[32,32], index: 20, kind: input, shape index: {}]   ;;  %s12304_s21 = inlined_call_operand.vmem [shape: f32[1,32], index: 21, kind: input, shape index: {}]   ;;  %s12305_s22 = inlined_call_operand.hbm [shape: f32[2,32], index: 22, kind: output, shape index: {}]  }
   0x1   :  { %12313 = sst [smem:[#allocation7_spill]] %s12283_s0 }
   0x2   :  { %12314 = sst [smem:[#allocation8_spill]] %s12284_s1 }
   0x3   :  { %12315 = sst [smem:[#allocation9_spill]] %s12285_s2 }
   0x4   :  { %12316 = sst [smem:[#allocation10_spill]] %s12286_s3 }
   0x5   :  { %12317 = sst [smem:[#allocation11_spill]] %s12287_s4 }
   0x6   :  { %12318 = sst [smem:[#allocation12_spill]] %s12288_s5 }
   0x7   :  { %12319 = sst [smem:[#allocation13_spill]] %s12289_s6 }
   0x8   :  { %s12320_s29 = sld [smem:[#allocation8_spill]]  ;;  %vm85_vm0 = vcmask 261120  }
   0x9   :  { %s12321_s0 = sld [smem:[#allocation7_spill]] }
   0xa   :  { %s12322_s26 = sld [smem:[#allocation12_spill]] }
   0xe   :  { %v77_v0 = vld [vmem:[%s12320_s29 + $0x18] sm:$0xff]  ;;  %v76_v2 = vld [vmem:[%s12320_s29 + $0x10] sm:$0xff]  ;;  %v75_v4 = vld [vmem:[%s12320_s29 + $0x8] sm:$0xff] }
   0xf   :  { %v8182_v1 = vld [vmem:[%s12320_s29 + $0x38] sm:$0xff]  ;;  %9025 = vmatprep.subr.mxu0 %v77_v0  ;;  %v8181_v3 = vld [vmem:[%s12320_s29 + $0x30] sm:$0xff]  ;;  %v8180_v5 = vld [vmem:[%s12320_s29 + $0x28] sm:$0xff] }
  0x10   :  { %9036 = vmatprep.subr.mxu1 %v8182_v1  ;;  %9026 = vmatpush3.msra.mxu0 %v77_v0  ;;  %v74_v6 = vld [vmem:[%s12320_s29] sm:$0xff]  ;;  %v10498_v9 = vld [vmem:[%s12321_s0 + $0x8] sm:$0xff]  ;;  %v8190_v10 = vld [vmem:[%s12320_s29 + $0x58] sm:$0xff] }
  0x11   :  { %9037 = vmatpush3.msra.mxu1 %v8182_v1  ;;  %9027 = vmatprep.subr.mxu0 %v76_v2  ;;  %v8179_v7 = vld [vmem:[%s12320_s29 + $0x20] sm:$0xff]  ;;  %v346_v11 = vld [vmem:[%s12322_s26 + $0x18] sm:$0xff]  ;;  %v8189_v12 = vld [vmem:[%s12320_s29 + $0x50] sm:$0xff] }
  0x12   :  { %9038 = vmatprep.subr.mxu1 %v8181_v3  ;;  %9028 = vmatpush3.msra.mxu0 %v76_v2  ;;  %v10493_v8 = vld [vmem:[%s12321_s0] sm:$0xff]  ;;  %v345_v13 = vld [vmem:[%s12322_s26 + $0x10] sm:$0xff]  ;;  %v8188_v14 = vld [vmem:[%s12320_s29 + $0x48] sm:$0xff] }
  0x13   :  { %9039 = vmatpush3.msra.mxu1 %v8181_v3  ;;  %9029 = vmatprep.subr.mxu0 %v75_v4  ;;  %v344_v15 = vld [vmem:[%s12322_s26 + $0x8] sm:$0xff]  ;;  %v8187_v16 = vld [vmem:[%s12320_s29 + $0x40] sm:$0xff] }
  0x14   :  { %9040 = vmatprep.subr.mxu1 %v8180_v5  ;;  %9030 = vmatpush3.msra.mxu0 %v75_v4  ;;  %v343_v17 = vld [vmem:[%s12322_s26] sm:$0xff] }
  0x15   :  { %9041 = vmatpush3.msra.mxu1 %v8180_v5  ;;  %9031 = vmatprep.subr.mxu0 %v74_v6 }
  0x16   :  { %9042 = vmatprep.subr.mxu1 %v8179_v7  ;;  %9032 = vmatpush3.msra.mxu0 %v74_v6 }
  0x17   :  { %9033 = vmatprep.mubr.msk.f32.mxu0 %vm85_vm0, %v10493_v8  ;;  %9043 = vmatpush3.msra.mxu1 %v8179_v7 }
  0x18   :  { %9044 = vmatprep.mubr.msk.f32.mxu1 %vm85_vm0, %v10493_v8  ;;  %9034 = vmatmul.mubr.msk.f32.vlgmr.msra.gmra.mxu0 %vm85_vm0, %v10498_v9 }
  0x19   :  { %9045 = vmatmul.mubr.msk.f32.vlgmr.msra.gmra.mxu1 %vm85_vm0, %v10498_v9  ;;  %9047 = vmatprep.subr.mxu0 %v8190_v10 }
  0x1a   :  { %9058 = vmatprep.subr.mxu1 %v346_v11  ;;  %9048 = vmatpush3.msra.mxu0 %v8190_v10 }
  0x1b   :  { %9059 = vmatpush3.msra.mxu1 %v346_v11  ;;  %9049 = vmatprep.subr.mxu0 %v8189_v12 }
  0x1c   :  { %9060 = vmatprep.subr.mxu1 %v345_v13  ;;  %9050 = vmatpush3.msra.mxu0 %v8189_v12 }
  0x1d   :  { %9061 = vmatpush3.msra.mxu1 %v345_v13  ;;  %9051 = vmatprep.subr.mxu0 %v8188_v14 }
  0x1e   :  { %9062 = vmatprep.subr.mxu1 %v344_v15  ;;  %9052 = vmatpush3.msra.mxu0 %v8188_v14 }
  0x1f   :  { %9063 = vmatpush3.msra.mxu1 %v344_v15 }
  0x20   :  { %27 = vsyncpa [#allocation5], 0  ;;  %9053 = vmatprep.subr.mxu0 %v8187_v16  ;;  %9064 = vmatprep.subr.mxu1 %v343_v17  ;;  %v8201_v18 = vld [vmem:[%s12322_s26 + $0x38] sm:$0xff]  ;;  %v8200_v20 = vld [vmem:[%s12322_s26 + $0x30] sm:$0xff]  ;;  %s12323_s3 = sld [smem:[#allocation9_spill]]  ;;  %v10348_v28 = vmov 0.0  }
  0x21   :  { %9054 = vmatpush3.msra.mxu0 %v8187_v16  ;;  %9055 = vmatprep.mubr.msk.f32.mxu0 %vm85_vm0, %v10493_v8  ;;  %v8209_v19 = vld [vmem:[%s12322_s26 + $0x58] sm:$0xff]  ;;  %v8208_v21 = vld [vmem:[%s12322_s26 + $0x50] sm:$0xff]  ;;  %v8199_v22 = vld [vmem:[%s12322_s26 + $0x28] sm:$0xff]  ;;  %vm10349_vm1 = vmmov 0   ;;  %s12324_s0 = sld [smem:[#allocation13_spill]]  ;;  %vm1119_vm2 = vcmask 254976  }
  0x22   :  { %9065 = vmatpush3.msra.mxu1 %v343_v17  ;;  %9066 = vmatprep.mubr.msk.f32.mxu1 %vm85_vm0, %v10493_v8  ;;  %v8207_v23 = vld [vmem:[%s12322_s26 + $0x48] sm:$0xff]  ;;  %v8198_v24 = vld [vmem:[%s12322_s26 + $0x20] sm:$0xff]  ;;  %s12325_s6 = sld [smem:[#allocation10_spill]]  ;;  %vm1121_vm3 = vcmask 261126   ;;  %vm1644_vm4 = vcmask 257026   ;;  %vm1646_vm5 = vcmask 259076  }
  0x23   :  { %9056 = vmatmul.mubr.msk.f32.vlgmr.msra.gmra.mxu0 %vm85_vm0, %v10498_v9  ;;  %9067 = vmatmul.mubr.msk.f32.vlgmr.msra.gmra.mxu1 %vm85_vm0, %v10498_v9  ;;  %v8206_v25 = vld [vmem:[%s12322_s26 + $0x40] sm:$0xff]  ;;  %s12326_s24 = sld [smem:[#allocation11_spill]]  ;;  %s10350_s30 = smov [#allocation4]  }
  0x24   :  { %9069 = vmatprep.subr.mxu0 %v8201_v18  ;;  %9080 = vmatprep.subr.mxu1 %v8209_v19  ;;  %v8195_v62 = vld [vmem:[%s12290_s7] ss:$0 sm:$0xff]  ;;  %v8203_v4 = vld [vmem:[%s12290_s7 + $0x1] ss:$0 sm:$0xff]  ;;  %v8211_v6 = vld [vmem:[%s12290_s7 + $0x2] ss:$0 sm:$0xff] }
  0x25   :  { %9070 = vmatpush3.msra.mxu0 %v8201_v18  ;;  %9081 = vmatpush3.msra.mxu1 %v8209_v19 }
  0x26   :  { %9071 = vmatprep.subr.mxu0 %v8200_v20  ;;  %9082 = vmatprep.subr.mxu1 %v8208_v21  ;;  %v10571_v26 = vld [vmem:[%s12323_s3 + $0x18] sm:$0xff]  ;;  %v10587_v29 = vld [vmem:[%s12323_s3 + $0x10] sm:$0xff]  ;;  %v10601_v31 = vld [vmem:[%s12323_s3 + $0x8] sm:$0xff] }
  0x27   :  { %9072 = vmatpush3.msra.mxu0 %v8200_v20  ;;  %9083 = vmatpush3.msra.mxu1 %v8208_v21  ;;  %v10576_v27 = vld [vmem:[%s12323_s3 + $0x38] sm:$0xff]  ;;  %v10592_v30 = vld [vmem:[%s12323_s3 + $0x30] sm:$0xff]  ;;  %v10606_v32 = vld [vmem:[%s12323_s3 + $0x28] sm:$0xff] }
  0x28   :  { %9073 = vmatprep.subr.mxu0 %v8199_v22  ;;  %9084 = vmatprep.subr.mxu1 %v8207_v23  ;;  %v10615_v33 = vld [vmem:[%s12323_s3] sm:$0xff]  ;;  %v10635_v35 = vld [vmem:[%s12323_s3 + $0x58] sm:$0xff]  ;;  %v10649_v37 = vld [vmem:[%s12323_s3 + $0x50] sm:$0xff] }
  0x29   :  { %9074 = vmatpush3.msra.mxu0 %v8199_v22  ;;  %9085 = vmatpush3.msra.mxu1 %v8207_v23  ;;  %v10622_v34 = vld [vmem:[%s12323_s3 + $0x20] sm:$0xff]  ;;  %v10640_v36 = vld [vmem:[%s12324_s0 + $0x18] sm:$0xff]  ;;  %v10654_v38 = vld [vmem:[%s12324_s0 + $0x10] sm:$0xff] }
  0x2a   :  { %9075 = vmatprep.subr.mxu0 %v8198_v24  ;;  %9086 = vmatprep.subr.mxu1 %v8206_v25  ;;  %v10663_v39 = vld [vmem:[%s12323_s3 + $0x48] sm:$0xff]  ;;  %v10677_v41 = vld [vmem:[%s12323_s3 + $0x40] sm:$0xff]  ;;  %v10697_v43 = vld [vmem:[%s12324_s0 + $0x38] sm:$0xff] }
  0x2b   :  { %9076 = vmatpush3.msra.mxu0 %v8198_v24  ;;  %9077 = vmatprep.mubr.msk.f32.mxu0 %vm85_vm0, %v10493_v8  ;;  %v10668_v40 = vld [vmem:[%s12324_s0 + $0x8] sm:$0xff]  ;;  %v10682_v42 = vld [vmem:[%s12324_s0] sm:$0xff]  ;;  %v10704_v44 = vld [vmem:[%s12324_s0 + $0x58] sm:$0xff] }
  0x2c   :  { %9087 = vmatpush3.msra.mxu1 %v8206_v25  ;;  %9088 = vmatprep.mubr.msk.f32.mxu1 %vm85_vm0, %v10493_v8  ;;  %v10710_v45 = vld [vmem:[%s12324_s0 + $0x30] sm:$0xff]  ;;  %v10725_v47 = vld [vmem:[%s12324_s0 + $0x28] sm:$0xff]  ;;  %v10739_v49 = vld [vmem:[%s12324_s0 + $0x20] sm:$0xff] }
  0x2d   :  { %9078 = vmatmul.mubr.msk.f32.vlgmr.msra.gmra.mxu0 %vm85_vm0, %v10498_v9  ;;  %9089 = vmatmul.mubr.msk.f32.vlgmr.msra.gmra.mxu1 %vm85_vm0, %v10498_v9  ;;  %v10719_v46 = vld [vmem:[%s12324_s0 + $0x50] sm:$0xff]  ;;  %v10733_v48 = vld [vmem:[%s12324_s0 + $0x48] sm:$0xff]  ;;  %v10747_v50 = vld [vmem:[%s12324_s0 + $0x40] sm:$0xff] }
  0x2e   :  { %9091 = vmatprep.subr.mxu0 %v10348_v28  ;;  %9102 = vmatprep.subr.mxu1 %v10348_v28  ;;  %v8176_v51 = vld [vmem:[%s12325_s6] ss:$0 sm:$0xff]  ;;  %v8184_v52 = vld [vmem:[%s12325_s6 + $0x1] ss:$0 sm:$0xff]  ;;  %v8192_v59 = vld [vmem:[%s12325_s6 + $0x2] ss:$0 sm:$0xff] }
  0x2f   :  { %9092 = vmatpush3.msra.mxu0 %v10571_v26  ;;  %9103 = vmatpush3.msra.mxu1 %v10576_v27 }
  0x30   :  { %9093 = vmatprep.subr.mxu0 %v10348_v28  ;;  %9104 = vmatprep.subr.mxu1 %v10348_v28 }
  0x31   :  { %9094 = vmatpush3.msra.mxu0 %v10587_v29  ;;  %9105 = vmatpush3.msra.mxu1 %v10592_v30 }
  0x32   :  { %9095 = vmatprep.subr.mxu0 %v10348_v28  ;;  %9106 = vmatprep.subr.mxu1 %v10348_v28 }
  0x33   :  { %9096 = vmatpush3.msra.mxu0 %v10601_v31  ;;  %9107 = vmatpush3.msra.mxu1 %v10606_v32 }
  0x34   :  { %9097 = vmatprep.subr.mxu0 %v10348_v28  ;;  %9108 = vmatprep.subr.mxu1 %v10348_v28 }
  0x35   :  { %9098 = vmatpush3.msra.mxu0 %v10615_v33  ;;  %9099 = vmatprep.mubr.msk.f32.mxu0 %vm10349_vm1, %v10348_v28 }
  0x36   :  { %9109 = vmatpush3.msra.mxu1 %v10622_v34  ;;  %9110 = vmatprep.mubr.msk.f32.mxu1 %vm10349_vm1, %v10348_v28 }
  0x37   :  { %9100 = vmatmul.mubr.f32.vlgmr.msra.gmra.mxu0 %v10348_v28  ;;  %9111 = vmatmul.mubr.f32.vlgmr.msra.gmra.mxu1 %v10348_v28 }
  0x38   :  { %9113 = vmatprep.subr.mxu0 %v10348_v28  ;;  %9124 = vmatprep.subr.mxu1 %v10348_v28 }
  0x39   :  { %9114 = vmatpush3.msra.mxu0 %v10635_v35  ;;  %9125 = vmatpush3.msra.mxu1 %v10640_v36 }
  0x3a   :  { %9115 = vmatprep.subr.mxu0 %v10348_v28  ;;  %9126 = vmatprep.subr.mxu1 %v10348_v28 }
  0x3b   :  { %9116 = vmatpush3.msra.mxu0 %v10649_v37  ;;  %9127 = vmatpush3.msra.mxu1 %v10654_v38 }
  0x3c   :  { %9117 = vmatprep.subr.mxu0 %v10348_v28  ;;  %9128 = vmatprep.subr.mxu1 %v10348_v28 }
  0x3d   :  { %9118 = vmatpush3.msra.mxu0 %v10663_v39  ;;  %9129 = vmatpush3.msra.mxu1 %v10668_v40 }
  0x3e   :  { %9119 = vmatprep.subr.mxu0 %v10348_v28  ;;  %9130 = vmatprep.subr.mxu1 %v10348_v28 }
  0x3f   :  { %9120 = vmatpush3.msra.mxu0 %v10677_v41  ;;  %9131 = vmatpush3.msra.mxu1 %v10682_v42 }
  0x40   :  { %9132 = vmatprep.mubr.msk.f32.mxu1 %vm10349_vm1, %v10348_v28  ;;  %9121 = vmatprep.mubr.msk.f32.mxu0 %vm10349_vm1, %v10348_v28 }
  0x41   :  { %9133 = vmatmul.mubr.f32.vlgmr.msra.gmra.mxu1 %v10348_v28  ;;  %9135 = vmatprep.subr.mxu0 %v10348_v28 }
  0x42   :  { %9122 = vmatmul.mubr.f32.vlgmr.msra.gmra.mxu0 %v10348_v28  ;;  %9146 = vmatprep.subr.mxu1 %v10348_v28 }
  0x43   :  { %9136 = vmatpush3.msra.mxu0 %v10697_v43  ;;  %9143 = vmatprep.mubr.msk.f32.mxu0 %vm10349_vm1, %v10348_v28 }
  0x44   :  { %9137 = vmatprep.subr.mxu0 %v10348_v28  ;;  %9147 = vmatpush3.msra.mxu1 %v10704_v44 }
  0x45   :  { %9138 = vmatpush3.msra.mxu0 %v10710_v45  ;;  %9148 = vmatprep.subr.mxu1 %v10348_v28 }
  0x46   :  { %9139 = vmatprep.subr.mxu0 %v10348_v28  ;;  %9149 = vmatpush3.msra.mxu1 %v10719_v46 }
  0x47   :  { %9140 = vmatpush3.msra.mxu0 %v10725_v47  ;;  %9150 = vmatprep.subr.mxu1 %v10348_v28 }
  0x48   :  { %9141 = vmatprep.subr.mxu0 %v10348_v28  ;;  %9151 = vmatpush3.msra.mxu1 %v10733_v48 }
  0x49   :  { %9142 = vmatpush3.msra.mxu0 %v10739_v49  ;;  %9152 = vmatprep.subr.mxu1 %v10348_v28 }
  0x4a   :  { %9144 = vmatmul.mubr.f32.vlgmr.msra.gmra.mxu0 %v10348_v28  ;;  %9153 = vmatpush3.msra.mxu1 %v10747_v50 }
  0x4b   :  { %9154 = vmatprep.mubr.msk.f32.mxu1 %vm10349_vm1, %v10348_v28  ;;  %9157 = vmatprep.subr.mxu0 %v10348_v28 }
  0x4c   :  { %9155 = vmatmul.mubr.f32.vlgmr.msra.gmra.mxu1 %v10348_v28  ;;  %9158 = vmatpush3.msra.mxu0 %v10571_v26 }
  0x4d   :  { %9168 = vmatprep.subr.mxu1 %v10348_v28  ;;  %9159 = vmatprep.subr.mxu0 %v10348_v28 }
  0x4e   :  { %9169 = vmatpush3.msra.mxu1 %v10576_v27  ;;  %9160 = vmatpush3.msra.mxu0 %v10587_v29 }
  0x4f   :  { %9170 = vmatprep.subr.mxu1 %v10348_v28  ;;  %9161 = vmatprep.subr.mxu0 %v10348_v28 }
  0x50   :  { %9171 = vmatpush3.msra.mxu1 %v10592_v30  ;;  %9162 = vmatpush3.msra.mxu0 %v10601_v31 }
  0x51   :  { %9172 = vmatprep.subr.mxu1 %v10348_v28  ;;  %9163 = vmatprep.subr.mxu0 %v10348_v28 }
  0x52   :  { %9173 = vmatpush3.msra.mxu1 %v10606_v32  ;;  %9164 = vmatpush3.msra.mxu0 %v10615_v33 }
  0x53   :  { %9174 = vmatprep.subr.mxu1 %v10348_v28  ;;  %9165 = vmatprep.mubr.msk.f32.mxu0 %vm10349_vm1, %v10348_v28 }
  0x54   :  { %9175 = vmatpush3.msra.mxu1 %v10622_v34  ;;  %9176 = vmatprep.mubr.msk.f32.mxu1 %vm10349_vm1, %v10348_v28 }
  0x55   :  { %9179 = vmatprep.subr.mxu0 %v10348_v28  ;;  %9190 = vmatprep.subr.mxu1 %v10348_v28 }
  0xd8   :  { %v9035_v53 = vpop.f32.mrf.mxu0 }
  0xd9   :  { %v9046_v54 = vpop.f32.mrf.mxu1  ;;  %v10786_v55 = vadd.f32 %v9035_v53, %v8176_v51 }
  0xda   :  { %v10788_v56 = vadd.f32 %v9046_v54, %v8184_v52  ;;  %v158_v57 = vpop.f32.mrf.mxu0 }
  0xdb   :  { %v246_v58 = vpop.f32.mrf.mxu1  ;;  %v10810_v11 = vadd.f32 %v8176_v51, %v158_v57 }
  0xdc   :  { %v10813_v18 = vadd.f32 %v8184_v52, %v246_v58 }
  0xe3   :  { %v9057_v60 = vpop.f32.mrf.mxu0  ;;  %v9068_v61 = vpop.f32.mrf.mxu1 }
  0xe4   :  { %v10796_v63 = vadd.f32 %v9057_v60, %v8192_v59  ;;  %v10815_v20 = vadd.f32 %v9068_v61, %v8195_v62 }
  0xe5   :  { %v420_v0 = vpop.f32.mrf.mxu1  ;;  %v334_v2 = vpop.f32.mrf.mxu0 }
  0xe6   :  { %v10798_v1 = vadd.f32 %v8195_v62, %v420_v0 }
  0xed   :  { %v9079_v3 = vpop.f32.mrf.mxu0  ;;  %v9090_v5 = vpop.f32.mrf.mxu1 }
  0xee   :  { %v10819_v62 = vadd.f32 %v9079_v3, %v8203_v4 }
  0xef   :  { %v508_v7 = vpop.f32.mrf.mxu0  ;;  %v596_v8 = vpop.f32.mrf.mxu1 }
  0xf0   :  { %v10806_v9 = vadd.f32 %v8203_v4, %v508_v7  ;;  %v10808_v10 = vadd.f32 %v8211_v6, %v596_v8  ;;  %v10833_v4 = vld [vmem:[%s12291_s8] ss:$0 sm:$0xff] }
  0xf7   :  { %v692_v12 = vpop.f32.mrf.mxu0  ;;  %v767_v13 = vpop.f32.mrf.mxu1 }
  0xf8   :  { %v776_v14 = vadd.f32 %v692_v12, %v10810_v11  ;;  %v783_v23 = vadd.f32 %v767_v13, %v10813_v18 }
  0xf9   :  { %v9101_v15 = vpop.f32.mrf.mxu0  ;;  %v9112_v16 = vpop.f32.mrf.mxu1 }
  0xfa   :  { %v8224_v17 = vmul.f32 -1.442695, %v776_v14  ;;  %v8225_v54 = vmul.f32 -1.442695, %v783_v23  ;;  %v10825_v14 = vld [vmem:[%s12326_s24] ss:$0 sm:$0xff] }
  0xfc   :  { %10073 = vpow2.f32 %v8224_v17 }
 0x101   :  { %v936_v19 = vpop.f32.mrf.mxu1 }
 0x102   :  { %v1021_v21 = vrot.slane %v936_v19, 2  ;;  %v856_v22 = vpop.f32.mrf.mxu0 }
 0x103   :  { %v9134_v24 = vpop.f32.mrf.mxu1  ;;  %v857_v17 = vadd.f32 %v10825_v14, %v856_v22  ;;  %v10837_v22 = vadd.f32 %v9090_v5, %v8211_v6 }
 0x104   :  { %v1023_v25 = vadd.f32 %v1021_v21, %v10815_v20  ;;  %v9123_v51 = vpop.f32.mrf.mxu0  ;;  %v10828_v21 = vadd.f32 %v8192_v59, %v334_v2 }
 0x106   :  { %v8234_v53 = vmul.f32 -1.442695, %v1023_v25 }
 0x108   :  { %10075 = vpow2.f32 %v8234_v53 }
 0x109   :  { %v10074_v57 = vpop.eup %10073  ;;  %10077 = vpow2.f32 %v8225_v54 }
 0x10a   :  { %v780_v60 = vadd.f32 1.0, %v10074_v57  ;;  %v1011_v0 = vpop.f32.mrf.mxu0 }
 0x10b   :  { %v1031_v52 = vrot.slane %v1011_v0, 2 }
 0x10c   :  { %10079 = vrcp.f32 %v780_v60  ;;  %v9145_v58 = vpop.f32.mrf.mxu0  ;;  %v1106_v61 = vpop.f32.mrf.mxu1 }
 0x10d   :  { %v1033_v8 = vadd.f32 %v1031_v52, %v10819_v62  ;;  %v1107_v25 = vadd.f32 %v10833_v4, %v1106_v61 }
 0x10e   :  { %v9156_v7 = vpop.f32.mrf.mxu1 }
 0x10f   :  { %v8235_v12 = vmul.f32 -1.442695, %v1033_v8  ;;  %v1111_v51 = vrot.slane %v1107_v25, 2 }
 0x111   :  { %10081 = vpow2.f32 %v8235_v12 }
 0x115   :  { %v10076_v13 = vpop.eup %10075 }
 0x116   :  { %v1027_v15 = vadd.f32 1.0, %v10076_v13  ;;  %v10078_v16 = vpop.eup %10077 }
 0x117   :  { %v787_v23 = vadd.f32 1.0, %v10078_v16 }
 0x118   :  { %10083 = vrcp.f32 %v1027_v15 }
 0x119   :  { %v10080_v19 = vpop.eup %10079 }
 0x11a   :  { %v860_v3 = vmul.f32 %v10080_v19, %v857_v17 }
 0x11c   :  { %v861_v24 = vadd.f32 %v860_v3, %v10828_v21 }
 0x11e   :  { %10085 = vtanh.f32 %v861_v24  ;;  %v10082_v53 = vpop.eup %10081 }
 0x11f   :  { %10087 = vrcp.f32 %v787_v23  ;;  %v1037_v2 = vadd.f32 1.0, %v10082_v53 }
 0x125   :  { %v10084_v54 = vpop.eup %10083 }
 0x126   :  { %v1113_v59 = vmul.f32 %v10084_v54, %v1111_v51 }
 0x128   :  { %v1114_v57 = vadd.f32 %v1113_v59, %v10837_v22 }
 0x12a   :  { %10089 = vtanh.f32 %v1114_v57 }
 0x12b   :  { %v10086_v60 = vpop.eup %10085  ;;  %10091 = vrcp.f32 %v1037_v2 }
 0x12c   :  { %v863_v0 = vsub.f32 0.0, %v10086_v60  ;;  %v10088_v52 = vpop.eup %10087 }
 0x12e   :  { %v864_v58 = vmul.f32 %v10088_v52, %v863_v0 }
 0x130   :  { %v10840_v7 = vadd.f32 %v10086_v60, %v864_v58 }
 0x132   :  { %1120 = vst.msk [vmem:[#allocation2] sm:$0x3] %vm1119_vm2, %v10840_v7  ;;  %9166 = vmatmul.mubr.msk.f32.vlgmr.msra.gmra.mxu0 %vm85_vm0, %v10840_v7  ;;  %9177 = vmatmul.mubr.msk.f32.vlgmr.msra.gmra.mxu1 %vm85_vm0, %v10840_v7 }
 0x133   :  { %9180 = vmatpush3.msra.mxu0 %v10635_v35  ;;  %9191 = vmatpush3.msra.mxu1 %v10640_v36 }
 0x134   :  { %9181 = vmatprep.subr.mxu0 %v10348_v28  ;;  %9192 = vmatprep.subr.mxu1 %v10348_v28 }
 0x135   :  { %9182 = vmatpush3.msra.mxu0 %v10649_v37  ;;  %9187 = vmatprep.mubr.msk.f32.mxu0 %vm10349_vm1, %v10348_v28 }
 0x136   :  { %9183 = vmatprep.subr.mxu0 %v10348_v28  ;;  %9193 = vmatpush3.msra.mxu1 %v10654_v38 }
 0x137   :  { %v10090_v5 = vpop.eup %10089  ;;  %9184 = vmatpush3.msra.mxu0 %v10663_v39  ;;  %9194 = vmatprep.subr.mxu1 %v10348_v28 }
 0x138   :  { %v1116_v6 = vsub.f32 0.0, %v10090_v5  ;;  %9185 = vmatprep.subr.mxu0 %v10348_v28  ;;  %9195 = vmatpush3.msra.mxu1 %v10668_v40  ;;  %v10092_v61 = vpop.eup %10091 }
 0x139   :  { %9186 = vmatpush3.msra.mxu0 %v10677_v41  ;;  %9196 = vmatprep.subr.mxu1 %v10348_v28 }
 0x13a   :  { %v1117_v8 = vmul.f32 %v10092_v61, %v1116_v6  ;;  %9188 = vmatmul.mubr.msk.f32.vlgmr.msra.gmra.mxu0 %vm85_vm0, %v10840_v7  ;;  %9201 = vmatprep.subr.mxu0 %v10348_v28 }
 0x13b   :  { %9202 = vmatpush3.msra.mxu0 %v10697_v43  ;;  %9197 = vmatpush3.msra.mxu1 %v10682_v42 }
 0x13c   :  { %v10868_v12 = vadd.f32 %v10090_v5, %v1117_v8  ;;  %9203 = vmatprep.subr.mxu0 %v10348_v28  ;;  %9198 = vmatprep.mubr.msk.f32.mxu1 %vm10349_vm1, %v10348_v28 }
 0x13d   :  { %9204 = vmatpush3.msra.mxu0 %v10710_v45  ;;  %9212 = vmatprep.subr.mxu1 %v10348_v28 }
 0x13e   :  { %1122 = vst.msk [vmem:[#allocation3 + $0x8] sm:$0xc0] %vm1121_vm3, %v10868_v12  ;;  %9205 = vmatprep.subr.mxu0 %v10348_v28  ;;  %v10879_v13 = vrot.slane %v10868_v12, 6  ;;  %9209 = vmatprep.mubr.msk.f32.mxu0 %vm10349_vm1, %v10348_v28 }
 0x13f   :  { %9206 = vmatpush3.msra.mxu0 %v10725_v47 }
 0x140   :  { %9199 = vmatmul.mubr.msk.f32.vlgmr.msra.gmra.mxu1 %vm85_vm0, %v10879_v13  ;;  %9207 = vmatprep.subr.mxu0 %v10348_v28 }
 0x141   :  { %9213 = vmatpush3.msra.mxu1 %v10704_v44  ;;  %9208 = vmatpush3.msra.mxu0 %v10739_v49 }
 0x142   :  { %9214 = vmatprep.subr.mxu1 %v10348_v28  ;;  %9210 = vmatmul.mubr.msk.f32.vlgmr.msra.gmra.mxu0 %vm85_vm0, %v10879_v13 }
 0x143   :  { %9215 = vmatpush3.msra.mxu1 %v10719_v46  ;;  %9220 = vmatprep.mubr.msk.f32.mxu1 %vm10349_vm1, %v10348_v28 }
 0x144   :  { %9216 = vmatprep.subr.mxu1 %v10348_v28  ;;  %9223 = vmatprep.subr.mxu0 %v10348_v28 }
 0x145   :  { %9217 = vmatpush3.msra.mxu1 %v10733_v48  ;;  %9224 = vmatpush3.msra.mxu0 %v10571_v26 }
 0x146   :  { %9218 = vmatprep.subr.mxu1 %v10348_v28  ;;  %9225 = vmatprep.subr.mxu0 %v10348_v28 }
 0x147   :  { %9219 = vmatpush3.msra.mxu1 %v10747_v50  ;;  %9226 = vmatpush3.msra.mxu0 %v10587_v29 }
 0x148   :  { %9221 = vmatmul.mubr.msk.f32.vlgmr.msra.gmra.mxu1 %vm85_vm0, %v10879_v13  ;;  %9234 = vmatprep.subr.mxu1 %v10348_v28 }
 0x149   :  { %9235 = vmatpush3.msra.mxu1 %v10576_v27  ;;  %9227 = vmatprep.subr.mxu0 %v10348_v28 }
 0x14a   :  { %9236 = vmatprep.subr.mxu1 %v10348_v28  ;;  %9228 = vmatpush3.msra.mxu0 %v10601_v31 }
 0x14b   :  { %9237 = vmatpush3.msra.mxu1 %v10592_v30  ;;  %9229 = vmatprep.subr.mxu0 %v10348_v28 }
 0x14c   :  { %9238 = vmatprep.subr.mxu1 %v10348_v28  ;;  %9230 = vmatpush3.msra.mxu0 %v10615_v33 }
 0x14d   :  { %9239 = vmatpush3.msra.mxu1 %v10606_v32  ;;  %9231 = vmatprep.mubr.msk.f32.mxu0 %vm10349_vm1, %v10348_v28 }
 0x14e   :  { %9240 = vmatprep.subr.mxu1 %v10348_v28  ;;  %9242 = vmatprep.mubr.msk.f32.mxu1 %vm10349_vm1, %v10348_v28 }
 0x14f   :  { %9241 = vmatpush3.msra.mxu1 %v10622_v34  ;;  %9245 = vmatprep.subr.mxu0 %v10348_v28 }
 0x150   :  { %9256 = vmatprep.subr.mxu1 %v10348_v28 }
 0x1f2   :  { %v1196_v15 = vpop.f32.mrf.mxu0  ;;  %v1270_v16 = vpop.f32.mrf.mxu1 }
 0x1f3   :  { %v1279_v17 = vrot.slane %v1196_v15, 6  ;;  %v1289_v54 = vrot.slane %v1270_v16, 6 }
 0x1f4   :  { %v9167_v19 = vpop.f32.mrf.mxu0  ;;  %v9178_v3 = vpop.f32.mrf.mxu1 }
 0x1f5   :  { %v1281_v23 = vadd.f32 %v1279_v17, %v10810_v11  ;;  %v1291_v52 = vadd.f32 %v1289_v54, %v10813_v18 }
 0x1f7   :  { %v8246_v24 = vmul.f32 -1.442695, %v1281_v23  ;;  %v8247_v8 = vmul.f32 -1.442695, %v1291_v52 }
 0x1f9   :  { %10093 = vpow2.f32 %v8246_v24 }
 0x1fa   :  { %v1364_v25 = vpop.f32.mrf.mxu0 }
 0x1fb   :  { %v1365_v16 = vadd.f32 %v10825_v14, %v1364_v25 }
 0x1fc   :  { %v9189_v51 = vpop.f32.mrf.mxu0 }
 0x1fd   :  { %v1369_v23 = vrot.slane %v1365_v16, 6 }
 0x200   :  { %v1457_v53 = vpop.f32.mrf.mxu1 }
 0x201   :  { %v1540_v59 = vrot.slane %v1457_v53, 4 }
 0x202   :  { %v9200_v2 = vpop.f32.mrf.mxu1  ;;  %v1531_v57 = vpop.f32.mrf.mxu0 }
 0x203   :  { %v1542_v60 = vadd.f32 %v1540_v59, %v10815_v20  ;;  %v1550_v17 = vrot.slane %v1531_v57, 4 }
 0x204   :  { %v9211_v0 = vpop.f32.mrf.mxu0 }
 0x205   :  { %v8259_v58 = vmul.f32 -1.442695, %v1542_v60  ;;  %v1552_v19 = vadd.f32 %v1550_v17, %v10819_v62 }
 0x206   :  { %v10094_v5 = vpop.eup %10093 }
 0x207   :  { %v1285_v6 = vadd.f32 1.0, %v10094_v5  ;;  %10095 = vpow2.f32 %v8259_v58  ;;  %v8260_v53 = vmul.f32 -1.442695, %v1552_v19 }
 0x208   :  { %v1625_v61 = vpop.f32.mrf.mxu1 }
 0x209   :  { %10097 = vrcp.f32 %v1285_v6  ;;  %v1626_v0 = vadd.f32 %v10833_v4, %v1625_v61 }
 0x20a   :  { %v9222_v15 = vpop.f32.mrf.mxu1  ;;  %10099 = vpow2.f32 %v8247_v8 }
 0x20b   :  { %v1630_v57 = vrot.slane %v1626_v0, 4 }
 0x214   :  { %v10096_v3 = vpop.eup %10095 }
 0x215   :  { %v1546_v24 = vadd.f32 1.0, %v10096_v3 }
 0x216   :  { %v10098_v51 = vpop.eup %10097 }
 0x217   :  { %v1371_v54 = vmul.f32 %v10098_v51, %v1369_v23  ;;  %10101 = vrcp.f32 %v1546_v24  ;;  %v10100_v2 = vpop.eup %10099 }
 0x218   :  { %10103 = vpow2.f32 %v8260_v53  ;;  %v1295_v60 = vadd.f32 1.0, %v10100_v2 }
 0x219   :  { %v1372_v59 = vadd.f32 %v1371_v54, %v10828_v21 }
 0x21b   :  { %10105 = vtanh.f32 %v1372_v59 }
 0x21c   :  { %10107 = vrcp.f32 %v1295_v60 }
 0x224   :  { %v10102_v25 = vpop.eup %10101 }
 0x225   :  { %v1632_v52 = vmul.f32 %v10102_v25, %v1630_v57  ;;  %v10104_v58 = vpop.eup %10103 }
 0x226   :  { %v1556_v15 = vadd.f32 1.0, %v10104_v58 }
 0x227   :  { %v1633_v5 = vadd.f32 %v1632_v52, %v10837_v22 }
 0x228   :  { %v10106_v6 = vpop.eup %10105 }
 0x229   :  { %v1375_v8 = vrot.slane %v10106_v6, 2  ;;  %10109 = vtanh.f32 %v1633_v5  ;;  %v10108_v19 = vpop.eup %10107 }
 0x22a   :  { %10111 = vrcp.f32 %v1556_v15 }
 0x22b   :  { %v1377_v17 = vsub.f32 %v10840_v7, %v1375_v8 }
 0x22d   :  { %v1379_v16 = vrot.slane %v1377_v17, 6 }
 0x22f   :  { %v1381_v3 = vmul.f32 %v10108_v19, %v1379_v16 }
 0x231   :  { %v10932_v23 = vadd.f32 %v10106_v6, %v1381_v3 }
 0x233   :  { %1645 = vst.msk [vmem:[#allocation2] sm:$0xc] %vm1644_vm4, %v10932_v23  ;;  %v1653_v61 = vrot.slane %v10932_v23, 2 }
 0x235   :  { %9232 = vmatmul.mubr.msk.f32.vlgmr.msra.gmra.mxu0 %vm85_vm0, %v1653_v61  ;;  %9243 = vmatmul.mubr.msk.f32.vlgmr.msra.gmra.mxu1 %vm85_vm0, %v1653_v61 }
 0x236   :  { %v10110_v24 = vpop.eup %10109  ;;  %9246 = vmatpush3.msra.mxu0 %v10635_v35  ;;  %9257 = vmatpush3.msra.mxu1 %v10640_v36 }
 0x237   :  { %v1636_v7 = vrot.slane %v10110_v24, 6  ;;  %9247 = vmatprep.subr.mxu0 %v10348_v28  ;;  %9258 = vmatprep.subr.mxu1 %v10348_v28  ;;  %v10112_v54 = vpop.eup %10111 }
 0x238   :  { %9248 = vmatpush3.msra.mxu0 %v10649_v37  ;;  %9253 = vmatprep.mubr.msk.f32.mxu0 %vm10349_vm1, %v10348_v28 }
 0x239   :  { %9249 = vmatprep.subr.mxu0 %v10348_v28  ;;  %9259 = vmatpush3.msra.mxu1 %v10654_v38  ;;  %v1638_v51 = vsub.f32 %v10868_v12, %v1636_v7 }
 0x23a   :  { %9250 = vmatpush3.msra.mxu0 %v10663_v39  ;;  %9260 = vmatprep.subr.mxu1 %v10348_v28 }
 0x23b   :  { %9251 = vmatprep.subr.mxu0 %v10348_v28  ;;  %9261 = vmatpush3.msra.mxu1 %v10668_v40  ;;  %v1640_v53 = vrot.slane %v1638_v51, 2 }
 0x23c   :  { %9252 = vmatpush3.msra.mxu0 %v10677_v41  ;;  %9262 = vmatprep.subr.mxu1 %v10348_v28 }
 0x23d   :  { %9254 = vmatmul.mubr.msk.f32.vlgmr.msra.gmra.mxu0 %vm85_vm0, %v1653_v61  ;;  %9267 = vmatprep.subr.mxu0 %v10348_v28  ;;  %v1642_v59 = vmul.f32 %v10112_v54, %v1640_v53 }
 0x23e   :  { %9268 = vmatpush3.msra.mxu0 %v10697_v43  ;;  %9263 = vmatpush3.msra.mxu1 %v10682_v42 }
 0x23f   :  { %9269 = vmatprep.subr.mxu0 %v10348_v28  ;;  %9264 = vmatprep.mubr.msk.f32.mxu1 %vm10349_vm1, %v10348_v28  ;;  %v10962_v12 = vadd.f32 %v10110_v24, %v1642_v59 }
 0x240   :  { %9270 = vmatpush3.msra.mxu0 %v10710_v45  ;;  %9278 = vmatprep.subr.mxu1 %v10348_v28 }
 0x241   :  { %9271 = vmatprep.subr.mxu0 %v10348_v28  ;;  %1647 = vst.msk [vmem:[#allocation3 + $0x8] sm:$0x30] %vm1646_vm5, %v10962_v12  ;;  %v1914_v2 = vrot.slane %v10962_v12, 4  ;;  %9275 = vmatprep.mubr.msk.f32.mxu0 %vm10349_vm1, %v10348_v28 }
 0x242   :  { %9272 = vmatpush3.msra.mxu0 %v10725_v47 }
 0x243   :  { %9265 = vmatmul.mubr.msk.f32.vlgmr.msra.gmra.mxu1 %vm85_vm0, %v1914_v2  ;;  %9273 = vmatprep.subr.mxu0 %v10348_v28 }
 0x244   :  { %9279 = vmatpush3.msra.mxu1 %v10704_v44  ;;  %9274 = vmatpush3.msra.mxu0 %v10739_v49 }
 0x245   :  { %9280 = vmatprep.subr.mxu1 %v10348_v28  ;;  %9276 = vmatmul.mubr.msk.f32.vlgmr.msra.gmra.mxu0 %vm85_vm0, %v1914_v2 }
 0x246   :  { %9281 = vmatpush3.msra.mxu1 %v10719_v46  ;;  %9286 = vmatprep.mubr.msk.f32.mxu1 %vm10349_vm1, %v10348_v28 }
 0x247   :  { %9282 = vmatprep.subr.mxu1 %v10348_v28  ;;  %9289 = vmatprep.subr.mxu0 %v10348_v28 }
 0x248   :  { %9283 = vmatpush3.msra.mxu1 %v10733_v48  ;;  %9290 = vmatpush3.msra.mxu0 %v10571_v26 }
 0x249   :  { %9284 = vmatprep.subr.mxu1 %v10348_v28  ;;  %9291 = vmatprep.subr.mxu0 %v10348_v28 }
 0x24a   :  { %9285 = vmatpush3.msra.mxu1 %v10747_v50  ;;  %9292 = vmatpush3.msra.mxu0 %v10587_v29 }
 0x24b   :  { %9287 = vmatmul.mubr.msk.f32.vlgmr.msra.gmra.mxu1 %vm85_vm0, %v1914_v2  ;;  %9300 = vmatprep.subr.mxu1 %v10348_v28 }
 0x24c   :  { %9301 = vmatpush3.msra.mxu1 %v10576_v27  ;;  %9293 = vmatprep.subr.mxu0 %v10348_v28 }
 0x24d   :  { %9302 = vmatprep.subr.mxu1 %v10348_v28  ;;  %9294 = vmatpush3.msra.mxu0 %v10601_v31 }
 0x24e   :  { %9303 = vmatpush3.msra.mxu1 %v10592_v30  ;;  %9295 = vmatprep.subr.mxu0 %v10348_v28 }
 0x24f   :  { %9304 = vmatprep.subr.mxu1 %v10348_v28  ;;  %9296 = vmatpush3.msra.mxu0 %v10615_v33 }
 0x250   :  { %9305 = vmatpush3.msra.mxu1 %v10606_v32  ;;  %9297 = vmatprep.mubr.msk.f32.mxu0 %vm10349_vm1, %v10348_v28 }
 0x251   :  { %9306 = vmatprep.subr.mxu1 %v10348_v28  ;;  %9308 = vmatprep.mubr.msk.f32.mxu1 %vm10349_vm1, %v10348_v28 }
 0x252   :  { %9307 = vmatpush3.msra.mxu1 %v10622_v34  ;;  %9311 = vmatprep.subr.mxu0 %v10348_v28 }
 0x253   :  { %9322 = vmatprep.subr.mxu1 %v10348_v28 }
 0x2f5   :  { %v1722_v26 = vpop.f32.mrf.mxu0  ;;  %v1796_v27 = vpop.f32.mrf.mxu1 }
 0x2f6   :  { %v1805_v29 = vrot.slane %v1722_v26, 4  ;;  %v1815_v25 = vrot.slane %v1796_v27, 4 }
 0x2f7   :  { %v9233_v30 = vpop.f32.mrf.mxu0  ;;  %v9244_v31 = vpop.f32.mrf.mxu1 }
 0x2f8   :  { %v1807_v32 = vadd.f32 %v1805_v29, %v10810_v11  ;;  %v1817_v8 = vadd.f32 %v1815_v25, %v10813_v18 }
 0x2fa   :  { %v8272_v33 = vmul.f32 -1.442695, %v1807_v32  ;;  %v8273_v3 = vmul.f32 -1.442695, %v1817_v8 }
 0x2fc   :  { %10113 = vpow2.f32 %v8272_v33 }
 0x2fd   :  { %v1890_v60 = vpop.f32.mrf.mxu0 }
 0x2fe   :  { %v1891_v7 = vadd.f32 %v10825_v14, %v1890_v60 }
 0x2ff   :  { %v9255_v0 = vpop.f32.mrf.mxu0 }
 0x300   :  { %v1895_v54 = vrot.slane %v1891_v7, 4 }
 0x303   :  { %v1983_v57 = vpop.f32.mrf.mxu1 }
 0x304   :  { %v2066_v52 = vrot.slane %v1983_v57, 6 }
 0x305   :  { %v9266_v58 = vpop.f32.mrf.mxu1  ;;  %v2057_v34 = vpop.f32.mrf.mxu0 }
 0x306   :  { %v2068_v5 = vadd.f32 %v2066_v52, %v10815_v20  ;;  %v2076_v24 = vrot.slane %v2057_v34, 6 }
 0x307   :  { %v9277_v6 = vpop.f32.mrf.mxu0 }
 0x308   :  { %v8285_v15 = vmul.f32 -1.442695, %v2068_v5  ;;  %v2078_v51 = vadd.f32 %v2076_v24, %v10819_v62 }
 0x309   :  { %v10114_v17 = vpop.eup %10113 }
 0x30a   :  { %v1811_v16 = vadd.f32 1.0, %v10114_v17  ;;  %10115 = vpow2.f32 %v8285_v15  ;;  %v8286_v26 = vmul.f32 -1.442695, %v2078_v51 }
 0x30b   :  { %v2151_v19 = vpop.f32.mrf.mxu1 }
 0x30c   :  { %10117 = vrcp.f32 %v1811_v16  ;;  %v2152_v32 = vadd.f32 %v10833_v4, %v2151_v19 }
 0x30d   :  { %v9288_v61 = vpop.f32.mrf.mxu1  ;;  %10119 = vpow2.f32 %v8273_v3 }
 0x30e   :  { %v2156_v33 = vrot.slane %v2152_v32, 6 }
 0x317   :  { %v10116_v53 = vpop.eup %10115 }
 0x318   :  { %v2072_v59 = vadd.f32 1.0, %v10116_v53 }
 0x319   :  { %v10118_v2 = vpop.eup %10117 }
 0x31a   :  { %v1897_v27 = vmul.f32 %v10118_v2, %v1895_v54  ;;  %10121 = vrcp.f32 %v2072_v59  ;;  %v10120_v30 = vpop.eup %10119 }
 0x31b   :  { %10123 = vpow2.f32 %v8286_v26  ;;  %v1821_v31 = vadd.f32 1.0, %v10120_v30 }
 0x31c   :  { %v1898_v29 = vadd.f32 %v1897_v27, %v10828_v21 }
 0x31e   :  { %10125 = vtanh.f32 %v1898_v29 }
 0x31f   :  { %10127 = vrcp.f32 %v1821_v31 }
 0x327   :  { %v10122_v60 = vpop.eup %10121 }
 0x328   :  { %v2158_v0 = vmul.f32 %v10122_v60, %v2156_v33  ;;  %v10124_v57 = vpop.eup %10123 }
 0x329   :  { %v2082_v34 = vadd.f32 1.0, %v10124_v57 }
 0x32a   :  { %v2159_v25 = vadd.f32 %v2158_v0, %v10837_v22 }
 0x32b   :  { %v10126_v52 = vpop.eup %10125 }
 0x32c   :  { %v1901_v58 = vrot.slane %v10126_v52, 2  ;;  %10129 = vtanh.f32 %v2159_v25  ;;  %v10128_v8 = vpop.eup %10127 }
 0x32d   :  { %10131 = vrcp.f32 %v2082_v34 }
 0x32e   :  { %v1903_v5 = vsub.f32 %v10932_v23, %v1901_v58 }
 0x330   :  { %v1905_v6 = vrot.slane %v1903_v5, 6 }
 0x332   :  { %v1907_v15 = vmul.f32 %v10128_v8, %v1905_v6 }
 0x334   :  { %v11018_v17 = vadd.f32 %v10126_v52, %v1907_v15 }
 0x336   :  { %2170 = vst.msk [vmem:[#allocation2] sm:$0x30] %vm1646_vm5, %v11018_v17  ;;  %v2177_v16 = vrot.slane %v11018_v17, 4 }
 0x338   :  { %9298 = vmatmul.mubr.msk.f32.vlgmr.msra.gmra.mxu0 %vm85_vm0, %v2177_v16  ;;  %9309 = vmatmul.mubr.msk.f32.vlgmr.msra.gmra.mxu1 %vm85_vm0, %v2177_v16 }
 0x339   :  { %v10130_v19 = vpop.eup %10129  ;;  %9312 = vmatpush3.msra.mxu0 %v10635_v35  ;;  %9323 = vmatpush3.msra.mxu1 %v10640_v36 }
 0x33a   :  { %v2162_v23 = vrot.slane %v10130_v19, 6  ;;  %9313 = vmatprep.subr.mxu0 %v10348_v28  ;;  %9324 = vmatprep.subr.mxu1 %v10348_v28  ;;  %v10132_v36 = vpop.eup %10131 }
 0x33b   :  { %9314 = vmatpush3.msra.mxu0 %v10649_v37  ;;  %9319 = vmatprep.mubr.msk.f32.mxu0 %vm10349_vm1, %v10348_v28 }
 0x33c   :  { %9315 = vmatprep.subr.mxu0 %v10348_v28  ;;  %9325 = vmatpush3.msra.mxu1 %v10654_v38  ;;  %v2164_v3 = vsub.f32 %v10962_v12, %v2162_v23 }
 0x33d   :  { %9316 = vmatpush3.msra.mxu0 %v10663_v39  ;;  %9326 = vmatprep.subr.mxu1 %v10348_v28 }
 0x33e   :  { %9317 = vmatprep.subr.mxu0 %v10348_v28  ;;  %9327 = vmatpush3.msra.mxu1 %v10668_v40  ;;  %v2166_v35 = vrot.slane %v2164_v3, 2  ;;  %v11082_v40 = vld [vmem:[%s12323_s3 + $0x18] sm:$0xff] }
 0x33f   :  { %9318 = vmatpush3.msra.mxu0 %v10677_v41  ;;  %9328 = vmatprep.subr.mxu1 %v10348_v28  ;;  %v11087_v41 = vld [vmem:[%s12323_s3 + $0x38] sm:$0xff] }
 0x340   :  { %9320 = vmatmul.mubr.msk.f32.vlgmr.msra.gmra.mxu0 %vm85_vm0, %v2177_v16  ;;  %9333 = vmatprep.subr.mxu0 %v10348_v28  ;;  %v2168_v37 = vmul.f32 %v10132_v36, %v2166_v35 }
 0x341   :  { %9334 = vmatpush3.msra.mxu0 %v10697_v43  ;;  %9329 = vmatpush3.msra.mxu1 %v10682_v42  ;;  %v11092_v42 = vld [vmem:[%s12323_s3 + $0x10] sm:$0xff] }
 0x342   :  { %9335 = vmatprep.subr.mxu0 %v10348_v28  ;;  %9330 = vmatprep.mubr.msk.f32.mxu1 %vm10349_vm1, %v10348_v28  ;;  %v11048_v38 = vadd.f32 %v10130_v19, %v2168_v37  ;;  %v11099_v43 = vld [vmem:[%s12323_s3 + $0x30] sm:$0xff] }
 0x343   :  { %9336 = vmatpush3.msra.mxu0 %v10710_v45  ;;  %9344 = vmatprep.subr.mxu1 %v10348_v28  ;;  %v11111_v45 = vld [vmem:[%s12323_s3 + $0x28] sm:$0xff] }
 0x344   :  { %9337 = vmatprep.subr.mxu0 %v10348_v28  ;;  %2171 = vst.msk [vmem:[#allocation3 + $0x8] sm:$0xc] %vm1644_vm4, %v11048_v38  ;;  %v2438_v39 = vrot.slane %v11048_v38, 2  ;;  %9341 = vmatprep.mubr.msk.f32.mxu0 %vm10349_vm1, %v10348_v28 }
 0x345   :  { %9338 = vmatpush3.msra.mxu0 %v10725_v47  ;;  %v11125_v47 = vld [vmem:[%s12323_s3 + $0x20] sm:$0xff] }
 0x346   :  { %9331 = vmatmul.mubr.msk.f32.vlgmr.msra.gmra.mxu1 %vm85_vm0, %v2438_v39  ;;  %9339 = vmatprep.subr.mxu0 %v10348_v28 }
 0x347   :  { %9345 = vmatpush3.msra.mxu1 %v10704_v44  ;;  %9340 = vmatpush3.msra.mxu0 %v10739_v49  ;;  %v11106_v44 = vld [vmem:[%s12323_s3 + $0x8] sm:$0xff] }
 0x348   :  { %9346 = vmatprep.subr.mxu1 %v10348_v28  ;;  %9342 = vmatmul.mubr.msk.f32.vlgmr.msra.gmra.mxu0 %vm85_vm0, %v2438_v39 }
 0x349   :  { %9347 = vmatpush3.msra.mxu1 %v10719_v46  ;;  %9352 = vmatprep.mubr.msk.f32.mxu1 %vm10349_vm1, %v10348_v28  ;;  %v11120_v46 = vld [vmem:[%s12323_s3] sm:$0xff] }
 0x34a   :  { %9348 = vmatprep.subr.mxu1 %v10348_v28  ;;  %9355 = vmatprep.subr.mxu0 %v10348_v28 }
 0x34b   :  { %9349 = vmatpush3.msra.mxu1 %v10733_v48  ;;  %9363 = vmatprep.mubr.msk.f32.mxu0 %vm10349_vm1, %v10348_v28 }
 0x34c   :  { %9350 = vmatprep.subr.mxu1 %v10348_v28  ;;  %9356 = vmatpush3.msra.mxu0 %v11082_v40 }
 0x34d   :  { %9351 = vmatpush3.msra.mxu1 %v10747_v50  ;;  %9357 = vmatprep.subr.mxu0 %v10348_v28 }
 0x34e   :  { %9353 = vmatmul.mubr.msk.f32.vlgmr.msra.gmra.mxu1 %vm85_vm0, %v2438_v39  ;;  %9366 = vmatprep.subr.mxu1 %v10348_v28 }
 0x34f   :  { %9374 = vmatprep.mubr.msk.f32.mxu1 %vm10349_vm1, %v10348_v28  ;;  %9367 = vmatpush3.msra.mxu1 %v11087_v41 }
 0x350   :  { %9368 = vmatprep.subr.mxu1 %v10348_v28  ;;  %9358 = vmatpush3.msra.mxu0 %v11092_v42 }
 0x351   :  { %9369 = vmatpush3.msra.mxu1 %v11099_v43  ;;  %9359 = vmatprep.subr.mxu0 %v10348_v28 }
 0x352   :  { %9370 = vmatprep.subr.mxu1 %v10348_v28  ;;  %9360 = vmatpush3.msra.mxu0 %v11106_v44 }
 0x353   :  { %9371 = vmatpush3.msra.mxu1 %v11111_v45  ;;  %9361 = vmatprep.subr.mxu0 %v10348_v28 }
 0x354   :  { %9372 = vmatprep.subr.mxu1 %v10348_v28  ;;  %9362 = vmatpush3.msra.mxu0 %v11120_v46 }
 0x355   :  { %9373 = vmatpush3.msra.mxu1 %v11125_v47  ;;  %9377 = vmatprep.subr.mxu0 %v10348_v28 }
 0x356   :  { %9388 = vmatprep.subr.mxu1 %v10348_v28 }
 0x3f8   :  { %v2246_v48 = vpop.f32.mrf.mxu0  ;;  %v2320_v49 = vpop.f32.mrf.mxu1 }
 0x3f9   :  { %v2329_v50 = vrot.slane %v2246_v48, 2  ;;  %v2339_v59 = vrot.slane %v2320_v49, 2 }
 0x3fa   :  { %v9299_v12 = vpop.f32.mrf.mxu0  ;;  %v9310_v61 = vpop.f32.mrf.mxu1 }
 0x3fb   :  { %v2331_v24 = vadd.f32 %v2329_v50, %v10810_v11  ;;  %v2341_v31 = vadd.f32 %v2339_v59, %v10813_v18  ;;  %v11164_v12 = vld [vmem:[%s12323_s3 + $0x50] sm:$0xff] }
 0x3fc   :  { %v11169_v61 = vld [vmem:[%s12324_s0 + $0x10] sm:$0xff] }
 0x3fd   :  { %v8298_v7 = vmul.f32 -1.442695, %v2331_v24  ;;  %v8299_v11 = vmul.f32 -1.442695, %v2341_v31  ;;  %v11232_v31 = vld [vmem:[%s12324_s0 + $0x30] sm:$0xff] }
 0x3ff   :  { %10133 = vpow2.f32 %v8298_v7  ;;  %v11178_v7 = vld [vmem:[%s12323_s3 + $0x48] sm:$0xff] }
 0x400   :  { %v2414_v51 = vpop.f32.mrf.mxu0 }
 0x401   :  { %v2415_v57 = vadd.f32 %v10825_v14, %v2414_v51  ;;  %v11183_v51 = vld [vmem:[%s12324_s0 + $0x8] sm:$0xff] }
 0x402   :  { %v9321_v53 = vpop.f32.mrf.mxu0 }
 0x403   :  { %v2419_v58 = vrot.slane %v2415_v57, 2 }
 0x406   :  { %v2507_v54 = vpop.f32.mrf.mxu1 }
 0x407   :  { %v2589_v2 = vadd.f32 %v2507_v54, %v10815_v20  ;;  %v11193_v54 = vld [vmem:[%s12323_s3 + $0x40] sm:$0xff] }
 0x408   :  { %v9332_v26 = vpop.f32.mrf.mxu1  ;;  %v2581_v27 = vpop.f32.mrf.mxu0 }
 0x409   :  { %v8311_v29 = vmul.f32 -1.442695, %v2589_v2  ;;  %v2596_v25 = vadd.f32 %v2581_v27, %v10819_v62 }
 0x40a   :  { %v9343_v30 = vpop.f32.mrf.mxu0 }
 0x40b   :  { %10135 = vpow2.f32 %v8311_v29  ;;  %v8312_v34 = vmul.f32 -1.442695, %v2596_v25  ;;  %v11214_v29 = vld [vmem:[%s12324_s0 + $0x38] sm:$0xff] }
 0x40c   :  { %v10134_v32 = vpop.eup %10133  ;;  %v11219_v30 = vld [vmem:[%s12324_s0 + $0x58] sm:$0xff] }
 0x40d   :  { %v2335_v33 = vadd.f32 1.0, %v10134_v32  ;;  %v11237_v32 = vld [vmem:[%s12324_s0 + $0x50] sm:$0xff] }
 0x40e   :  { %v2669_v60 = vpop.f32.mrf.mxu1 }
 0x40f   :  { %10137 = vrcp.f32 %v2335_v33  ;;  %v2670_v16 = vadd.f32 %v10833_v4, %v2669_v60  ;;  %v11246_v33 = vld [vmem:[%s12324_s0 + $0x28] sm:$0xff] }
 0x410   :  { %v9354_v0 = vpop.f32.mrf.mxu1  ;;  %10139 = vpow2.f32 %v8299_v11  ;;  %v11251_v60 = vld [vmem:[%s12324_s0 + $0x48] sm:$0xff]  ;;  %v11260_v11 = vld [vmem:[%s12324_s0 + $0x20] sm:$0xff] }
 0x411   :  { %v11267_v0 = vld [vmem:[%s12324_s0 + $0x40] sm:$0xff] }
 0x418   :  { %v10136_v52 = vpop.eup %10135 }
 0x419   :  { %v2593_v20 = vadd.f32 1.0, %v10136_v52 }
 0x41b   :  { %10141 = vrcp.f32 %v2593_v20 }
 0x41c   :  { %v10138_v5 = vpop.eup %10137  ;;  %10143 = vpow2.f32 %v8312_v34 }
 0x41d   :  { %v2421_v6 = vmul.f32 %v10138_v5, %v2419_v58  ;;  %v10140_v8 = vpop.eup %10139 }
 0x41e   :  { %v2345_v15 = vadd.f32 1.0, %v10140_v8 }
 0x41f   :  { %v2422_v18 = vadd.f32 %v2421_v6, %v10828_v21 }
 0x421   :  { %10145 = vtanh.f32 %v2422_v18 }
 0x422   :  { %10147 = vrcp.f32 %v2345_v15 }
 0x428   :  { %v10142_v19 = vpop.eup %10141 }
 0x429   :  { %v2673_v14 = vmul.f32 %v10142_v19, %v2670_v16  ;;  %v10144_v23 = vpop.eup %10143 }
 0x42a   :  { %v2600_v36 = vadd.f32 1.0, %v10144_v23 }
 0x42b   :  { %v2674_v62 = vadd.f32 %v2673_v14, %v10837_v22  ;;  %v11152_v22 = vld [vmem:[%s12323_s3 + $0x58] sm:$0xff] }
 0x42d   :  { %10149 = vtanh.f32 %v2674_v62 }
 0x42e   :  { %v10146_v3 = vpop.eup %10145  ;;  %10151 = vrcp.f32 %v2600_v36 }
 0x42f   :  { %v2425_v35 = vrot.slane %v10146_v3, 2  ;;  %v10148_v39 = vpop.eup %10147 }
 0x431   :  { %v2427_v37 = vsub.f32 %v11018_v17, %v2425_v35  ;;  %v11157_v17 = vld [vmem:[%s12324_s0 + $0x18] sm:$0xff] }
 0x433   :  { %v2429_v21 = vrot.slane %v2427_v37, 6 }
 0x435   :  { %v2431_v48 = vmul.f32 %v10148_v39, %v2429_v21 }
 0x437   :  { %v11144_v49 = vadd.f32 %v10146_v3, %v2431_v48 }
 0x439   :  { %2685 = vst.msk [vmem:[#allocation2] sm:$0xc0] %vm1121_vm3, %v11144_v49  ;;  %v2692_v4 = vrot.slane %v11144_v49, 6 }
 0x43a   :  { %v10150_v50 = vpop.eup %10149 }
 0x43b   :  { %9364 = vmatmul.mubr.msk.f32.vlgmr.msra.gmra.mxu0 %vm85_vm0, %v2692_v4  ;;  %9375 = vmatmul.mubr.msk.f32.vlgmr.msra.gmra.mxu1 %vm85_vm0, %v2692_v4  ;;  %v2677_v24 = vrot.slane %v10150_v50, 6  ;;  %v10152_v2 = vpop.eup %10151 }
 0x43c   :  { %9378 = vmatpush3.msra.mxu0 %v11152_v22  ;;  %9389 = vmatpush3.msra.mxu1 %v11157_v17 }
 0x43d   :  { %9379 = vmatprep.subr.mxu0 %v10348_v28  ;;  %9390 = vmatprep.subr.mxu1 %v10348_v28  ;;  %v2679_v53 = vsub.f32 %v11048_v38, %v2677_v24  ;;  %v11200_v38 = vld [vmem:[%s12324_s0] sm:$0xff] }
 0x43e   :  { %9380 = vmatpush3.msra.mxu0 %v11164_v12  ;;  %9391 = vmatpush3.msra.mxu1 %v11169_v61  ;;  %v11310_v24 = vld [vmem:[%s12326_s24] ss:$0 sm:$0xff] }
 0x43f   :  { %9381 = vmatprep.subr.mxu0 %v10348_v28  ;;  %9392 = vmatprep.subr.mxu1 %v10348_v28  ;;  %v2681_v59 = vrot.slane %v2679_v53, 2 }
 0x440   :  { %9382 = vmatpush3.msra.mxu0 %v11178_v7  ;;  %9393 = vmatpush3.msra.mxu1 %v11183_v51 }
 0x441   :  { %9383 = vmatprep.subr.mxu0 %v10348_v28  ;;  %9394 = vmatprep.subr.mxu1 %v10348_v28  ;;  %v2683_v26 = vmul.f32 %v10152_v2, %v2681_v59 }
 0x442   :  { %9384 = vmatpush3.msra.mxu0 %v11193_v54  ;;  %9385 = vmatprep.mubr.msk.f32.mxu0 %vm10349_vm1, %v10348_v28 }
 0x443   :  { %9395 = vmatpush3.msra.mxu1 %v11200_v38  ;;  %9386 = vmatmul.mubr.msk.f32.vlgmr.msra.gmra.mxu0 %vm85_vm0, %v2692_v4  ;;  %v11209_v27 = vadd.f32 %v10150_v50, %v2683_v26 }
 0x444   :  { %9396 = vmatprep.mubr.msk.f32.mxu1 %vm10349_vm1, %v10348_v28  ;;  %9399 = vmatprep.subr.mxu0 %v10348_v28 }
 0x445   :  { %9410 = vmatprep.subr.mxu1 %v10348_v28  ;;  %2686 = vst.msk [vmem:[#allocation3 + $0x8] sm:$0x3] %vm1119_vm2, %v11209_v27  ;;  %9397 = vmatmul.mubr.msk.f32.vlgmr.msra.gmra.mxu1 %vm85_vm0, %v11209_v27 }
 0x446   :  { %9400 = vmatpush3.msra.mxu0 %v11214_v29  ;;  %9411 = vmatpush3.msra.mxu1 %v11219_v30 }
 0x447   :  { %9401 = vmatprep.subr.mxu0 %v10348_v28  ;;  %9412 = vmatprep.subr.mxu1 %v10348_v28 }
 0x448   :  { %9402 = vmatpush3.msra.mxu0 %v11232_v31  ;;  %9413 = vmatpush3.msra.mxu1 %v11237_v32 }
 0x449   :  { %9403 = vmatprep.subr.mxu0 %v10348_v28  ;;  %9414 = vmatprep.subr.mxu1 %v10348_v28 }
 0x44a   :  { %9404 = vmatpush3.msra.mxu0 %v11246_v33  ;;  %9415 = vmatpush3.msra.mxu1 %v11251_v60 }
 0x44b   :  { %9405 = vmatprep.subr.mxu0 %v10348_v28  ;;  %9416 = vmatprep.subr.mxu1 %v10348_v28 }
 0x44c   :  { %9406 = vmatpush3.msra.mxu0 %v11260_v11  ;;  %9407 = vmatprep.mubr.msk.f32.mxu0 %vm10349_vm1, %v10348_v28 }
 0x44d   :  { %9417 = vmatpush3.msra.mxu1 %v11267_v0  ;;  %9418 = vmatprep.mubr.msk.f32.mxu1 %vm10349_vm1, %v10348_v28 }
 0x44e   :  { %9408 = vmatmul.mubr.msk.f32.vlgmr.msra.gmra.mxu0 %vm85_vm0, %v11209_v27  ;;  %9419 = vmatmul.mubr.msk.f32.vlgmr.msra.gmra.mxu1 %vm85_vm0, %v11209_v27 }
 0x44f   :  { %9421 = vmatprep.subr.mxu0 %v10348_v28  ;;  %9432 = vmatprep.subr.mxu1 %v10348_v28 }
 0x450   :  { %9422 = vmatpush3.msra.mxu0 %v11082_v40  ;;  %9433 = vmatpush3.msra.mxu1 %v11087_v41 }
 0x451   :  { %9423 = vmatprep.subr.mxu0 %v10348_v28  ;;  %9434 = vmatprep.subr.mxu1 %v10348_v28 }
 0x452   :  { %9424 = vmatpush3.msra.mxu0 %v11092_v42  ;;  %9435 = vmatpush3.msra.mxu1 %v11099_v43 }
 0x453   :  { %9425 = vmatprep.subr.mxu0 %v10348_v28  ;;  %9436 = vmatprep.subr.mxu1 %v10348_v28 }
 0x454   :  { %9426 = vmatpush3.msra.mxu0 %v11106_v44  ;;  %9437 = vmatpush3.msra.mxu1 %v11111_v45 }
 0x455   :  { %9427 = vmatprep.subr.mxu0 %v10348_v28  ;;  %9438 = vmatprep.subr.mxu1 %v10348_v28 }
 0x456   :  { %9428 = vmatpush3.msra.mxu0 %v11120_v46  ;;  %9429 = vmatprep.mubr.msk.f32.mxu0 %vm10349_vm1, %v10348_v28 }
 0x457   :  { %9439 = vmatpush3.msra.mxu1 %v11125_v47  ;;  %9440 = vmatprep.mubr.msk.f32.mxu1 %vm10349_vm1, %v10348_v28 }
 0x458   :  { %9443 = vmatprep.subr.mxu0 %v10348_v28  ;;  %9454 = vmatprep.subr.mxu1 %v10348_v28 }
 0x4fb   :  { %v2761_v57 = vpop.f32.mrf.mxu0  ;;  %v2835_v25 = vpop.f32.mrf.mxu1 }
 0x4fc   :  { %v2843_v52 = vadd.f32 %v2761_v57, %v10786_v55  ;;  %v2850_v14 = vadd.f32 %v2835_v25, %v10788_v56 }
 0x4fd   :  { %v9365_v20 = vpop.f32.mrf.mxu0  ;;  %v9376_v58 = vpop.f32.mrf.mxu1 }
 0x4fe   :  { %v8324_v34 = vmul.f32 -1.442695, %v2843_v52  ;;  %v8325_v36 = vmul.f32 -1.442695, %v2850_v14  ;;  %v11317_v20 = vld [vmem:[%s12291_s8] ss:$0 sm:$0xff] }
 0x500   :  { %10153 = vpow2.f32 %v8324_v34 }
 0x503   :  { %v2923_v5 = vpop.f32.mrf.mxu0 }
 0x504   :  { %v2924_v53 = vadd.f32 %v11310_v24, %v2923_v5 }
 0x505   :  { %v3012_v6 = vpop.f32.mrf.mxu1  ;;  %v9387_v18 = vpop.f32.mrf.mxu0 }
 0x506   :  { %v3095_v8 = vrot.slane %v3012_v6, 2 }
 0x507   :  { %v9398_v15 = vpop.f32.mrf.mxu1 }
 0x508   :  { %v3097_v16 = vadd.f32 %v3095_v8, %v10798_v1 }
 0x50a   :  { %v8337_v19 = vmul.f32 -1.442695, %v3097_v16 }
 0x50c   :  { %10155 = vpow2.f32 %v8337_v19 }
 0x50d   :  { %v10154_v62 = vpop.eup %10153 }
 0x50e   :  { %v2847_v23 = vadd.f32 1.0, %v10154_v62  ;;  %v3086_v3 = vpop.f32.mrf.mxu0  ;;  %v3180_v35 = vpop.f32.mrf.mxu1 }
 0x50f   :  { %v3105_v39 = vrot.slane %v3086_v3, 2  ;;  %v3181_v58 = vadd.f32 %v11317_v20, %v3180_v35 }
 0x510   :  { %10157 = vrcp.f32 %v2847_v23  ;;  %v9409_v37 = vpop.f32.mrf.mxu0  ;;  %v9420_v21 = vpop.f32.mrf.mxu1 }
 0x511   :  { %10159 = vpow2.f32 %v8325_v36  ;;  %v3107_v48 = vadd.f32 %v3105_v39, %v10806_v9  ;;  %v3185_v34 = vrot.slane %v3181_v58, 2 }
 0x513   :  { %v8338_v59 = vmul.f32 -1.442695, %v3107_v48 }
 0x519   :  { %v10156_v4 = vpop.eup %10155 }
 0x51a   :  { %v3101_v50 = vadd.f32 1.0, %v10156_v4 }
 0x51c   :  { %10161 = vrcp.f32 %v3101_v50 }
 0x51d   :  { %v10158_v2 = vpop.eup %10157  ;;  %10163 = vpow2.f32 %v8338_v59 }
 0x51e   :  { %v2927_v26 = vmul.f32 %v10158_v2, %v2924_v53  ;;  %v10160_v25 = vpop.eup %10159 }
 0x51f   :  { %v2854_v52 = vadd.f32 1.0, %v10160_v25 }
 0x520   :  { %v2928_v57 = vadd.f32 %v2927_v26, %v10796_v63 }
 0x522   :  { %10165 = vtanh.f32 %v2928_v57 }
 0x523   :  { %10167 = vrcp.f32 %v2854_v52 }
 0x529   :  { %v10162_v5 = vpop.eup %10161 }
 0x52a   :  { %v3187_v6 = vmul.f32 %v10162_v5, %v3185_v34  ;;  %v10164_v8 = vpop.eup %10163 }
 0x52b   :  { %v3111_v16 = vadd.f32 1.0, %v10164_v8 }
 0x52c   :  { %v3188_v18 = vadd.f32 %v3187_v6, %v10808_v10 }
 0x52e   :  { %10169 = vtanh.f32 %v3188_v18 }
 0x52f   :  { %v10166_v15 = vpop.eup %10165  ;;  %10171 = vrcp.f32 %v3111_v16 }
 0x530   :  { %v2931_v19 = vrot.slane %v10166_v15, 2  ;;  %v10168_v23 = vpop.eup %10167 }
 0x532   :  { %v2933_v14 = vsub.f32 %v11144_v49, %v2931_v19 }
 0x534   :  { %v2935_v62 = vrot.slane %v2933_v14, 6 }
 0x536   :  { %v2937_v3 = vmul.f32 %v10168_v23, %v2935_v62 }
 0x538   :  { %v11322_v36 = vadd.f32 %v10166_v15, %v2937_v3 }
 0x53a   :  { %3199 = vst.msk [vmem:[#allocation2 + $0x8] sm:$0x3] %vm1119_vm2, %v11322_v36  ;;  %9430 = vmatmul.mubr.msk.f32.vlgmr.msra.gmra.mxu0 %vm85_vm0, %v11322_v36  ;;  %9441 = vmatmul.mubr.msk.f32.vlgmr.msra.gmra.mxu1 %vm85_vm0, %v11322_v36 }
 0x53b   :  { %v10170_v35 = vpop.eup %10169  ;;  %9444 = vmatpush3.msra.mxu0 %v11152_v22  ;;  %9455 = vmatpush3.msra.mxu1 %v11157_v17 }
 0x53c   :  { %v3191_v49 = vrot.slane %v10170_v35, 6  ;;  %9445 = vmatprep.subr.mxu0 %v10348_v28  ;;  %9456 = vmatprep.subr.mxu1 %v10348_v28  ;;  %v10172_v39 = vpop.eup %10171 }
 0x53d   :  { %9446 = vmatpush3.msra.mxu0 %v11164_v12  ;;  %9451 = vmatprep.mubr.msk.f32.mxu0 %vm10349_vm1, %v10348_v28 }
 0x53e   :  { %9447 = vmatprep.subr.mxu0 %v10348_v28  ;;  %9457 = vmatpush3.msra.mxu1 %v11169_v61  ;;  %v3193_v37 = vsub.f32 %v11209_v27, %v3191_v49 }
 0x53f   :  { %9448 = vmatpush3.msra.mxu0 %v11178_v7  ;;  %9458 = vmatprep.subr.mxu1 %v10348_v28 }
 0x540   :  { %9449 = vmatprep.subr.mxu0 %v10348_v28  ;;  %9459 = vmatpush3.msra.mxu1 %v11183_v51  ;;  %v3195_v21 = vrot.slane %v3193_v37, 2 }
 0x541   :  { %9450 = vmatpush3.msra.mxu0 %v11193_v54  ;;  %9460 = vmatprep.subr.mxu1 %v10348_v28 }
 0x542   :  { %9452 = vmatmul.mubr.msk.f32.vlgmr.msra.gmra.mxu0 %vm85_vm0, %v11322_v36  ;;  %9465 = vmatprep.subr.mxu0 %v10348_v28  ;;  %v3197_v27 = vmul.f32 %v10172_v39, %v3195_v21 }
 0x543   :  { %9466 = vmatpush3.msra.mxu0 %v11214_v29  ;;  %9461 = vmatpush3.msra.mxu1 %v11200_v38 }
 0x544   :  { %9467 = vmatprep.subr.mxu0 %v10348_v28  ;;  %9462 = vmatprep.mubr.msk.f32.mxu1 %vm10349_vm1, %v10348_v28  ;;  %v11354_v48 = vadd.f32 %v10170_v35, %v3197_v27 }
 0x545   :  { %9468 = vmatpush3.msra.mxu0 %v11232_v31  ;;  %9476 = vmatprep.subr.mxu1 %v10348_v28 }
 0x546   :  { %9469 = vmatprep.subr.mxu0 %v10348_v28  ;;  %3200 = vst.msk [vmem:[#allocation3] sm:$0xc0] %vm1121_vm3, %v11354_v48  ;;  %v3466_v4 = vrot.slane %v11354_v48, 6  ;;  %9473 = vmatprep.mubr.msk.f32.mxu0 %vm10349_vm1, %v10348_v28 }
 0x547   :  { %9470 = vmatpush3.msra.mxu0 %v11246_v33 }
 0x548   :  { %9463 = vmatmul.mubr.msk.f32.vlgmr.msra.gmra.mxu1 %vm85_vm0, %v3466_v4  ;;  %9471 = vmatprep.subr.mxu0 %v10348_v28 }
 0x549   :  { %9477 = vmatpush3.msra.mxu1 %v11219_v30  ;;  %9472 = vmatpush3.msra.mxu0 %v11260_v11 }
 0x54a   :  { %9478 = vmatprep.subr.mxu1 %v10348_v28  ;;  %9474 = vmatmul.mubr.msk.f32.vlgmr.msra.gmra.mxu0 %vm85_vm0, %v3466_v4 }
 0x54b   :  { %9479 = vmatpush3.msra.mxu1 %v11237_v32  ;;  %9484 = vmatprep.mubr.msk.f32.mxu1 %vm10349_vm1, %v10348_v28 }
 0x54c   :  { %9480 = vmatprep.subr.mxu1 %v10348_v28  ;;  %9487 = vmatprep.subr.mxu0 %v10348_v28 }
 0x54d   :  { %9481 = vmatpush3.msra.mxu1 %v11251_v60  ;;  %9488 = vmatpush3.msra.mxu0 %v11082_v40 }
 0x54e   :  { %9482 = vmatprep.subr.mxu1 %v10348_v28  ;;  %9489 = vmatprep.subr.mxu0 %v10348_v28 }
 0x54f   :  { %9483 = vmatpush3.msra.mxu1 %v11267_v0  ;;  %9490 = vmatpush3.msra.mxu0 %v11092_v42 }
 0x550   :  { %9485 = vmatmul.mubr.msk.f32.vlgmr.msra.gmra.mxu1 %vm85_vm0, %v3466_v4  ;;  %9498 = vmatprep.subr.mxu1 %v10348_v28 }
 0x551   :  { %9499 = vmatpush3.msra.mxu1 %v11087_v41  ;;  %9491 = vmatprep.subr.mxu0 %v10348_v28 }
 0x552   :  { %9500 = vmatprep.subr.mxu1 %v10348_v28  ;;  %9492 = vmatpush3.msra.mxu0 %v11106_v44 }
 0x553   :  { %9501 = vmatpush3.msra.mxu1 %v11099_v43  ;;  %9493 = vmatprep.subr.mxu0 %v10348_v28 }
 0x554   :  { %9502 = vmatprep.subr.mxu1 %v10348_v28  ;;  %9494 = vmatpush3.msra.mxu0 %v11120_v46 }
 0x555   :  { %9503 = vmatpush3.msra.mxu1 %v11111_v45  ;;  %9495 = vmatprep.mubr.msk.f32.mxu0 %vm10349_vm1, %v10348_v28 }
 0x556   :  { %9504 = vmatprep.subr.mxu1 %v10348_v28  ;;  %9506 = vmatprep.mubr.msk.f32.mxu1 %vm10349_vm1, %v10348_v28 }
 0x557   :  { %9505 = vmatpush3.msra.mxu1 %v11125_v47  ;;  %9509 = vmatprep.subr.mxu0 %v10348_v28 }
 0x558   :  { %9520 = vmatprep.subr.mxu1 %v10348_v28 }
 0x5fa   :  { %v3274_v50 = vpop.f32.mrf.mxu0  ;;  %v3348_v53 = vpop.f32.mrf.mxu1 }
 0x5fb   :  { %v3357_v59 = vrot.slane %v3274_v50, 6  ;;  %v3367_v5 = vrot.slane %v3348_v53, 6 }
 0x5fc   :  { %v9431_v2 = vpop.f32.mrf.mxu0  ;;  %v9442_v26 = vpop.f32.mrf.mxu1 }
 0x5fd   :  { %v3359_v57 = vadd.f32 %v3357_v59, %v10786_v55  ;;  %v3369_v19 = vadd.f32 %v3367_v5, %v10788_v56 }
 0x5ff   :  { %v8350_v25 = vmul.f32 -1.442695, %v3359_v57  ;;  %v8351_v35 = vmul.f32 -1.442695, %v3369_v19 }
 0x601   :  { %10173 = vpow2.f32 %v8350_v25 }
 0x602   :  { %v3442_v52 = vpop.f32.mrf.mxu0 }
 0x603   :  { %v3443_v21 = vadd.f32 %v11310_v24, %v3442_v52 }
 0x604   :  { %v9453_v58 = vpop.f32.mrf.mxu0 }
 0x605   :  { %v3447_v4 = vrot.slane %v3443_v21, 6 }
 0x608   :  { %v3535_v34 = vpop.f32.mrf.mxu1 }
 0x609   :  { %v3618_v6 = vrot.slane %v3535_v34, 4 }
 0x60a   :  { %v9464_v18 = vpop.f32.mrf.mxu1  ;;  %v3609_v8 = vpop.f32.mrf.mxu0 }
 0x60b   :  { %v3620_v15 = vadd.f32 %v3618_v6, %v10798_v1  ;;  %v3628_v37 = vrot.slane %v3609_v8, 4 }
 0x60c   :  { %v9475_v16 = vpop.f32.mrf.mxu0 }
 0x60d   :  { %v8363_v14 = vmul.f32 -1.442695, %v3620_v15  ;;  %v3630_v39 = vadd.f32 %v3628_v37, %v10806_v9 }
 0x60e   :  { %v10174_v62 = vpop.eup %10173 }
 0x60f   :  { %v3363_v23 = vadd.f32 1.0, %v10174_v62  ;;  %10175 = vpow2.f32 %v8363_v14  ;;  %v8364_v59 = vmul.f32 -1.442695, %v3630_v39 }
 0x610   :  { %v3703_v3 = vpop.f32.mrf.mxu1 }
 0x611   :  { %10177 = vrcp.f32 %v3363_v23  ;;  %v3704_v58 = vadd.f32 %v11317_v20, %v3703_v3 }
 0x612   :  { %v9486_v49 = vpop.f32.mrf.mxu1  ;;  %10179 = vpow2.f32 %v8351_v35 }
 0x613   :  { %v3708_v34 = vrot.slane %v3704_v58, 4 }
 0x61c   :  { %v10176_v27 = vpop.eup %10175 }
 0x61d   :  { %v3624_v50 = vadd.f32 1.0, %v10176_v27 }
 0x61e   :  { %v10178_v53 = vpop.eup %10177 }
 0x61f   :  { %v3449_v2 = vmul.f32 %v10178_v53, %v3447_v4  ;;  %10181 = vrcp.f32 %v3624_v50  ;;  %v10180_v57 = vpop.eup %10179 }
 0x620   :  { %10183 = vpow2.f32 %v8364_v59  ;;  %v3373_v25 = vadd.f32 1.0, %v10180_v57 }
 0x621   :  { %v3450_v26 = vadd.f32 %v3449_v2, %v10796_v63 }
 0x623   :  { %10185 = vtanh.f32 %v3450_v26 }
 0x624   :  { %10187 = vrcp.f32 %v3373_v25 }
 0x62c   :  { %v10182_v52 = vpop.eup %10181 }
 0x62d   :  { %v3710_v5 = vmul.f32 %v10182_v52, %v3708_v34  ;;  %v10184_v6 = vpop.eup %10183 }
 0x62e   :  { %v3634_v16 = vadd.f32 1.0, %v10184_v6 }
 0x62f   :  { %v3711_v18 = vadd.f32 %v3710_v5, %v10808_v10 }
 0x630   :  { %v10186_v8 = vpop.eup %10185 }
 0x631   :  { %v3453_v15 = vrot.slane %v10186_v8, 2  ;;  %10189 = vtanh.f32 %v3711_v18  ;;  %v10188_v62 = vpop.eup %10187 }
 0x632   :  { %10191 = vrcp.f32 %v3634_v16 }
 0x633   :  { %v3455_v19 = vsub.f32 %v11322_v36, %v3453_v15 }
 0x635   :  { %v3457_v14 = vrot.slane %v3455_v19, 6 }
 0x637   :  { %v3459_v23 = vmul.f32 %v10188_v62, %v3457_v14 }
 0x639   :  { %v11410_v35 = vadd.f32 %v10186_v8, %v3459_v23 }
 0x63b   :  { %3722 = vst.msk [vmem:[#allocation2 + $0x8] sm:$0xc] %vm1644_vm4, %v11410_v35  ;;  %v3729_v3 = vrot.slane %v11410_v35, 2 }
 0x63d   :  { %9496 = vmatmul.mubr.msk.f32.vlgmr.msra.gmra.mxu0 %vm85_vm0, %v3729_v3  ;;  %9507 = vmatmul.mubr.msk.f32.vlgmr.msra.gmra.mxu1 %vm85_vm0, %v3729_v3 }
 0x63e   :  { %v10190_v49 = vpop.eup %10189  ;;  %9510 = vmatpush3.msra.mxu0 %v11152_v22  ;;  %9521 = vmatpush3.msra.mxu1 %v11157_v17 }
 0x63f   :  { %v3714_v36 = vrot.slane %v10190_v49, 6  ;;  %9511 = vmatprep.subr.mxu0 %v10348_v28  ;;  %9522 = vmatprep.subr.mxu1 %v10348_v28  ;;  %v10192_v39 = vpop.eup %10191 }
 0x640   :  { %9512 = vmatpush3.msra.mxu0 %v11164_v12  ;;  %9517 = vmatprep.mubr.msk.f32.mxu0 %vm10349_vm1, %v10348_v28 }
 0x641   :  { %9513 = vmatprep.subr.mxu0 %v10348_v28  ;;  %9523 = vmatpush3.msra.mxu1 %v11169_v61  ;;  %v3716_v37 = vsub.f32 %v11354_v48, %v3714_v36 }
 0x642   :  { %9514 = vmatpush3.msra.mxu0 %v11178_v7  ;;  %9524 = vmatprep.subr.mxu1 %v10348_v28 }
 0x643   :  { %9515 = vmatprep.subr.mxu0 %v10348_v28  ;;  %9525 = vmatpush3.msra.mxu1 %v11183_v51  ;;  %v3718_v21 = vrot.slane %v3716_v37, 2 }
 0x644   :  { %9516 = vmatpush3.msra.mxu0 %v11193_v54  ;;  %9526 = vmatprep.subr.mxu1 %v10348_v28 }
 0x645   :  { %9518 = vmatmul.mubr.msk.f32.vlgmr.msra.gmra.mxu0 %vm85_vm0, %v3729_v3  ;;  %9531 = vmatprep.subr.mxu0 %v10348_v28  ;;  %v3720_v27 = vmul.f32 %v10192_v39, %v3718_v21 }
 0x646   :  { %9532 = vmatpush3.msra.mxu0 %v11214_v29  ;;  %9527 = vmatpush3.msra.mxu1 %v11200_v38 }
 0x647   :  { %9533 = vmatprep.subr.mxu0 %v10348_v28  ;;  %9528 = vmatprep.mubr.msk.f32.mxu1 %vm10349_vm1, %v10348_v28  ;;  %v11440_v48 = vadd.f32 %v10190_v49, %v3720_v27 }
 0x648   :  { %9534 = vmatpush3.msra.mxu0 %v11232_v31  ;;  %9542 = vmatprep.subr.mxu1 %v10348_v28 }
 0x649   :  { %9535 = vmatprep.subr.mxu0 %v10348_v28  ;;  %3723 = vst.msk [vmem:[#allocation3] sm:$0x30] %vm1646_vm5, %v11440_v48  ;;  %v3990_v4 = vrot.slane %v11440_v48, 4  ;;  %9539 = vmatprep.mubr.msk.f32.mxu0 %vm10349_vm1, %v10348_v28 }
 0x64a   :  { %9536 = vmatpush3.msra.mxu0 %v11246_v33 }
 0x64b   :  { %9529 = vmatmul.mubr.msk.f32.vlgmr.msra.gmra.mxu1 %vm85_vm0, %v3990_v4  ;;  %9537 = vmatprep.subr.mxu0 %v10348_v28 }
 0x64c   :  { %9543 = vmatpush3.msra.mxu1 %v11219_v30  ;;  %9538 = vmatpush3.msra.mxu0 %v11260_v11 }
 0x64d   :  { %9544 = vmatprep.subr.mxu1 %v10348_v28  ;;  %9540 = vmatmul.mubr.msk.f32.vlgmr.msra.gmra.mxu0 %vm85_vm0, %v3990_v4 }
 0x64e   :  { %9545 = vmatpush3.msra.mxu1 %v11237_v32  ;;  %9550 = vmatprep.mubr.msk.f32.mxu1 %vm10349_vm1, %v10348_v28 }
 0x64f   :  { %9546 = vmatprep.subr.mxu1 %v10348_v28  ;;  %9553 = vmatprep.subr.mxu0 %v10348_v28 }
 0x650   :  { %9547 = vmatpush3.msra.mxu1 %v11251_v60  ;;  %9554 = vmatpush3.msra.mxu0 %v11082_v40 }
 0x651   :  { %9548 = vmatprep.subr.mxu1 %v10348_v28  ;;  %9555 = vmatprep.subr.mxu0 %v10348_v28 }
 0x652   :  { %9549 = vmatpush3.msra.mxu1 %v11267_v0  ;;  %9556 = vmatpush3.msra.mxu0 %v11092_v42 }
 0x653   :  { %9551 = vmatmul.mubr.msk.f32.vlgmr.msra.gmra.mxu1 %vm85_vm0, %v3990_v4  ;;  %9564 = vmatprep.subr.mxu1 %v10348_v28 }
 0x654   :  { %9565 = vmatpush3.msra.mxu1 %v11087_v41  ;;  %9557 = vmatprep.subr.mxu0 %v10348_v28 }
 0x655   :  { %9566 = vmatprep.subr.mxu1 %v10348_v28  ;;  %9558 = vmatpush3.msra.mxu0 %v11106_v44 }
 0x656   :  { %9567 = vmatpush3.msra.mxu1 %v11099_v43  ;;  %9559 = vmatprep.subr.mxu0 %v10348_v28 }
 0x657   :  { %9568 = vmatprep.subr.mxu1 %v10348_v28  ;;  %9560 = vmatpush3.msra.mxu0 %v11120_v46 }
 0x658   :  { %9569 = vmatpush3.msra.mxu1 %v11111_v45  ;;  %9561 = vmatprep.mubr.msk.f32.mxu0 %vm10349_vm1, %v10348_v28 }
 0x659   :  { %9570 = vmatprep.subr.mxu1 %v10348_v28  ;;  %9572 = vmatprep.mubr.msk.f32.mxu1 %vm10349_vm1, %v10348_v28 }
 0x65a   :  { %9571 = vmatpush3.msra.mxu1 %v11125_v47  ;;  %9575 = vmatprep.subr.mxu0 %v10348_v28 }
 0x65b   :  { %9586 = vmatprep.subr.mxu1 %v10348_v28 }
 0x6fd   :  { %v3798_v40 = vpop.f32.mrf.mxu0  ;;  %v3872_v41 = vpop.f32.mrf.mxu1 }
 0x6fe   :  { %v3881_v42 = vrot.slane %v3798_v40, 4  ;;  %v3891_v2 = vrot.slane %v3872_v41, 4 }
 0x6ff   :  { %v9497_v43 = vpop.f32.mrf.mxu0  ;;  %v9508_v44 = vpop.f32.mrf.mxu1 }
 0x700   :  { %v3883_v45 = vadd.f32 %v3881_v42, %v10786_v55  ;;  %v3893_v34 = vadd.f32 %v3891_v2, %v10788_v56 }
 0x702   :  { %v8376_v46 = vmul.f32 -1.442695, %v3883_v45  ;;  %v8377_v8 = vmul.f32 -1.442695, %v3893_v34 }
 0x704   :  { %10193 = vpow2.f32 %v8376_v46 }
 0x705   :  { %v3966_v50 = vpop.f32.mrf.mxu0 }
 0x706   :  { %v3967_v19 = vadd.f32 %v11310_v24, %v3966_v50 }
 0x707   :  { %v9519_v53 = vpop.f32.mrf.mxu0 }
 0x708   :  { %v3971_v23 = vrot.slane %v3967_v19, 4 }
 0x70b   :  { %v4059_v59 = vpop.f32.mrf.mxu1 }
 0x70c   :  { %v4142_v26 = vrot.slane %v4059_v59, 6 }
 0x70d   :  { %v9530_v57 = vpop.f32.mrf.mxu1  ;;  %v4133_v47 = vpop.f32.mrf.mxu0 }
 0x70e   :  { %v4144_v25 = vadd.f32 %v4142_v26, %v10798_v1  ;;  %v4152_v16 = vrot.slane %v4133_v47, 6 }
 0x70f   :  { %v9541_v58 = vpop.f32.mrf.mxu0 }
 0x710   :  { %v8389_v52 = vmul.f32 -1.442695, %v4144_v25  ;;  %v4154_v14 = vadd.f32 %v4152_v16, %v10806_v9 }
 0x711   :  { %v10194_v5 = vpop.eup %10193 }
 0x712   :  { %v3887_v6 = vadd.f32 1.0, %v10194_v5  ;;  %10195 = vpow2.f32 %v8389_v52  ;;  %v8390_v36 = vmul.f32 -1.442695, %v4154_v14 }
 0x713   :  { %v4227_v18 = vpop.f32.mrf.mxu1 }
 0x714   :  { %10197 = vrcp.f32 %v3887_v6  ;;  %v4228_v4 = vadd.f32 %v11317_v20, %v4227_v18 }
 0x715   :  { %v9552_v15 = vpop.f32.mrf.mxu1  ;;  %10199 = vpow2.f32 %v8377_v8 }
 0x716   :  { %v4232_v40 = vrot.slane %v4228_v4, 6 }
 0x71f   :  { %v10196_v62 = vpop.eup %10195 }
 0x720   :  { %v4148_v3 = vadd.f32 1.0, %v10196_v62 }
 0x721   :  { %v10198_v49 = vpop.eup %10197 }
 0x722   :  { %v3973_v37 = vmul.f32 %v10198_v49, %v3971_v23  ;;  %10201 = vrcp.f32 %v4148_v3  ;;  %v10200_v39 = vpop.eup %10199 }
 0x723   :  { %10203 = vpow2.f32 %v8390_v36  ;;  %v3897_v27 = vadd.f32 1.0, %v10200_v39 }
 0x724   :  { %v3974_v21 = vadd.f32 %v3973_v37, %v10796_v63 }
 0x726   :  { %10205 = vtanh.f32 %v3974_v21 }
 0x727   :  { %10207 = vrcp.f32 %v3897_v27 }
 0x72f   :  { %v10202_v41 = vpop.eup %10201 }
 0x730   :  { %v4234_v42 = vmul.f32 %v10202_v41, %v4232_v40  ;;  %v10204_v43 = vpop.eup %10203 }
 0x731   :  { %v4158_v50 = vadd.f32 1.0, %v10204_v43 }
 0x732   :  { %v4235_v44 = vadd.f32 %v4234_v42, %v10808_v10 }
 0x733   :  { %v10206_v45 = vpop.eup %10205 }
 0x734   :  { %v3977_v46 = vrot.slane %v10206_v45, 2  ;;  %10209 = vtanh.f32 %v4235_v44  ;;  %v10208_v2 = vpop.eup %10207 }
 0x735   :  { %10211 = vrcp.f32 %v4158_v50 }
 0x736   :  { %v3979_v53 = vsub.f32 %v11410_v35, %v3977_v46 }
 0x738   :  { %v3981_v59 = vrot.slane %v3979_v53, 6 }
 0x73a   :  { %v3983_v26 = vmul.f32 %v10208_v2, %v3981_v59 }
 0x73c   :  { %v11496_v57 = vadd.f32 %v10206_v45, %v3983_v26 }
 0x73e   :  { %4246 = vst.msk [vmem:[#allocation2 + $0x8] sm:$0x30] %vm1646_vm5, %v11496_v57  ;;  %v4253_v47 = vrot.slane %v11496_v57, 4 }
 0x740   :  { %9562 = vmatmul.mubr.msk.f32.vlgmr.msra.gmra.mxu0 %vm85_vm0, %v4253_v47  ;;  %9573 = vmatmul.mubr.msk.f32.vlgmr.msra.gmra.mxu1 %vm85_vm0, %v4253_v47 }
 0x741   :  { %v10210_v25 = vpop.eup %10209  ;;  %9576 = vmatpush3.msra.mxu0 %v11152_v22  ;;  %9587 = vmatpush3.msra.mxu1 %v11157_v17 }
 0x742   :  { %v4238_v35 = vrot.slane %v10210_v25, 6  ;;  %9577 = vmatprep.subr.mxu0 %v10348_v28  ;;  %9588 = vmatprep.subr.mxu1 %v10348_v28  ;;  %v10212_v17 = vpop.eup %10211 }
 0x743   :  { %9578 = vmatpush3.msra.mxu0 %v11164_v12  ;;  %9583 = vmatprep.mubr.msk.f32.mxu0 %vm10349_vm1, %v10348_v28 }
 0x744   :  { %9579 = vmatprep.subr.mxu0 %v10348_v28  ;;  %9589 = vmatpush3.msra.mxu1 %v11169_v61  ;;  %v4240_v58 = vsub.f32 %v11440_v48, %v4238_v35 }
 0x745   :  { %9580 = vmatpush3.msra.mxu0 %v11178_v7  ;;  %9590 = vmatprep.subr.mxu1 %v10348_v28 }
 0x746   :  { %9581 = vmatprep.subr.mxu0 %v10348_v28  ;;  %9591 = vmatpush3.msra.mxu1 %v11183_v51  ;;  %v4242_v22 = vrot.slane %v4240_v58, 2  ;;  %v11551_v51 = vld [vmem:[#allocation2] sm:$0xff] }
 0x747   :  { %9582 = vmatpush3.msra.mxu0 %v11193_v54  ;;  %9592 = vmatprep.subr.mxu1 %v10348_v28  ;;  %v4770_v54 = vld [vmem:[%s12292_s9 + $0x18] sm:$0xff] }
 0x748   :  { %9584 = vmatmul.mubr.msk.f32.vlgmr.msra.gmra.mxu0 %vm85_vm0, %v4253_v47  ;;  %9597 = vmatprep.subr.mxu0 %v10348_v28  ;;  %v4244_v12 = vmul.f32 %v10212_v17, %v4242_v22 }
 0x749   :  { %9598 = vmatpush3.msra.mxu0 %v11214_v29  ;;  %9593 = vmatpush3.msra.mxu1 %v11200_v38  ;;  %v4769_v38 = vld [vmem:[%s12292_s9 + $0x10] sm:$0xff]  ;;  %v4768_v29 = vld [vmem:[%s12292_s9 + $0x8] sm:$0xff] }
 0x74a   :  { %9599 = vmatprep.subr.mxu0 %v10348_v28  ;;  %9594 = vmatprep.mubr.msk.f32.mxu1 %vm10349_vm1, %v10348_v28  ;;  %v11526_v61 = vadd.f32 %v10210_v25, %v4244_v12 }
 0x74b   :  { %9600 = vmatpush3.msra.mxu0 %v11232_v31  ;;  %9608 = vmatprep.subr.mxu1 %v10348_v28  ;;  %v11570_v31 = vld [vmem:[%s12292_s9 + $0x38] sm:$0xff] }
 0x74c   :  { %9601 = vmatprep.subr.mxu0 %v10348_v28  ;;  %4247 = vst.msk [vmem:[#allocation3] sm:$0xc] %vm1644_vm4, %v11526_v61  ;;  %v4514_v7 = vrot.slane %v11526_v61, 2  ;;  %9605 = vmatprep.mubr.msk.f32.mxu0 %vm10349_vm1, %v10348_v28 }
 0x74d   :  { %9602 = vmatpush3.msra.mxu0 %v11246_v33  ;;  %v4773_v33 = vld [vmem:[%s12293_s10 + $0x10] sm:$0xff] }
 0x74e   :  { %9595 = vmatmul.mubr.msk.f32.vlgmr.msra.gmra.mxu1 %vm85_vm0, %v4514_v7  ;;  %9603 = vmatprep.subr.mxu0 %v10348_v28 }
 0x74f   :  { %9609 = vmatpush3.msra.mxu1 %v11219_v30  ;;  %9604 = vmatpush3.msra.mxu0 %v11260_v11  ;;  %v4767_v30 = vld [vmem:[%s12292_s9] sm:$0xff] }
 0x750   :  { %9610 = vmatprep.subr.mxu1 %v10348_v28  ;;  %9606 = vmatmul.mubr.msk.f32.vlgmr.msra.gmra.mxu0 %vm85_vm0, %v4514_v7  ;;  %v4771_v11 = vld [vmem:[%s12293_s10] sm:$0xff] }
 0x751   :  { %9611 = vmatpush3.msra.mxu1 %v11237_v32  ;;  %9616 = vmatprep.mubr.msk.f32.mxu1 %vm10349_vm1, %v10348_v28  ;;  %v4774_v32 = vld [vmem:[%s12293_s10 + $0x18] sm:$0xff] }
 0x752   :  { %9612 = vmatprep.subr.mxu1 %v10348_v28  ;;  %9619 = vmatprep.subr.mxu0 %v4774_v32 }
 0x753   :  { %9613 = vmatpush3.msra.mxu1 %v11251_v60  ;;  %9620 = vmatpush3.msra.mxu0 %v4774_v32  ;;  %v4772_v60 = vld [vmem:[%s12293_s10 + $0x8] sm:$0xff] }
 0x754   :  { %9614 = vmatprep.subr.mxu1 %v10348_v28  ;;  %9621 = vmatprep.subr.mxu0 %v4773_v33  ;;  %v8424_v32 = vld [vmem:[%s12292_s9 + $0x28] sm:$0xff] }
 0x755   :  { %9615 = vmatpush3.msra.mxu1 %v11267_v0  ;;  %9622 = vmatpush3.msra.mxu0 %v4773_v33  ;;  %v11588_v0 = vld [vmem:[%s12293_s10 + $0x38] sm:$0xff]  ;;  %v8423_v33 = vld [vmem:[%s12292_s9 + $0x20] sm:$0xff] }
 0x756   :  { %9617 = vmatmul.mubr.msk.f32.vlgmr.msra.gmra.mxu1 %vm85_vm0, %v4514_v7  ;;  %9630 = vmatprep.subr.mxu1 %v4770_v54 }
 0x757   :  { %9638 = vmatprep.mubr.msk.f32.mxu1 %vm85_vm0, %v11551_v51  ;;  %9631 = vmatpush3.msra.mxu1 %v4770_v54 }
 0x758   :  { %9632 = vmatprep.subr.mxu1 %v4769_v38  ;;  %9623 = vmatprep.subr.mxu0 %v4772_v60 }
 0x759   :  { %9633 = vmatpush3.msra.mxu1 %v4769_v38  ;;  %9624 = vmatpush3.msra.mxu0 %v4772_v60  ;;  %v8439_v60 = vld [vmem:[%s12292_s9 + $0x50] sm:$0xff] }
 0x75a   :  { %9634 = vmatprep.subr.mxu1 %v4768_v29  ;;  %9625 = vmatprep.subr.mxu0 %v4771_v11 }
 0x75b   :  { %9635 = vmatpush3.msra.mxu1 %v4768_v29  ;;  %9626 = vmatpush3.msra.mxu0 %v4771_v11  ;;  %v8438_v11 = vld [vmem:[%s12292_s9 + $0x48] sm:$0xff] }
 0x75c   :  { %9636 = vmatprep.subr.mxu1 %v4767_v30  ;;  %9641 = vmatprep.subr.mxu0 %v11588_v0 }
 0x75d   :  { %9637 = vmatpush3.msra.mxu1 %v4767_v30 }
 0x75e   :  { %9652 = vmatprep.subr.mxu1 %v11570_v31 }
 0x800   :  { %v4322_v48 = vpop.f32.mrf.mxu0  ;;  %v4396_v34 = vpop.f32.mrf.mxu1 }
 0x801   :  { %v4405_v52 = vrot.slane %v4322_v48, 2  ;;  %v4415_v14 = vrot.slane %v4396_v34, 2  ;;  %v4766_v34 = vld [vmem:[#allocation3 + $0x8] sm:$0xff] }
 0x802   :  { %v9563_v5 = vpop.f32.mrf.mxu0  ;;  %v9574_v6 = vpop.f32.mrf.mxu1 }
 0x803   :  { %v4407_v18 = vadd.f32 %v4405_v52, %v10786_v55  ;;  %v4417_v37 = vadd.f32 %v4415_v14, %v10788_v56  ;;  %v8429_v52 = vld [vmem:[%s12293_s10 + $0x30] sm:$0xff]  ;;  %v8437_v5 = vld [vmem:[%s12292_s9 + $0x40] sm:$0xff] }
 0x804   :  { %v8427_v6 = vld [vmem:[%s12293_s10 + $0x20] sm:$0xff] }
 0x805   :  { %v8402_v8 = vmul.f32 -1.442695, %v4407_v18  ;;  %v8403_v55 = vmul.f32 -1.442695, %v4417_v37  ;;  %v11650_v18 = vld [vmem:[%s12294_s11 + $0x38] sm:$0xff]  ;;  %v11682_v14 = vld [vmem:[%s12294_s11 + $0x20] sm:$0xff] }
 0x806   :  { %v11731_v37 = vld [vmem:[%s12294_s11 + $0x58] sm:$0xff] }
 0x807   :  { %10213 = vpow2.f32 %v8402_v8  ;;  %v11662_v8 = vld [vmem:[%s12294_s11 + $0x30] sm:$0xff] }
 0x808   :  { %v4490_v15 = vpop.f32.mrf.mxu0 }
 0x809   :  { %v4491_v40 = vadd.f32 %v11310_v24, %v4490_v15  ;;  %v8443_v15 = vld [vmem:[%s12293_s10 + $0x50] sm:$0xff] }
 0x80a   :  { %v9585_v16 = vpop.f32.mrf.mxu0 }
 0x80b   :  { %v4495_v43 = vrot.slane %v4491_v40, 2  ;;  %v11672_v16 = vld [vmem:[%s12294_s11 + $0x28] sm:$0xff]  ;;  %v8422_v40 = vld [vmem:[%s12295_s12] ss:$0 sm:$0xff] }
 0x80e   :  { %v4583_v19 = vpop.f32.mrf.mxu1 }
 0x80f   :  { %v4665_v62 = vadd.f32 %v4583_v19, %v10798_v1  ;;  %v8442_v19 = vld [vmem:[%s12293_s10 + $0x48] sm:$0xff] }
 0x810   :  { %v9596_v23 = vpop.f32.mrf.mxu1  ;;  %v4657_v3 = vpop.f32.mrf.mxu0 }
 0x811   :  { %v8415_v49 = vmul.f32 -1.442695, %v4665_v62  ;;  %v4672_v41 = vadd.f32 %v4657_v3, %v10806_v9  ;;  %v8441_v62 = vld [vmem:[%s12293_s10 + $0x40] sm:$0xff]  ;;  %v11696_v23 = vld [vmem:[%s12294_s11 + $0x18] sm:$0xff]  ;;  %v11704_v3 = vld [vmem:[%s12294_s11 + $0x10] sm:$0xff] }
 0x812   :  { %v9607_v36 = vpop.f32.mrf.mxu0 }
 0x813   :  { %10215 = vpow2.f32 %v8415_v49  ;;  %v8416_v44 = vmul.f32 -1.442695, %v4672_v41  ;;  %v11713_v49 = vld [vmem:[%s12294_s11 + $0x8] sm:$0xff]  ;;  %v11722_v36 = vld [vmem:[%s12294_s11] sm:$0xff] }
 0x814   :  { %v10214_v21 = vpop.eup %10213 }
 0x815   :  { %v4411_v39 = vadd.f32 1.0, %v10214_v21  ;;  %v11741_v21 = vld [vmem:[%s12294_s11 + $0x50] sm:$0xff] }
 0x816   :  { %v4745_v27 = vpop.f32.mrf.mxu1 }
 0x817   :  { %10217 = vrcp.f32 %v4411_v39  ;;  %v4746_v59 = vadd.f32 %v11317_v20, %v4745_v27  ;;  %v11750_v39 = vld [vmem:[%s12294_s11 + $0x48] sm:$0xff]  ;;  %v11760_v27 = vld [vmem:[%s12294_s11 + $0x40] sm:$0xff] }
 0x818   :  { %v9618_v4 = vpop.f32.mrf.mxu1  ;;  %10219 = vpow2.f32 %v8403_v55 }
 0x820   :  { %v10216_v42 = vpop.eup %10215 }
 0x821   :  { %v4669_v1 = vadd.f32 1.0, %v10216_v42 }
 0x823   :  { %10221 = vrcp.f32 %v4669_v1 }
 0x824   :  { %v10218_v45 = vpop.eup %10217  ;;  %10223 = vpow2.f32 %v8416_v44 }
 0x825   :  { %v4497_v46 = vmul.f32 %v10218_v45, %v4495_v43  ;;  %v10220_v50 = vpop.eup %10219 }
 0x826   :  { %v4421_v53 = vadd.f32 1.0, %v10220_v50 }
 0x827   :  { %v4498_v56 = vadd.f32 %v4497_v46, %v10796_v63 }
 0x829   :  { %10225 = vtanh.f32 %v4498_v56  ;;  %v8436_v56 = vld [vmem:[%s12295_s12 + $0x1] ss:$0 sm:$0xff] }
 0x82a   :  { %10227 = vrcp.f32 %v4421_v53 }
 0x830   :  { %v10222_v2 = vpop.eup %10221 }
 0x831   :  { %v4749_v24 = vmul.f32 %v10222_v2, %v4746_v59  ;;  %v10224_v26 = vpop.eup %10223 }
 0x832   :  { %v4676_v35 = vadd.f32 1.0, %v10224_v26 }
 0x833   :  { %v4750_v9 = vadd.f32 %v4749_v24, %v10808_v10 }
 0x835   :  { %10229 = vtanh.f32 %v4750_v9 }
 0x836   :  { %v10226_v47 = vpop.eup %10225  ;;  %10231 = vrcp.f32 %v4676_v35 }
 0x837   :  { %v4501_v25 = vrot.slane %v10226_v47, 2  ;;  %v10228_v63 = vpop.eup %10227 }
 0x839   :  { %v4503_v58 = vsub.f32 %v11496_v57, %v4501_v25  ;;  %v8425_v57 = vld [vmem:[%s12292_s9 + $0x30] sm:$0xff] }
 0x83b   :  { %v4505_v22 = vrot.slane %v4503_v58, 6 }
 0x83d   :  { %v4507_v17 = vmul.f32 %v10228_v63, %v4505_v22 }
 0x83f   :  { %v11600_v12 = vadd.f32 %v10226_v47, %v4507_v17  ;;  %v8450_v47 = vld [vmem:[%s12295_s12 + $0x2] ss:$0 sm:$0xff] }
 0x841   :  { %4761 = vst.msk [vmem:[#allocation2 + $0x8] sm:$0xc0] %vm1121_vm3, %v11600_v12 }
 0x842   :  { %v10230_v20 = vpop.eup %10229 }
 0x843   :  { %v4753_v7 = vrot.slane %v10230_v20, 6  ;;  %v10232_v38 = vpop.eup %10231 }
 0x845   :  { %v4755_v10 = vsub.f32 %v11526_v61, %v4753_v7 }
 0x847   :  { %v4757_v54 = vrot.slane %v4755_v10, 2 }
 0x848   :  { %v4764_v29 = vld [vmem:[#allocation2 + $0x8] sm:$0xff] }
 0x849   :  { %v4759_v30 = vmul.f32 %v10232_v38, %v4757_v54  ;;  %9639 = vmatmul.mubr.msk.f32.vlgmr.msra.gmra.mxu1 %vm85_vm0, %v4764_v29 }
 0x84a   :  { %9653 = vmatpush3.msra.mxu1 %v11570_v31  ;;  %9660 = vmatprep.mubr.msk.f32.mxu1 %vm85_vm0, %v11551_v51  ;;  %v8440_v31 = vld [vmem:[%s12292_s9 + $0x58] sm:$0xff] }
 0x84b   :  { %v4760_v61 = vadd.f32 %v10230_v20, %v4759_v30  ;;  %9654 = vmatprep.subr.mxu1 %v8425_v57 }
 0x84c   :  { %9655 = vmatpush3.msra.mxu1 %v8425_v57 }
 0x84d   :  { %4762 = vst.msk [vmem:[#allocation3] sm:$0x3] %vm1119_vm2, %v4760_v61  ;;  %9656 = vmatprep.subr.mxu1 %v8424_v32 }
 0x84e   :  { %9657 = vmatpush3.msra.mxu1 %v8424_v32 }
 0x84f   :  { %9658 = vmatprep.subr.mxu1 %v8423_v33 }
 0x850   :  { %9659 = vmatpush3.msra.mxu1 %v8423_v33 }
 0x851   :  { %9661 = vmatmul.mubr.msk.f32.vlgmr.msra.gmra.mxu1 %vm85_vm0, %v4764_v29  ;;  %9674 = vmatprep.subr.mxu1 %v8440_v31 }
 0x852   :  { %9675 = vmatpush3.msra.mxu1 %v8440_v31  ;;  %9682 = vmatprep.mubr.msk.f32.mxu1 %vm85_vm0, %v11551_v51  ;;  %v8428_v51 = vld [vmem:[%s12293_s10 + $0x28] sm:$0xff] }
 0x853   :  { %9676 = vmatprep.subr.mxu1 %v8439_v60 }
 0x854   :  { %v4765_v48 = vld [vmem:[#allocation3] sm:$0xff]  ;;  %9677 = vmatpush3.msra.mxu1 %v8439_v60  ;;  %v11802_v60 = vld [vmem:[%s12296_s13] ss:$0 sm:$0xff] }
 0x855   :  { %9627 = vmatprep.mubr.msk.f32.mxu0 %vm85_vm0, %v4765_v48  ;;  %9678 = vmatprep.subr.mxu1 %v8438_v11 }
 0x856   :  { %9628 = vmatmul.mubr.msk.f32.vlgmr.msra.gmra.mxu0 %vm85_vm0, %v4766_v34  ;;  %9679 = vmatpush3.msra.mxu1 %v8438_v11 }
 0x857   :  { %9642 = vmatpush3.msra.mxu0 %v11588_v0  ;;  %9649 = vmatprep.mubr.msk.f32.mxu0 %vm85_vm0, %v4765_v48  ;;  %v8444_v0 = vld [vmem:[%s12293_s10 + $0x58] sm:$0xff] }
 0x858   :  { %9643 = vmatprep.subr.mxu0 %v8429_v52  ;;  %9680 = vmatprep.subr.mxu1 %v8437_v5 }
 0x859   :  { %9644 = vmatpush3.msra.mxu0 %v8429_v52  ;;  %9681 = vmatpush3.msra.mxu1 %v8437_v5 }
 0x85a   :  { %9645 = vmatprep.subr.mxu0 %v8428_v51  ;;  %9683 = vmatmul.mubr.msk.f32.vlgmr.msra.gmra.mxu1 %vm85_vm0, %v4764_v29 }
 0x85b   :  { %9646 = vmatpush3.msra.mxu0 %v8428_v51  ;;  %9696 = vmatprep.subr.mxu1 %v10348_v28 }
 0x85c   :  { %9647 = vmatprep.subr.mxu0 %v8427_v6  ;;  %9697 = vmatpush3.msra.mxu1 %v11650_v18 }
 0x85d   :  { %9648 = vmatpush3.msra.mxu0 %v8427_v6  ;;  %9698 = vmatprep.subr.mxu1 %v10348_v28 }
 0x85e   :  { %9650 = vmatmul.mubr.msk.f32.vlgmr.msra.gmra.mxu0 %vm85_vm0, %v4766_v34  ;;  %9663 = vmatprep.subr.mxu0 %v8444_v0 }
 0x85f   :  { %9664 = vmatpush3.msra.mxu0 %v8444_v0  ;;  %9671 = vmatprep.mubr.msk.f32.mxu0 %vm85_vm0, %v4765_v48 }
 0x860   :  { %9699 = vmatpush3.msra.mxu1 %v11662_v8  ;;  %9665 = vmatprep.subr.mxu0 %v8443_v15 }
 0x861   :  { %9700 = vmatprep.subr.mxu1 %v10348_v28  ;;  %9666 = vmatpush3.msra.mxu0 %v8443_v15 }
 0x862   :  { %9701 = vmatpush3.msra.mxu1 %v11672_v16  ;;  %9667 = vmatprep.subr.mxu0 %v8442_v19 }
 0x863   :  { %9702 = vmatprep.subr.mxu1 %v10348_v28  ;;  %9668 = vmatpush3.msra.mxu0 %v8442_v19 }
 0x864   :  { %9703 = vmatpush3.msra.mxu1 %v11682_v14  ;;  %9704 = vmatprep.mubr.msk.f32.mxu1 %vm10349_vm1, %v10348_v28 }
 0x865   :  { %9669 = vmatprep.subr.mxu0 %v8441_v62  ;;  %9705 = vmatmul.mubr.f32.vlgmr.msra.gmra.mxu1 %v10348_v28 }
 0x866   :  { %9670 = vmatpush3.msra.mxu0 %v8441_v62  ;;  %9718 = vmatprep.subr.mxu1 %v10348_v28 }
 0x867   :  { %9672 = vmatmul.mubr.msk.f32.vlgmr.msra.gmra.mxu0 %vm85_vm0, %v4766_v34  ;;  %9685 = vmatprep.subr.mxu0 %v10348_v28 }
 0x868   :  { %9686 = vmatpush3.msra.mxu0 %v11696_v23  ;;  %9693 = vmatprep.mubr.msk.f32.mxu0 %vm10349_vm1, %v10348_v28 }
 0x869   :  { %9687 = vmatprep.subr.mxu0 %v10348_v28  ;;  %9719 = vmatpush3.msra.mxu1 %v11696_v23 }
 0x86a   :  { %9688 = vmatpush3.msra.mxu0 %v11704_v3  ;;  %9720 = vmatprep.subr.mxu1 %v10348_v28 }
 0x86b   :  { %9689 = vmatprep.subr.mxu0 %v10348_v28  ;;  %9721 = vmatpush3.msra.mxu1 %v11704_v3 }
 0x86c   :  { %9690 = vmatpush3.msra.mxu0 %v11713_v49  ;;  %9722 = vmatprep.subr.mxu1 %v10348_v28 }
 0x86d   :  { %9691 = vmatprep.subr.mxu0 %v10348_v28  ;;  %9723 = vmatpush3.msra.mxu1 %v11713_v49 }
 0x86e   :  { %9692 = vmatpush3.msra.mxu0 %v11722_v36  ;;  %9724 = vmatprep.subr.mxu1 %v10348_v28 }
 0x86f   :  { %9694 = vmatmul.mubr.f32.vlgmr.msra.gmra.mxu0 %v10348_v28  ;;  %9707 = vmatprep.subr.mxu0 %v10348_v28 }
 0x870   :  { %9708 = vmatpush3.msra.mxu0 %v11731_v37  ;;  %9715 = vmatprep.mubr.msk.f32.mxu0 %vm10349_vm1, %v10348_v28 }
 0x871   :  { %9709 = vmatprep.subr.mxu0 %v10348_v28  ;;  %9725 = vmatpush3.msra.mxu1 %v11722_v36 }
 0x872   :  { %9710 = vmatpush3.msra.mxu0 %v11741_v21  ;;  %9726 = vmatprep.mubr.msk.f32.mxu1 %vm10349_vm1, %v10348_v28 }
 0x873   :  { %9711 = vmatprep.subr.mxu0 %v10348_v28  ;;  %9740 = vmatprep.subr.mxu1 %v10348_v28 }
 0x874   :  { %9712 = vmatpush3.msra.mxu0 %v11750_v39 }
 0x875   :  { %9713 = vmatprep.subr.mxu0 %v10348_v28 }
 0x876   :  { %9714 = vmatpush3.msra.mxu0 %v11760_v27 }
 0x877   :  { %9716 = vmatmul.mubr.f32.vlgmr.msra.gmra.mxu0 %v10348_v28  ;;  %9729 = vmatprep.subr.mxu0 %v10348_v28 }
 0x878   :  { %9730 = vmatpush3.msra.mxu0 %v11650_v18  ;;  %9737 = vmatprep.mubr.msk.f32.mxu0 %vm10349_vm1, %v10348_v28 }
 0x879   :  { %9731 = vmatprep.subr.mxu0 %v10348_v28 }
 0x87a   :  { %9732 = vmatpush3.msra.mxu0 %v11662_v8 }
 0x87b   :  { %9733 = vmatprep.subr.mxu0 %v10348_v28 }
 0x87c   :  { %9734 = vmatpush3.msra.mxu0 %v11672_v16 }
 0x87d   :  { %9735 = vmatprep.subr.mxu0 %v10348_v28 }
 0x87e   :  { %9736 = vmatpush3.msra.mxu0 %v11682_v14 }
 0x87f   :  { %9751 = vmatprep.subr.mxu0 %v10348_v28 }
 0x909   :  { %v9640_v55 = vpop.f32.mrf.mxu1 }
 0x90b   :  { %v4928_v41 = vpop.f32.mrf.mxu1 }
 0x911   :  { %v9662_v1 = vpop.f32.mrf.mxu1 }
 0x913   :  { %v5097_v45 = vpop.f32.mrf.mxu1 }
 0x916   :  { %v9629_v4 = vpop.f32.mrf.mxu0 }
 0x917   :  { %v4934_v42 = vadd.f32 %v9640_v55, %v9629_v4 }
 0x918   :  { %v4847_v44 = vpop.f32.mrf.mxu0 }
 0x919   :  { %v11781_v43 = vadd.f32 %v8422_v40, %v4934_v42  ;;  %v4929_v58 = vadd.f32 %v4928_v41, %v4847_v44 }
 0x91a   :  { %v9684_v50 = vpop.f32.mrf.mxu1 }
 0x91b   :  { %v11793_v17 = vadd.f32 %v8422_v40, %v4929_v58 }
 0x91c   :  { %v5267_v2 = vpop.f32.mrf.mxu1 }
 0x91e   :  { %v9651_v46 = vpop.f32.mrf.mxu0 }
 0x91f   :  { %v5103_v53 = vadd.f32 %v9662_v1, %v9651_v46 }
 0x920   :  { %v5022_v24 = vpop.f32.mrf.mxu0 }
 0x921   :  { %v11786_v59 = vadd.f32 %v8436_v56, %v5103_v53  ;;  %v5098_v38 = vadd.f32 %v5097_v45, %v5022_v24 }
 0x923   :  { %v11796_v29 = vadd.f32 %v8436_v56, %v5098_v38 }
 0x925   :  { %v5438_v9 = vpop.f32.mrf.mxu1 }
 0x926   :  { %v5454_v32 = vadd.f32 %v5438_v9, %v11796_v29 }
 0x927   :  { %v9673_v26 = vpop.f32.mrf.mxu0  ;;  %v9706_v25 = vpop.f32.mrf.mxu1 }
 0x928   :  { %v5273_v35 = vadd.f32 %v9684_v50, %v9673_v26  ;;  %v8461_v61 = vmul.f32 -1.442695, %v5454_v32 }
 0x929   :  { %v5192_v63 = vpop.f32.mrf.mxu0 }
 0x92a   :  { %v11791_v22 = vadd.f32 %v8450_v47, %v5273_v35  ;;  %v5268_v11 = vadd.f32 %v5267_v2, %v5192_v63 }
 0x92c   :  { %v11805_v5 = vadd.f32 %v8450_v47, %v5268_v11 }
 0x92f   :  { %v5363_v20 = vpop.f32.mrf.mxu0 }
 0x930   :  { %v5447_v7 = vadd.f32 %v5363_v20, %v11793_v17 }
 0x931   :  { %v9695_v10 = vpop.f32.mrf.mxu0 }
 0x932   :  { %v8460_v54 = vmul.f32 -1.442695, %v5447_v7 }
 0x934   :  { %10233 = vpow2.f32 %v8460_v54 }
 0x935   :  { %10235 = vpow2.f32 %v8461_v61 }
 0x937   :  { %v5527_v57 = vpop.f32.mrf.mxu0 }
 0x938   :  { %v5528_v48 = vadd.f32 %v11802_v60, %v5527_v57 }
 0x939   :  { %v9717_v30 = vpop.f32.mrf.mxu0 }
 0x941   :  { %v10234_v33 = vpop.eup %10233 }
 0x942   :  { %v5451_v31 = vadd.f32 1.0, %v10234_v33  ;;  %v10236_v34 = vpop.eup %10235 }
 0x943   :  { %v5458_v6 = vadd.f32 1.0, %v10236_v34 }
 0x944   :  { %10237 = vrcp.f32 %v5451_v31 }
 0x951   :  { %v10238_v52 = vpop.eup %10237 }
 0x952   :  { %v5531_v51 = vmul.f32 %v10238_v52, %v5528_v48 }
 0x954   :  { %v5532_v0 = vadd.f32 %v5531_v51, %v11805_v5 }
 0x956   :  { %10239 = vtanh.f32 %v5532_v0 }
 0x957   :  { %10241 = vrcp.f32 %v5458_v6 }
 0x963   :  { %v10240_v15 = vpop.eup %10239 }
 0x964   :  { %v5534_v19 = vsub.f32 0.0, %v10240_v15  ;;  %v10242_v62 = vpop.eup %10241 }
 0x966   :  { %v5535_v55 = vmul.f32 %v10242_v62, %v5534_v19 }
 0x968   :  { %v5536_v4 = vadd.f32 %v10240_v15, %v5535_v55 }
 0x96a   :  { %9727 = vmatmul.mubr.msk.f32.vlgmr.msra.gmra.mxu1 %vm85_vm0, %v5536_v4  ;;  %9738 = vmatmul.mubr.msk.f32.vlgmr.msra.gmra.mxu0 %vm85_vm0, %v5536_v4 }
 0x96b   :  { %9741 = vmatpush3.msra.mxu1 %v11731_v37  ;;  %9748 = vmatprep.mubr.msk.f32.mxu1 %vm10349_vm1, %v10348_v28 }
 0x96c   :  { %9742 = vmatprep.subr.mxu1 %v10348_v28  ;;  %9752 = vmatpush3.msra.mxu0 %v11696_v23 }
 0x96d   :  { %9743 = vmatpush3.msra.mxu1 %v11741_v21  ;;  %9753 = vmatprep.subr.mxu0 %v10348_v28 }
 0x96e   :  { %9744 = vmatprep.subr.mxu1 %v10348_v28  ;;  %9754 = vmatpush3.msra.mxu0 %v11704_v3 }
 0x96f   :  { %9745 = vmatpush3.msra.mxu1 %v11750_v39  ;;  %9755 = vmatprep.subr.mxu0 %v10348_v28 }
 0x970   :  { %9746 = vmatprep.subr.mxu1 %v10348_v28  ;;  %9756 = vmatpush3.msra.mxu0 %v11713_v49 }
 0x971   :  { %9747 = vmatpush3.msra.mxu1 %v11760_v27  ;;  %9757 = vmatprep.subr.mxu0 %v10348_v28 }
 0x972   :  { %9749 = vmatmul.mubr.msk.f32.vlgmr.msra.gmra.mxu1 %vm85_vm0, %v5536_v4  ;;  %9762 = vmatprep.subr.mxu1 %v10348_v28 }
 0x973   :  { %9763 = vmatpush3.msra.mxu1 %v11650_v18  ;;  %9758 = vmatpush3.msra.mxu0 %v11722_v36 }
 0x974   :  { %9764 = vmatprep.subr.mxu1 %v10348_v28  ;;  %9759 = vmatprep.mubr.msk.f32.mxu0 %vm10349_vm1, %v10348_v28 }
 0x975   :  { %9765 = vmatpush3.msra.mxu1 %v11662_v8  ;;  %9770 = vmatprep.mubr.msk.f32.mxu1 %vm10349_vm1, %v10348_v28 }
 0x976   :  { %9766 = vmatprep.subr.mxu1 %v10348_v28  ;;  %9773 = vmatprep.subr.mxu0 %v10348_v28 }
 0x977   :  { %9767 = vmatpush3.msra.mxu1 %v11672_v16 }
 0x978   :  { %9768 = vmatprep.subr.mxu1 %v10348_v28 }
 0x979   :  { %9769 = vmatpush3.msra.mxu1 %v11682_v14 }
 0x97a   :  { %9784 = vmatprep.subr.mxu1 %v10348_v28 }
 0xa2a   :  { %v5606_v40 = vpop.f32.mrf.mxu1  ;;  %v5676_v41 = vpop.f32.mrf.mxu0 }
 0xa2b   :  { %v5681_v42 = vrot.slane %v5606_v40, 6  ;;  %v5691_v53 = vrot.slane %v5676_v41, 6 }
 0xa2c   :  { %v9728_v1 = vpop.f32.mrf.mxu1  ;;  %v9739_v44 = vpop.f32.mrf.mxu0 }
 0xa2d   :  { %v5683_v45 = vadd.f32 %v5681_v42, %v11793_v17  ;;  %v5693_v2 = vadd.f32 %v5691_v53, %v11796_v29 }
 0xa2f   :  { %v8464_v46 = vmul.f32 -1.442695, %v5683_v45  ;;  %v8465_v26 = vmul.f32 -1.442695, %v5693_v2 }
 0xa31   :  { %10243 = vpow2.f32 %v8464_v46 }
 0xa32   :  { %v5766_v56 = vpop.f32.mrf.mxu1 }
 0xa33   :  { %v5767_v47 = vadd.f32 %v11802_v60, %v5766_v56 }
 0xa34   :  { %v9750_v50 = vpop.f32.mrf.mxu1 }
 0xa35   :  { %v5771_v25 = vrot.slane %v5767_v47, 6 }
 0xa3e   :  { %v10244_v24 = vpop.eup %10243 }
 0xa3f   :  { %v5687_v9 = vadd.f32 1.0, %v10244_v24 }
 0xa41   :  { %10245 = vrcp.f32 %v5687_v9 }
 0xa42   :  { %10247 = vpow2.f32 %v8465_v26 }
 0xa4e   :  { %v10246_v35 = vpop.eup %10245 }
 0xa4f   :  { %v5773_v58 = vmul.f32 %v10246_v35, %v5771_v25  ;;  %v10248_v20 = vpop.eup %10247 }
 0xa50   :  { %v5697_v7 = vadd.f32 1.0, %v10248_v20 }
 0xa51   :  { %v5774_v63 = vadd.f32 %v5773_v58, %v11805_v5 }
 0xa53   :  { %10249 = vtanh.f32 %v5774_v63 }
 0xa54   :  { %10251 = vrcp.f32 %v5697_v7 }
 0xa60   :  { %v10250_v10 = vpop.eup %10249 }
 0xa61   :  { %v5777_v54 = vrot.slane %v10250_v10, 2  ;;  %v10252_v30 = vpop.eup %10251 }
 0xa63   :  { %v5779_v38 = vsub.f32 %v5536_v4, %v5777_v54 }
 0xa65   :  { %v5781_v57 = vrot.slane %v5779_v38, 6 }
 0xa67   :  { %v5783_v32 = vmul.f32 %v10252_v30, %v5781_v57 }
 0xa69   :  { %v5784_v61 = vadd.f32 %v10250_v10, %v5783_v32 }
 0xa6b   :  { %v5786_v33 = vrot.slane %v5784_v61, 2 }
 0xa6d   :  { %9760 = vmatmul.mubr.msk.f32.vlgmr.msra.gmra.mxu0 %vm85_vm0, %v5786_v33  ;;  %9771 = vmatmul.mubr.msk.f32.vlgmr.msra.gmra.mxu1 %vm85_vm0, %v5786_v33 }
 0xa6e   :  { %9774 = vmatpush3.msra.mxu0 %v11731_v37  ;;  %9781 = vmatprep.mubr.msk.f32.mxu0 %vm10349_vm1, %v10348_v28 }
 0xa6f   :  { %9775 = vmatprep.subr.mxu0 %v10348_v28  ;;  %9785 = vmatpush3.msra.mxu1 %v11696_v23 }
 0xa70   :  { %9776 = vmatpush3.msra.mxu0 %v11741_v21  ;;  %9786 = vmatprep.subr.mxu1 %v10348_v28 }
 0xa71   :  { %9777 = vmatprep.subr.mxu0 %v10348_v28  ;;  %9787 = vmatpush3.msra.mxu1 %v11704_v3 }
 0xa72   :  { %9778 = vmatpush3.msra.mxu0 %v11750_v39  ;;  %9788 = vmatprep.subr.mxu1 %v10348_v28 }
 0xa73   :  { %9779 = vmatprep.subr.mxu0 %v10348_v28  ;;  %9789 = vmatpush3.msra.mxu1 %v11713_v49 }
 0xa74   :  { %9780 = vmatpush3.msra.mxu0 %v11760_v27  ;;  %9790 = vmatprep.subr.mxu1 %v10348_v28 }
 0xa75   :  { %9782 = vmatmul.mubr.msk.f32.vlgmr.msra.gmra.mxu0 %vm85_vm0, %v5786_v33  ;;  %9795 = vmatprep.subr.mxu0 %v10348_v28 }
 0xa76   :  { %9796 = vmatpush3.msra.mxu0 %v11650_v18  ;;  %9791 = vmatpush3.msra.mxu1 %v11722_v36 }
 0xa77   :  { %9797 = vmatprep.subr.mxu0 %v10348_v28  ;;  %9792 = vmatprep.mubr.msk.f32.mxu1 %vm10349_vm1, %v10348_v28 }
 0xa78   :  { %9798 = vmatpush3.msra.mxu0 %v11662_v8  ;;  %9803 = vmatprep.mubr.msk.f32.mxu0 %vm10349_vm1, %v10348_v28 }
 0xa79   :  { %9799 = vmatprep.subr.mxu0 %v10348_v28  ;;  %9806 = vmatprep.subr.mxu1 %v10348_v28 }
 0xa7a   :  { %9800 = vmatpush3.msra.mxu0 %v11672_v16 }
 0xa7b   :  { %9801 = vmatprep.subr.mxu0 %v10348_v28 }
 0xa7c   :  { %9802 = vmatpush3.msra.mxu0 %v11682_v14 }
 0xa7d   :  { %9817 = vmatprep.subr.mxu0 %v10348_v28 }
 0xb2d   :  { %v5855_v31 = vpop.f32.mrf.mxu0  ;;  %v5925_v11 = vpop.f32.mrf.mxu1 }
 0xb2e   :  { %v5930_v48 = vrot.slane %v5855_v31, 4  ;;  %v5940_v19 = vrot.slane %v5925_v11, 4 }
 0xb2f   :  { %v9761_v34 = vpop.f32.mrf.mxu0  ;;  %v9772_v52 = vpop.f32.mrf.mxu1 }
 0xb30   :  { %v5932_v51 = vadd.f32 %v5930_v48, %v11793_v17  ;;  %v5942_v62 = vadd.f32 %v5940_v19, %v11796_v29 }
 0xb32   :  { %v8469_v6 = vmul.f32 -1.442695, %v5932_v51  ;;  %v8470_v40 = vmul.f32 -1.442695, %v5942_v62 }
 0xb34   :  { %10253 = vpow2.f32 %v8469_v6 }
 0xb35   :  { %v6015_v0 = vpop.f32.mrf.mxu0 }
 0xb36   :  { %v6016_v41 = vadd.f32 %v11802_v60, %v6015_v0 }
 0xb37   :  { %v9783_v15 = vpop.f32.mrf.mxu0 }
 0xb38   :  { %v6020_v42 = vrot.slane %v6016_v41, 4 }
 0xb41   :  { %v10254_v55 = vpop.eup %10253 }
 0xb42   :  { %v5936_v4 = vadd.f32 1.0, %v10254_v55 }
 0xb44   :  { %10255 = vrcp.f32 %v5936_v4 }
 0xb45   :  { %10257 = vpow2.f32 %v8470_v40 }
 0xb51   :  { %v10256_v1 = vpop.eup %10255 }
 0xb52   :  { %v6022_v44 = vmul.f32 %v10256_v1, %v6020_v42  ;;  %v10258_v46 = vpop.eup %10257 }
 0xb53   :  { %v5946_v56 = vadd.f32 1.0, %v10258_v46 }
 0xb54   :  { %v6023_v45 = vadd.f32 %v6022_v44, %v11805_v5 }
 0xb56   :  { %10259 = vtanh.f32 %v6023_v45 }
 0xb57   :  { %10261 = vrcp.f32 %v5946_v56 }
 0xb63   :  { %v10260_v50 = vpop.eup %10259 }
 0xb64   :  { %v6026_v53 = vrot.slane %v10260_v50, 2  ;;  %v10262_v9 = vpop.eup %10261 }
 0xb66   :  { %v6028_v2 = vsub.f32 %v5784_v61, %v6026_v53 }
 0xb68   :  { %v6030_v24 = vrot.slane %v6028_v2, 6 }
 0xb6a   :  { %v6032_v26 = vmul.f32 %v10262_v9, %v6030_v24 }
 0xb6c   :  { %v6033_v47 = vadd.f32 %v10260_v50, %v6032_v26 }
 0xb6e   :  { %v6035_v25 = vrot.slane %v6033_v47, 4 }
 0xb70   :  { %9793 = vmatmul.mubr.msk.f32.vlgmr.msra.gmra.mxu1 %vm85_vm0, %v6035_v25  ;;  %9804 = vmatmul.mubr.msk.f32.vlgmr.msra.gmra.mxu0 %vm85_vm0, %v6035_v25 }
 0xb71   :  { %9807 = vmatpush3.msra.mxu1 %v11731_v37  ;;  %9814 = vmatprep.mubr.msk.f32.mxu1 %vm10349_vm1, %v10348_v28 }
 0xb72   :  { %9808 = vmatprep.subr.mxu1 %v10348_v28  ;;  %9818 = vmatpush3.msra.mxu0 %v11696_v23 }
 0xb73   :  { %9809 = vmatpush3.msra.mxu1 %v11741_v21  ;;  %9819 = vmatprep.subr.mxu0 %v10348_v28 }
 0xb74   :  { %9810 = vmatprep.subr.mxu1 %v10348_v28  ;;  %9820 = vmatpush3.msra.mxu0 %v11704_v3 }
 0xb75   :  { %9811 = vmatpush3.msra.mxu1 %v11750_v39  ;;  %9821 = vmatprep.subr.mxu0 %v10348_v28 }
 0xb76   :  { %9812 = vmatprep.subr.mxu1 %v10348_v28  ;;  %9822 = vmatpush3.msra.mxu0 %v11713_v49 }
 0xb77   :  { %9813 = vmatpush3.msra.mxu1 %v11760_v27  ;;  %9823 = vmatprep.subr.mxu0 %v10348_v28 }
 0xb78   :  { %9815 = vmatmul.mubr.msk.f32.vlgmr.msra.gmra.mxu1 %vm85_vm0, %v6035_v25  ;;  %9828 = vmatprep.subr.mxu1 %v10348_v28 }
 0xb79   :  { %9829 = vmatpush3.msra.mxu1 %v11650_v18  ;;  %9824 = vmatpush3.msra.mxu0 %v11722_v36 }
 0xb7a   :  { %9830 = vmatprep.subr.mxu1 %v10348_v28  ;;  %9825 = vmatprep.mubr.msk.f32.mxu0 %vm10349_vm1, %v10348_v28 }
 0xb7b   :  { %9831 = vmatpush3.msra.mxu1 %v11662_v8  ;;  %9836 = vmatprep.mubr.msk.f32.mxu1 %vm10349_vm1, %v10348_v28 }
 0xb7c   :  { %9832 = vmatprep.subr.mxu1 %v10348_v28  ;;  %9839 = vmatprep.subr.mxu0 %v10348_v28 }
 0xb7d   :  { %9833 = vmatpush3.msra.mxu1 %v11672_v16 }
 0xb7e   :  { %9834 = vmatprep.subr.mxu1 %v10348_v28 }
 0xb7f   :  { %9835 = vmatpush3.msra.mxu1 %v11682_v14 }
 0xb80   :  { %9850 = vmatprep.subr.mxu1 %v10348_v28 }
 0xc30   :  { %v6104_v35 = vpop.f32.mrf.mxu1  ;;  %v6174_v58 = vpop.f32.mrf.mxu0 }
 0xc31   :  { %v6179_v63 = vrot.slane %v6104_v35, 2  ;;  %v6189_v30 = vrot.slane %v6174_v58, 2 }
 0xc32   :  { %v9794_v20 = vpop.f32.mrf.mxu1  ;;  %v9805_v7 = vpop.f32.mrf.mxu0 }
 0xc33   :  { %v6181_v10 = vadd.f32 %v6179_v63, %v11793_v17  ;;  %v6191_v32 = vadd.f32 %v6189_v30, %v11796_v29 }
 0xc35   :  { %v8474_v54 = vmul.f32 -1.442695, %v6181_v10  ;;  %v8475_v31 = vmul.f32 -1.442695, %v6191_v32 }
 0xc37   :  { %10263 = vpow2.f32 %v8474_v54 }
 0xc38   :  { %v6264_v38 = vpop.f32.mrf.mxu1 }
 0xc39   :  { %v6265_v11 = vadd.f32 %v11802_v60, %v6264_v38 }
 0xc3a   :  { %v9816_v57 = vpop.f32.mrf.mxu1 }
 0xc3b   :  { %v6269_v48 = vrot.slane %v6265_v11, 2 }
 0xc44   :  { %v10264_v61 = vpop.eup %10263 }
 0xc45   :  { %v6185_v33 = vadd.f32 1.0, %v10264_v61 }
 0xc47   :  { %10265 = vrcp.f32 %v6185_v33 }
 0xc48   :  { %10267 = vpow2.f32 %v8475_v31 }
 0xc54   :  { %v10266_v34 = vpop.eup %10265 }
 0xc55   :  { %v6271_v52 = vmul.f32 %v10266_v34, %v6269_v48  ;;  %v10268_v17 = vpop.eup %10267 }
 0xc56   :  { %v6195_v6 = vadd.f32 1.0, %v10268_v17 }
 0xc57   :  { %v6272_v51 = vadd.f32 %v6271_v52, %v11805_v5 }
 0xc59   :  { %10269 = vtanh.f32 %v6272_v51 }
 0xc5a   :  { %10271 = vrcp.f32 %v6195_v6 }
 0xc66   :  { %v10270_v0 = vpop.eup %10269 }
 0xc67   :  { %v6275_v15 = vrot.slane %v10270_v0, 2  ;;  %v10272_v62 = vpop.eup %10271 }
 0xc69   :  { %v6277_v19 = vsub.f32 %v6033_v47, %v6275_v15 }
 0xc6b   :  { %v6279_v29 = vrot.slane %v6277_v19, 6 }
 0xc6d   :  { %v6281_v55 = vmul.f32 %v10272_v62, %v6279_v29 }
 0xc6f   :  { %v6282_v4 = vadd.f32 %v10270_v0, %v6281_v55 }
 0xc71   :  { %v6284_v40 = vrot.slane %v6282_v4, 6 }
 0xc73   :  { %9826 = vmatmul.mubr.msk.f32.vlgmr.msra.gmra.mxu0 %vm85_vm0, %v6284_v40  ;;  %9837 = vmatmul.mubr.msk.f32.vlgmr.msra.gmra.mxu1 %vm85_vm0, %v6284_v40 }
 0xc74   :  { %9840 = vmatpush3.msra.mxu0 %v11731_v37  ;;  %9847 = vmatprep.mubr.msk.f32.mxu0 %vm10349_vm1, %v10348_v28 }
 0xc75   :  { %9841 = vmatprep.subr.mxu0 %v10348_v28  ;;  %9851 = vmatpush3.msra.mxu1 %v11696_v23 }
 0xc76   :  { %9842 = vmatpush3.msra.mxu0 %v11741_v21  ;;  %9852 = vmatprep.subr.mxu1 %v10348_v28 }
 0xc77   :  { %9843 = vmatprep.subr.mxu0 %v10348_v28  ;;  %9853 = vmatpush3.msra.mxu1 %v11704_v3 }
 0xc78   :  { %9844 = vmatpush3.msra.mxu0 %v11750_v39  ;;  %9854 = vmatprep.subr.mxu1 %v10348_v28 }
 0xc79   :  { %9845 = vmatprep.subr.mxu0 %v10348_v28  ;;  %9855 = vmatpush3.msra.mxu1 %v11713_v49 }
 0xc7a   :  { %9846 = vmatpush3.msra.mxu0 %v11760_v27  ;;  %9856 = vmatprep.subr.mxu1 %v10348_v28 }
 0xc7b   :  { %9848 = vmatmul.mubr.msk.f32.vlgmr.msra.gmra.mxu0 %vm85_vm0, %v6284_v40  ;;  %9861 = vmatprep.subr.mxu0 %v10348_v28 }
 0xc7c   :  { %9862 = vmatpush3.msra.mxu0 %v11650_v18  ;;  %9857 = vmatpush3.msra.mxu1 %v11722_v36 }
 0xc7d   :  { %9863 = vmatprep.subr.mxu0 %v10348_v28  ;;  %9858 = vmatprep.mubr.msk.f32.mxu1 %vm10349_vm1, %v10348_v28 }
 0xc7e   :  { %9864 = vmatpush3.msra.mxu0 %v11662_v8  ;;  %9869 = vmatprep.mubr.msk.f32.mxu0 %vm10349_vm1, %v10348_v28 }
 0xc7f   :  { %9865 = vmatprep.subr.mxu0 %v10348_v28  ;;  %9872 = vmatprep.subr.mxu1 %v10348_v28 }
 0xc80   :  { %9866 = vmatpush3.msra.mxu0 %v11672_v16 }
 0xc81   :  { %9867 = vmatprep.subr.mxu0 %v10348_v28 }
 0xc82   :  { %9868 = vmatpush3.msra.mxu0 %v11682_v14 }
 0xc83   :  { %9883 = vmatprep.subr.mxu0 %v10348_v28 }
 0xd33   :  { %v6353_v5 = vpop.f32.mrf.mxu0  ;;  %v6423_v41 = vpop.f32.mrf.mxu1 }
 0xd34   :  { %v6427_v42 = vadd.f32 %v6353_v5, %v11781_v43  ;;  %v6434_v50 = vadd.f32 %v6423_v41, %v11786_v59 }
 0xd35   :  { %v9827_v1 = vpop.f32.mrf.mxu0  ;;  %v9838_v44 = vpop.f32.mrf.mxu1 }
 0xd36   :  { %v8479_v45 = vmul.f32 -1.442695, %v6427_v42  ;;  %v8480_v24 = vmul.f32 -1.442695, %v6434_v50 }
 0xd38   :  { %10273 = vpow2.f32 %v8479_v45 }
 0xd3b   :  { %v6507_v46 = vpop.f32.mrf.mxu0 }
 0xd3c   :  { %v6508_v9 = vadd.f32 %v11802_v60, %v6507_v46 }
 0xd3d   :  { %v9849_v56 = vpop.f32.mrf.mxu0 }
 0xd45   :  { %v10274_v53 = vpop.eup %10273 }
 0xd46   :  { %v6431_v2 = vadd.f32 1.0, %v10274_v53 }
 0xd48   :  { %10275 = vrcp.f32 %v6431_v2 }
 0xd49   :  { %10277 = vpow2.f32 %v8480_v24 }
 0xd55   :  { %v10276_v26 = vpop.eup %10275 }
 0xd56   :  { %v6511_v47 = vmul.f32 %v10276_v26, %v6508_v9  ;;  %v10278_v35 = vpop.eup %10277 }
 0xd57   :  { %v6438_v58 = vadd.f32 1.0, %v10278_v35 }
 0xd58   :  { %v6512_v25 = vadd.f32 %v6511_v47, %v11791_v22 }
 0xd5a   :  { %10279 = vtanh.f32 %v6512_v25 }
 0xd5b   :  { %10281 = vrcp.f32 %v6438_v58 }
 0xd67   :  { %v10280_v63 = vpop.eup %10279 }
 0xd68   :  { %v6515_v20 = vrot.slane %v10280_v63, 2  ;;  %v10282_v54 = vpop.eup %10281 }
 0xd6a   :  { %v6517_v7 = vsub.f32 %v6282_v4, %v6515_v20 }
 0xd6c   :  { %v6519_v10 = vrot.slane %v6517_v7, 6 }
 0xd6e   :  { %v6521_v38 = vmul.f32 %v10282_v54, %v6519_v10 }
 0xd70   :  { %v6522_v57 = vadd.f32 %v10280_v63, %v6521_v38 }
 0xd72   :  { %9859 = vmatmul.mubr.msk.f32.vlgmr.msra.gmra.mxu1 %vm85_vm0, %v6522_v57  ;;  %9870 = vmatmul.mubr.msk.f32.vlgmr.msra.gmra.mxu0 %vm85_vm0, %v6522_v57 }
 0xd73   :  { %9873 = vmatpush3.msra.mxu1 %v11731_v37  ;;  %9880 = vmatprep.mubr.msk.f32.mxu1 %vm10349_vm1, %v10348_v28 }
 0xd74   :  { %9874 = vmatprep.subr.mxu1 %v10348_v28  ;;  %9884 = vmatpush3.msra.mxu0 %v11696_v23 }
 0xd75   :  { %9875 = vmatpush3.msra.mxu1 %v11741_v21  ;;  %9885 = vmatprep.subr.mxu0 %v10348_v28 }
 0xd76   :  { %9876 = vmatprep.subr.mxu1 %v10348_v28  ;;  %9886 = vmatpush3.msra.mxu0 %v11704_v3 }
 0xd77   :  { %9877 = vmatpush3.msra.mxu1 %v11750_v39  ;;  %9887 = vmatprep.subr.mxu0 %v10348_v28 }
 0xd78   :  { %9878 = vmatprep.subr.mxu1 %v10348_v28  ;;  %9888 = vmatpush3.msra.mxu0 %v11713_v49 }
 0xd79   :  { %9879 = vmatpush3.msra.mxu1 %v11760_v27  ;;  %9889 = vmatprep.subr.mxu0 %v10348_v28 }
 0xd7a   :  { %9881 = vmatmul.mubr.msk.f32.vlgmr.msra.gmra.mxu1 %vm85_vm0, %v6522_v57  ;;  %9894 = vmatprep.subr.mxu1 %v10348_v28 }
 0xd7b   :  { %9895 = vmatpush3.msra.mxu1 %v11650_v18  ;;  %9890 = vmatpush3.msra.mxu0 %v11722_v36 }
 0xd7c   :  { %9896 = vmatprep.subr.mxu1 %v10348_v28  ;;  %9891 = vmatprep.mubr.msk.f32.mxu0 %vm10349_vm1, %v10348_v28 }
 0xd7d   :  { %9897 = vmatpush3.msra.mxu1 %v11662_v8  ;;  %9902 = vmatprep.mubr.msk.f32.mxu1 %vm10349_vm1, %v10348_v28 }
 0xd7e   :  { %9898 = vmatprep.subr.mxu1 %v10348_v28  ;;  %9905 = vmatprep.subr.mxu0 %v10348_v28 }
 0xd7f   :  { %9899 = vmatpush3.msra.mxu1 %v11672_v16 }
 0xd80   :  { %9900 = vmatprep.subr.mxu1 %v10348_v28 }
 0xd81   :  { %9901 = vmatpush3.msra.mxu1 %v11682_v14 }
 0xd82   :  { %9916 = vmatprep.subr.mxu1 %v10348_v28 }
 0xe32   :  { %v6592_v30 = vpop.f32.mrf.mxu1  ;;  %v6662_v32 = vpop.f32.mrf.mxu0 }
 0xe33   :  { %v6667_v61 = vrot.slane %v6592_v30, 6  ;;  %v6677_v51 = vrot.slane %v6662_v32, 6 }
 0xe34   :  { %v9860_v33 = vpop.f32.mrf.mxu1  ;;  %v9871_v31 = vpop.f32.mrf.mxu0 }
 0xe35   :  { %v6669_v11 = vadd.f32 %v6667_v61, %v11781_v43  ;;  %v6679_v17 = vadd.f32 %v6677_v51, %v11786_v59  ;;  %v8505_v51 = vld [vmem:[%s12298_s15 + $0x28] sm:$0xff] }
 0xe37   :  { %v8484_v48 = vmul.f32 -1.442695, %v6669_v11  ;;  %v8485_v15 = vmul.f32 -1.442695, %v6679_v17  ;;  %v7275_v11 = vld [vmem:[%s12298_s15 + $0x10] sm:$0xff]  ;;  %v7269_v17 = vld [vmem:[%s12297_s14] sm:$0xff] }
 0xe39   :  { %10283 = vpow2.f32 %v8484_v48  ;;  %v7274_v48 = vld [vmem:[%s12298_s15 + $0x8] sm:$0xff] }
 0xe3a   :  { %v6752_v34 = vpop.f32.mrf.mxu1 }
 0xe3b   :  { %v6753_v19 = vadd.f32 %v11802_v60, %v6752_v34  ;;  %v8506_v34 = vld [vmem:[%s12298_s15 + $0x30] sm:$0xff] }
 0xe3c   :  { %v9882_v52 = vpop.f32.mrf.mxu1 }
 0xe3d   :  { %v6757_v29 = vrot.slane %v6753_v19, 6  ;;  %v7270_v52 = vld [vmem:[%s12297_s14 + $0x8] sm:$0xff]  ;;  %v8519_v19 = vld [vmem:[%s12298_s15 + $0x58] sm:$0xff] }
 0xe46   :  { %v10284_v6 = vpop.eup %10283 }
 0xe47   :  { %v6673_v0 = vadd.f32 1.0, %v10284_v6  ;;  %v8504_v6 = vld [vmem:[%s12298_s15 + $0x20] sm:$0xff] }
 0xe49   :  { %10285 = vrcp.f32 %v6673_v0  ;;  %v7348_v0 = vrot.slane %v11600_v12, 6  ;;  %v8502_v12 = vld [vmem:[%s12297_s14 + $0x30] sm:$0xff] }
 0xe4a   :  { %10287 = vpow2.f32 %v8485_v15  ;;  %v8503_v15 = vld [vmem:[%s12297_s14 + $0x38] sm:$0xff] }
 0xe56   :  { %v10286_v62 = vpop.eup %10285 }
 0xe57   :  { %v6759_v55 = vmul.f32 %v10286_v62, %v6757_v29  ;;  %v10288_v40 = vpop.eup %10287  ;;  %v8518_v29 = vld [vmem:[%s12298_s15 + $0x50] sm:$0xff]  ;;  %v8501_v62 = vld [vmem:[%s12297_s14 + $0x28] sm:$0xff] }
 0xe58   :  { %v6683_v5 = vadd.f32 1.0, %v10288_v40  ;;  %v8516_v40 = vld [vmem:[%s12298_s15 + $0x40] sm:$0xff] }
 0xe59   :  { %v6760_v4 = vadd.f32 %v6759_v55, %v11791_v22  ;;  %v8517_v55 = vld [vmem:[%s12298_s15 + $0x48] sm:$0xff] }
 0xe5b   :  { %10289 = vtanh.f32 %v6760_v4  ;;  %v8500_v4 = vld [vmem:[%s12297_s14 + $0x20] sm:$0xff] }
 0xe5c   :  { %10291 = vrcp.f32 %v6683_v5  ;;  %v8515_v5 = vld [vmem:[%s12297_s14 + $0x58] sm:$0xff] }
 0xe68   :  { %v10290_v41 = vpop.eup %10289 }
 0xe69   :  { %v6763_v42 = vrot.slane %v10290_v41, 2  ;;  %v10292_v45 = vpop.eup %10291 }
 0xe6b   :  { %v6765_v1 = vsub.f32 %v6522_v57, %v6763_v42  ;;  %v8514_v42 = vld [vmem:[%s12297_s14 + $0x50] sm:$0xff] }
 0xe6d   :  { %v6767_v44 = vrot.slane %v6765_v1, 6  ;;  %v7756_v1 = vld [vmem:[%s12299_s16 + $0x10] sm:$0xff] }
 0xe6f   :  { %v6769_v46 = vmul.f32 %v10292_v45, %v6767_v44  ;;  %v7755_v44 = vld [vmem:[%s12299_s16 + $0x8] sm:$0xff]  ;;  %v8512_v45 = vld [vmem:[%s12297_s14 + $0x40] sm:$0xff] }
 0xe71   :  { %v6770_v56 = vadd.f32 %v10290_v41, %v6769_v46  ;;  %v7757_v41 = vld [vmem:[%s12299_s16 + $0x18] sm:$0xff]  ;;  %v7754_v46 = vld [vmem:[%s12299_s16] sm:$0xff] }
 0xe73   :  { %v6772_v50 = vrot.slane %v6770_v56, 2 }
 0xe75   :  { %9892 = vmatmul.mubr.msk.f32.vlgmr.msra.gmra.mxu0 %vm85_vm0, %v6772_v50  ;;  %9903 = vmatmul.mubr.msk.f32.vlgmr.msra.gmra.mxu1 %vm85_vm0, %v6772_v50 }
 0xe76   :  { %9906 = vmatpush3.msra.mxu0 %v11731_v37  ;;  %9913 = vmatprep.mubr.msk.f32.mxu0 %vm10349_vm1, %v10348_v28 }
 0xe77   :  { %9907 = vmatprep.subr.mxu0 %v10348_v28  ;;  %9917 = vmatpush3.msra.mxu1 %v11696_v23 }
 0xe78   :  { %9908 = vmatpush3.msra.mxu0 %v11741_v21  ;;  %9918 = vmatprep.subr.mxu1 %v10348_v28 }
 0xe79   :  { %9909 = vmatprep.subr.mxu0 %v10348_v28  ;;  %9919 = vmatpush3.msra.mxu1 %v11704_v3 }
 0xe7a   :  { %9910 = vmatpush3.msra.mxu0 %v11750_v39  ;;  %9920 = vmatprep.subr.mxu1 %v10348_v28 }
 0xe7b   :  { %9911 = vmatprep.subr.mxu0 %v10348_v28  ;;  %9921 = vmatpush3.msra.mxu1 %v11713_v49 }
 0xe7c   :  { %9912 = vmatpush3.msra.mxu0 %v11760_v27  ;;  %9922 = vmatprep.subr.mxu1 %v10348_v28 }
 0xe7d   :  { %9914 = vmatmul.mubr.msk.f32.vlgmr.msra.gmra.mxu0 %vm85_vm0, %v6772_v50  ;;  %9927 = vmatprep.subr.mxu0 %v10348_v28  ;;  %v8532_v50 = vld [vmem:[%s12299_s16 + $0x58] sm:$0xff] }
 0xe7e   :  { %9928 = vmatpush3.msra.mxu0 %v11650_v18  ;;  %9923 = vmatpush3.msra.mxu1 %v11722_v36 }
 0xe7f   :  { %9929 = vmatprep.subr.mxu0 %v10348_v28  ;;  %9924 = vmatprep.mubr.msk.f32.mxu1 %vm10349_vm1, %v10348_v28 }
 0xe80   :  { %9930 = vmatpush3.msra.mxu0 %v11662_v8  ;;  %9935 = vmatprep.mubr.msk.f32.mxu0 %vm10349_vm1, %v10348_v28 }
 0xe81   :  { %9931 = vmatprep.subr.mxu0 %v10348_v28  ;;  %9938 = vmatprep.subr.mxu1 %v10348_v28 }
 0xe82   :  { %9932 = vmatpush3.msra.mxu0 %v11672_v16 }
 0xe83   :  { %9933 = vmatprep.subr.mxu0 %v10348_v28 }
 0xe84   :  { %9934 = vmatpush3.msra.mxu0 %v11682_v14 }
 0xe85   :  { %9949 = vmatprep.subr.mxu0 %v10348_v28 }
 0xf35   :  { %v6841_v18 = vpop.f32.mrf.mxu0  ;;  %v6911_v23 = vpop.f32.mrf.mxu1 }
 0xf36   :  { %v6916_v3 = vrot.slane %v6841_v18, 4  ;;  %v6926_v9 = vrot.slane %v6911_v23, 4  ;;  %v8527_v18 = vld [vmem:[%s12299_s16 + $0x30] sm:$0xff] }
 0xf37   :  { %v9893_v49 = vpop.f32.mrf.mxu0  ;;  %v9904_v8 = vpop.f32.mrf.mxu1  ;;  %v8531_v23 = vld [vmem:[%s12299_s16 + $0x50] sm:$0xff] }
 0xf38   :  { %v6918_v36 = vadd.f32 %v6916_v3, %v11781_v43  ;;  %v6928_v16 = vadd.f32 %v6926_v9, %v11786_v59  ;;  %v8526_v3 = vld [vmem:[%s12299_s16 + $0x28] sm:$0xff]  ;;  %v8525_v8 = vld [vmem:[%s12299_s16 + $0x20] sm:$0xff] }
 0xf39   :  { %v8530_v49 = vld [vmem:[%s12299_s16 + $0x48] sm:$0xff]  ;;  %v7998_v9 = vld [vmem:[%s12302_s19] sm:$0xff] }
 0xf3a   :  { %v8489_v53 = vmul.f32 -1.442695, %v6918_v36  ;;  %v8490_v14 = vmul.f32 -1.442695, %v6928_v16  ;;  %v8529_v36 = vld [vmem:[%s12299_s16 + $0x40] sm:$0xff]  ;;  %v8005_v16 = vld [vmem:[%s12303_s20 + $0x18] sm:$0xff] }
 0xf3c   :  { %10293 = vpow2.f32 %v8489_v53  ;;  %v8001_v53 = vld [vmem:[%s12302_s19 + $0x18] sm:$0xff] }
 0xf3d   :  { %v7001_v2 = vpop.f32.mrf.mxu0 }
 0xf3e   :  { %v7002_v25 = vadd.f32 %v11802_v60, %v7001_v2  ;;  %v7276_v60 = vld [vmem:[%s12298_s15 + $0x18] sm:$0xff]  ;;  %v8000_v2 = vld [vmem:[%s12302_s19 + $0x10] sm:$0xff] }
 0xf3f   :  { %v9915_v24 = vpop.f32.mrf.mxu0 }
 0xf40   :  { %v7006_v35 = vrot.slane %v7002_v25, 4  ;;  %v7999_v24 = vld [vmem:[%s12302_s19 + $0x8] sm:$0xff] }
 0xf49   :  { %v10294_v26 = vpop.eup %10293 }
 0xf4a   :  { %v6922_v47 = vadd.f32 1.0, %v10294_v26  ;;  %v8004_v26 = vld [vmem:[%s12303_s20 + $0x10] sm:$0xff] }
 0xf4c   :  { %10295 = vrcp.f32 %v6922_v47  ;;  %v8003_v47 = vld [vmem:[%s12303_s20 + $0x8] sm:$0xff] }
 0xf4d   :  { %10297 = vpow2.f32 %v8490_v14  ;;  %v8002_v14 = vld [vmem:[%s12303_s20] sm:$0xff] }
 0xf59   :  { %v10296_v58 = vpop.eup %10295 }
 0xf5a   :  { %v7008_v63 = vmul.f32 %v10296_v58, %v7006_v35  ;;  %v10298_v7 = vpop.eup %10297 }
 0xf5b   :  { %v6932_v10 = vadd.f32 1.0, %v10298_v7 }
 0xf5c   :  { %v7009_v20 = vadd.f32 %v7008_v63, %v11791_v22 }
 0xf5e   :  { %10299 = vtanh.f32 %v7009_v20 }
 0xf5f   :  { %10301 = vrcp.f32 %v6932_v10 }
 0xf6b   :  { %v10300_v54 = vpop.eup %10299 }
 0xf6c   :  { %v7012_v38 = vrot.slane %v10300_v54, 2  ;;  %v10302_v32 = vpop.eup %10301 }
 0xf6e   :  { %v7014_v57 = vsub.f32 %v6770_v56, %v7012_v38  ;;  %v8528_v56 = vld [vmem:[%s12299_s16 + $0x38] sm:$0xff]  ;;  %s8168_s16 = sshll.u32 %s10350_s30, 4  ;;  %s8169_s16 = int_to_ptr.vmem [resolvable:$true] %s8168_s16 }
 0xf6f   :  { %s10326_s3 = scalar_lea.vmem %s8169_s16, 32  ;;  %p10331_p1 = scmp.lt.s32.totalorder %s8169_s16, %s8169_s16 }
 0xf70   :  { %v7016_v30 = vrot.slane %v7014_v57, 6  ;;  %p10327_p0 = scmp.ne.s32.totalorder %s8169_s16, %s10326_s3  ;;  %p10332_p2 = scmp.lt.s32.totalorder %s10326_s3, %s10326_s3 }
 0xf72   :  { %v7018_v61 = vmul.f32 %v10302_v32, %v7016_v30  ;;  %p10333_p3 = por %p10332_p2, %p10331_p1 }
 0xf74   :  { %v12030_v33 = vadd.f32 %v10300_v54, %v7018_v61  ;;  %p10334_p4 = pnand %p10333_p3, %p10327_p0 }
 0xf76   :  { %v7021_v31 = vrot.slane %v12030_v33, 4 }
 0xf78   :  { %9925 = vmatmul.mubr.msk.f32.vlgmr.msra.gmra.mxu1 %vm85_vm0, %v7021_v31  ;;  %9936 = vmatmul.mubr.msk.f32.vlgmr.msra.gmra.mxu0 %vm85_vm0, %v7021_v31 }
 0xf79   :  { %9939 = vmatpush3.msra.mxu1 %v11731_v37  ;;  %9950 = vmatpush3.msra.mxu0 %v7276_v60  ;;  %v7273_v37 = vld [vmem:[%s12298_s15] sm:$0xff] }
 0xf7a   :  { %9940 = vmatprep.subr.mxu1 %v10348_v28  ;;  %9951 = vmatprep.subr.mxu0 %v10348_v28 }
 0xf7b   :  { %9941 = vmatpush3.msra.mxu1 %v11741_v21  ;;  %9952 = vmatpush3.msra.mxu0 %v7275_v11  ;;  %v7272_v21 = vld [vmem:[%s12297_s14 + $0x18] sm:$0xff] }
 0xf7c   :  { %9942 = vmatprep.subr.mxu1 %v10348_v28  ;;  %9953 = vmatprep.subr.mxu0 %v10348_v28 }
 0xf7d   :  { %9943 = vmatpush3.msra.mxu1 %v11750_v39  ;;  %9954 = vmatpush3.msra.mxu0 %v7274_v48  ;;  %v8507_v39 = vld [vmem:[%s12298_s15 + $0x38] sm:$0xff] }
 0xf7e   :  { %9944 = vmatprep.subr.mxu1 %v10348_v28  ;;  %9955 = vmatprep.subr.mxu0 %v10348_v28 }
 0xf7f   :  { %9945 = vmatpush3.msra.mxu1 %v11760_v27  ;;  %9946 = vmatprep.mubr.msk.f32.mxu1 %vm10349_vm1, %v10348_v28  ;;  %v7271_v27 = vld [vmem:[%s12297_s14 + $0x10] sm:$0xff] }
 0xf80   :  { %9956 = vmatpush3.msra.mxu0 %v7273_v37  ;;  %9957 = vmatprep.mubr.msk.f32.mxu0 %vm10349_vm1, %v10348_v28 }
 0xf81   :  { %9947 = vmatmul.mubr.msk.f32.vlgmr.msra.gmra.mxu1 %vm85_vm0, %v7021_v31  ;;  %9958 = vmatmul.mubr.msk.f32.vlgmr.msra.gmra.mxu0 %vm85_vm0, %v10879_v13 }
 0xf82   :  { %9960 = vmatprep.subr.mxu1 %v10348_v28  ;;  %9971 = vmatprep.subr.mxu0 %v10348_v28 }
 0xf83   :  { %9961 = vmatpush3.msra.mxu1 %v7272_v21  ;;  %9972 = vmatpush3.msra.mxu0 %v8507_v39 }
 0xf84   :  { %9962 = vmatprep.subr.mxu1 %v10348_v28  ;;  %9973 = vmatprep.subr.mxu0 %v10348_v28 }
 0xf85   :  { %9963 = vmatpush3.msra.mxu1 %v7271_v27  ;;  %9974 = vmatpush3.msra.mxu0 %v8506_v34  ;;  %v10325_v27 = vld [vmem:[%s12296_s13] ss:$0 sm:$0xff] }
 0xf86   :  { %9964 = vmatprep.subr.mxu1 %v10348_v28  ;;  %9975 = vmatprep.subr.mxu0 %v10348_v28 }
 0xf87   :  { %9965 = vmatpush3.msra.mxu1 %v7270_v52  ;;  %9976 = vmatpush3.msra.mxu0 %v8505_v51 }
 0xf88   :  { %9966 = vmatprep.subr.mxu1 %v10348_v28  ;;  %9977 = vmatprep.subr.mxu0 %v10348_v28 }
 0xf89   :  { %9967 = vmatpush3.msra.mxu1 %v7269_v17  ;;  %9968 = vmatprep.mubr.msk.f32.mxu1 %vm10349_vm1, %v10348_v28 }
 0xf8a   :  { %9978 = vmatpush3.msra.mxu0 %v8504_v6  ;;  %9979 = vmatprep.mubr.msk.f32.mxu0 %vm10349_vm1, %v10348_v28  ;;  %v8499_v6 = vld [vmem:[%s12300_s17] ss:$0 sm:$0xff] }
 0xf8b   :  { %9969 = vmatmul.mubr.msk.f32.vlgmr.msra.gmra.mxu1 %vm85_vm0, %v7348_v0  ;;  %9980 = vmatmul.mubr.msk.f32.vlgmr.msra.gmra.mxu0 %vm85_vm0, %v10879_v13 }
 0xf8c   :  { %9982 = vmatprep.subr.mxu1 %v10348_v28  ;;  %9993 = vmatprep.subr.mxu0 %v10348_v28 }
 0xf8d   :  { %9983 = vmatpush3.msra.mxu1 %v8503_v15  ;;  %9994 = vmatpush3.msra.mxu0 %v8519_v19 }
 0xf8e   :  { %9984 = vmatprep.subr.mxu1 %v10348_v28  ;;  %9995 = vmatprep.subr.mxu0 %v10348_v28 }
 0xf8f   :  { %9985 = vmatpush3.msra.mxu1 %v8502_v12  ;;  %9996 = vmatpush3.msra.mxu0 %v8518_v29 }
 0xf90   :  { %9986 = vmatprep.subr.mxu1 %v10348_v28  ;;  %9997 = vmatprep.subr.mxu0 %v10348_v28 }
 0xf91   :  { %9987 = vmatpush3.msra.mxu1 %v8501_v62  ;;  %9998 = vmatpush3.msra.mxu0 %v8517_v55 }
 0xf92   :  { %9988 = vmatprep.subr.mxu1 %v10348_v28  ;;  %9999 = vmatprep.subr.mxu0 %v10348_v28 }
 0xf93   :  { %9989 = vmatpush3.msra.mxu1 %v8500_v4  ;;  %9990 = vmatprep.mubr.msk.f32.mxu1 %vm10349_vm1, %v10348_v28 }
 0xf94   :  { %10000 = vmatpush3.msra.mxu0 %v8516_v40  ;;  %10001 = vmatprep.mubr.msk.f32.mxu0 %vm10349_vm1, %v10348_v28 }
 0xf95   :  { %9991 = vmatmul.mubr.msk.f32.vlgmr.msra.gmra.mxu1 %vm85_vm0, %v7348_v0  ;;  %10002 = vmatmul.mubr.msk.f32.vlgmr.msra.gmra.mxu0 %vm85_vm0, %v10879_v13  ;;  %v8513_v13 = vld [vmem:[%s12297_s14 + $0x48] sm:$0xff] }
 0xf96   :  { %10004 = vmatprep.subr.mxu1 %v10348_v28  ;;  %10015 = vmatprep.subr.mxu0 %v10348_v28 }
 0xf97   :  { %10005 = vmatpush3.msra.mxu1 %v8515_v5  ;;  %10016 = vmatpush3.msra.mxu0 %v7757_v41 }
 0xf98   :  { %10006 = vmatprep.subr.mxu1 %v10348_v28  ;;  %10017 = vmatprep.subr.mxu0 %v10348_v28 }
 0xf99   :  { %10007 = vmatpush3.msra.mxu1 %v8514_v42  ;;  %10018 = vmatpush3.msra.mxu0 %v7756_v1 }
 0xf9a   :  { %10008 = vmatprep.subr.mxu1 %v10348_v28  ;;  %10019 = vmatprep.subr.mxu0 %v10348_v28 }
 0xf9b   :  { %10009 = vmatpush3.msra.mxu1 %v8513_v13  ;;  %10020 = vmatpush3.msra.mxu0 %v7755_v44  ;;  %v8511_v13 = vld [vmem:[%s12300_s17 + $0x1] ss:$0 sm:$0xff] }
 0xf9c   :  { %10010 = vmatprep.subr.mxu1 %v10348_v28  ;;  %10021 = vmatprep.subr.mxu0 %v10348_v28 }
 0xf9d   :  { %10011 = vmatpush3.msra.mxu1 %v8512_v45  ;;  %10012 = vmatprep.mubr.msk.f32.mxu1 %vm10349_vm1, %v10348_v28 }
 0xf9e   :  { %10022 = vmatpush3.msra.mxu0 %v7754_v46  ;;  %10023 = vmatprep.mubr.msk.f32.mxu0 %vm10349_vm1, %v10348_v28 }
 0xf9f   :  { %10013 = vmatmul.mubr.msk.f32.vlgmr.msra.gmra.mxu1 %vm85_vm0, %v7348_v0  ;;  %10024 = vmatmul.mubr.f32.vlgmr.msra.gmra.mxu0 %v10348_v28 }
 0xfa0   :  { %10026 = vmatprep.subr.mxu1 %v10348_v28  ;;  %10034 = vmatprep.mubr.msk.f32.mxu1 %vm10349_vm1, %v10348_v28 }
 0xfa1   :  { %10027 = vmatpush3.msra.mxu1 %v8528_v56  ;;  %10037 = vmatprep.subr.mxu0 %v10348_v28 }
 0xfa2   :  { %10028 = vmatprep.subr.mxu1 %v10348_v28  ;;  %10038 = vmatpush3.msra.mxu0 %v8532_v50 }
 0xfa3   :  { %10029 = vmatpush3.msra.mxu1 %v8527_v18  ;;  %10039 = vmatprep.subr.mxu0 %v10348_v28 }
 0xfa4   :  { %10030 = vmatprep.subr.mxu1 %v10348_v28  ;;  %10040 = vmatpush3.msra.mxu0 %v8531_v23 }
 0xfa5   :  { %10031 = vmatpush3.msra.mxu1 %v8526_v3  ;;  %10041 = vmatprep.subr.mxu0 %v10348_v28 }
 0xfa6   :  { %10032 = vmatprep.subr.mxu1 %v10348_v28  ;;  %10042 = vmatpush3.msra.mxu0 %v8530_v49 }
 0xfa7   :  { %10033 = vmatpush3.msra.mxu1 %v8525_v8  ;;  %10043 = vmatprep.subr.mxu0 %v10348_v28 }
 0xfa8   :  { %10035 = vmatmul.mubr.f32.vlgmr.msra.gmra.mxu1 %v10348_v28  ;;  %10044 = vmatpush3.msra.mxu0 %v8529_v36 }
 0xfa9   :  { %10045 = vmatprep.mubr.msk.f32.mxu0 %vm10349_vm1, %v10348_v28  ;;  %10059 = vmatprep.subr.mxu0 %v10348_v28 }
 0xfaa   :  { %10046 = vmatmul.mubr.f32.vlgmr.msra.gmra.mxu0 %v10348_v28  ;;  %10048 = vmatprep.subr.mxu1 %v10348_v28 }
 0xfab   :  { %10067 = vmatprep.mubr.msk.f32.mxu0 %vm10349_vm1, %v10348_v28  ;;  %10056 = vmatprep.mubr.msk.f32.mxu1 %vm10349_vm1, %v10348_v28 }
 0xfac   :  { %10060 = vmatpush3.msra.mxu0 %v8001_v53  ;;  %10049 = vmatpush3.msra.mxu1 %v8005_v16 }
 0xfad   :  { %10061 = vmatprep.subr.mxu0 %v10348_v28  ;;  %10050 = vmatprep.subr.mxu1 %v10348_v28 }
 0xfae   :  { %10062 = vmatpush3.msra.mxu0 %v8000_v2  ;;  %10051 = vmatpush3.msra.mxu1 %v8004_v26  ;;  %v8524_v26 = vld [vmem:[%s12301_s18] ss:$0 sm:$0xff] }
 0xfaf   :  { %10063 = vmatprep.subr.mxu0 %v10348_v28  ;;  %10052 = vmatprep.subr.mxu1 %v10348_v28 }
 0xfb0   :  { %10064 = vmatpush3.msra.mxu0 %v7999_v24  ;;  %10053 = vmatpush3.msra.mxu1 %v8003_v47 }
 0xfb1   :  { %10065 = vmatprep.subr.mxu0 %v10348_v28  ;;  %10054 = vmatprep.subr.mxu1 %v10348_v28 }
 0xfb2   :  { %10066 = vmatpush3.msra.mxu0 %v7998_v9  ;;  %10055 = vmatpush3.msra.mxu1 %v8002_v14 }
0x1038   :  { %v7090_v25 = vpop.f32.mrf.mxu1  ;;  %v7160_v35 = vpop.f32.mrf.mxu0 }
0x1039   :  { %v7165_v58 = vrot.slane %v7090_v25, 2  ;;  %v7175_v32 = vrot.slane %v7160_v35, 2 }
0x103a   :  { %v9926_v63 = vpop.f32.mrf.mxu1  ;;  %v9937_v20 = vpop.f32.mrf.mxu0 }
0x103b   :  { %v7167_v7 = vadd.f32 %v7165_v58, %v11781_v43  ;;  %v7177_v61 = vadd.f32 %v7175_v32, %v11786_v59 }
0x103d   :  { %v8494_v10 = vmul.f32 -1.442695, %v7167_v7  ;;  %v8495_v21 = vmul.f32 -1.442695, %v7177_v61 }
0x103f   :  { %10303 = vpow2.f32 %v8494_v10 }
0x1041   :  { %v7250_v54 = vpop.f32.mrf.mxu1  ;;  %v7343_v38 = vpop.f32.mrf.mxu0 }
0x1042   :  { %v7251_v34 = vadd.f32 %v10325_v27, %v7250_v54 }
0x1043   :  { %v9948_v57 = vpop.f32.mrf.mxu1  ;;  %v9959_v30 = vpop.f32.mrf.mxu0 }
0x1044   :  { %v7255_v59 = vrot.slane %v7251_v34, 2 }
0x104b   :  { %v7417_v31 = vpop.f32.mrf.mxu1  ;;  %v7505_v60 = vpop.f32.mrf.mxu0 }
0x104c   :  { %v10304_v28 = vpop.eup %10303  ;;  %v7418_v17 = vadd.f32 %v7417_v31, %v7343_v38 }
0x104d   :  { %v7171_v11 = vadd.f32 1.0, %v10304_v28  ;;  %v9970_v48 = vpop.f32.mrf.mxu1  ;;  %v9981_v37 = vpop.f32.mrf.mxu0 }
0x104e   :  { %v7428_v19 = vadd.f32 %v8499_v6, %v7418_v17 }
0x104f   :  { %10305 = vrcp.f32 %v7171_v11 }
0x1050   :  { %10307 = vpow2.f32 %v8495_v21 }
0x1055   :  { %v7575_v39 = vpop.f32.mrf.mxu1  ;;  %v7664_v43 = vpop.f32.mrf.mxu0 }
0x1056   :  { %v7576_v1 = vadd.f32 %v7575_v39, %v7505_v60  ;;  %v8537_v60 = vld [vmem:[%s12304_s21] ss:$0 sm:$0xff] }
0x1057   :  { %v9992_v52 = vpop.f32.mrf.mxu1  ;;  %v10003_v51 = vpop.f32.mrf.mxu0 }
0x1058   :  { %v7587_v45 = vadd.f32 %v8511_v13, %v7576_v1 }
0x105c   :  { %v10306_v0 = vpop.eup %10305 }
0x105d   :  { %v7257_v15 = vmul.f32 %v10306_v0, %v7255_v59  ;;  %v10308_v55 = vpop.eup %10307 }
0x105e   :  { %v7181_v42 = vadd.f32 1.0, %v10308_v55 }
0x105f   :  { %v7258_v12 = vadd.f32 %v7257_v15, %v11791_v22  ;;  %v7734_v29 = vpop.f32.mrf.mxu1  ;;  %v7824_v62 = vpop.f32.mrf.mxu0 }
0x1060   :  { %v7908_v4 = vadd.f32 %v7824_v62, %v7428_v19  ;;  %v7735_v47 = vadd.f32 %v7734_v29, %v7664_v43 }
0x1061   :  { %10309 = vtanh.f32 %v7258_v12  ;;  %v10014_v40 = vpop.f32.mrf.mxu1  ;;  %v10025_v5 = vpop.f32.mrf.mxu0 }
0x1062   :  { %v8533_v41 = vmul.f32 -1.442695, %v7908_v4 }
0x1064   :  { %10311 = vpow2.f32 %v8533_v41 }
0x1065   :  { %10313 = vrcp.f32 %v7181_v42 }
0x1068   :  { %v7899_v44 = vpop.f32.mrf.mxu1 }
0x1069   :  { %v7915_v56 = vadd.f32 %v7899_v44, %v7587_v45 }
0x106a   :  { %v10036_v46 = vpop.f32.mrf.mxu1  ;;  %v7988_v22 = vpop.f32.mrf.mxu0 }
0x106b   :  { %v8534_v23 = vmul.f32 -1.442695, %v7915_v56  ;;  %v7989_v14 = vadd.f32 %v8524_v26, %v7988_v22 }
0x106c   :  { %v10047_v50 = vpop.f32.mrf.mxu0 }
0x106d   :  { %10315 = vpow2.f32 %v8534_v23 }
0x106e   :  { %v10310_v18 = vpop.eup %10309 }
0x106f   :  { %v7261_v3 = vrot.slane %v10310_v18, 2 }
0x1071   :  { %v10312_v49 = vpop.eup %10311  ;;  %v7263_v8 = vsub.f32 %v12030_v33, %v7261_v3  ;;  %v8523_v33 = vld [vmem:[%s12300_s17 + $0x2] ss:$0 sm:$0xff] }
0x1072   :  { %v7912_v36 = vadd.f32 1.0, %v10312_v49  ;;  %v10314_v2 = vpop.eup %10313  ;;  %v7746_v58 = vadd.f32 %v8523_v33, %v7735_v47 }
0x1073   :  { %v7265_v53 = vrot.slane %v7263_v8, 6 }
0x1074   :  { %10317 = vrcp.f32 %v7912_v36 }
0x1075   :  { %v7267_v24 = vmul.f32 %v10314_v2, %v7265_v53 }
0x1077   :  { %v7268_v9 = vadd.f32 %v10310_v18, %v7267_v24 }
0x1079   :  { %v8080_v16 = vrot.slane %v7268_v9, 6 }
0x107a   :  { %v10316_v25 = vpop.eup %10315 }
0x107b   :  { %10068 = vmatmul.mubr.msk.f32.vlgmr.msra.gmra.mxu0 %vm85_vm0, %v8080_v16  ;;  %v7919_v20 = vadd.f32 1.0, %v10316_v25 }
0x1081   :  { %v10318_v35 = vpop.eup %10317 }
0x1082   :  { %v7992_v63 = vmul.f32 %v10318_v35, %v7989_v14 }
0x1084   :  { %v7993_v7 = vadd.f32 %v7992_v63, %v7746_v58 }
0x1086   :  { %10319 = vtanh.f32 %v7993_v7 }
0x1087   :  { %10321 = vrcp.f32 %v7919_v20 }
0x1093   :  { %v10320_v10 = vpop.eup %10319 }
0x1094   :  { %v7995_v54 = vsub.f32 0.0, %v10320_v10  ;;  %v10322_v38 = vpop.eup %10321 }
0x1096   :  { %v7996_v57 = vmul.f32 %v10322_v38, %v7995_v54 }
0x1098   :  { %v7997_v30 = vadd.f32 %v10320_v10, %v7996_v57 }
0x109a   :  { %10057 = vmatmul.mubr.msk.f32.vlgmr.msra.gmra.mxu1 %vm85_vm0, %v7997_v30 }
0x113b   :  { %v8149_v32 = vpop.f32.mrf.mxu0 }
0x113d   :  { %v10069_v61 = vpop.f32.mrf.mxu0 }
0x115a   :  { %v8075_v31 = vpop.f32.mrf.mxu1 }
0x115b   :  { %v8150_v28 = vadd.f32 %v8149_v32, %v8075_v31 }
0x115c   :  { %v10058_v11 = vpop.f32.mrf.mxu1 }
0x115d   :  { %v8160_v48 = vadd.f32 %v8537_v60, %v8150_v28 }
0x115f   :  { %8161 = vst.msk [vmem:[#allocation4] sm:$0x3] %vm1119_vm2, %v8160_v48 }
0x1160   :  { %10337 = shalt.err (!%p10334_p4)
}
0x1161   :  { %8171 = dma.vmem_to_hbm [thread:$0]  %s8169_s16, 32, %s12305_s22, [#allocation5]  }
0x1162   :  { %10346 = dma.done.wait [#allocation5], 32  }
0x1163   :  { %10347 = vsyncadd [#allocation5], 4294967264 }
0x1164   :  { %8175 = vsyncpa [#allocation5], 1 }

</bundles_post_ra>
